<compile_context>
chip_gen: v5e
topology: v5e:2x2
jax: 0.10.0
libtpu: 0.0.40
codegen_flags: <defaults>
</compile_context>

<pallas_src>
import math

import jax
import jax.numpy as jnp
from jax.experimental import pallas as pl
from jax.experimental.pallas import tpu as pltpu


_UNROLL_T_LIMIT = 16


def _round_up(n, m):
    return ((n + m - 1) // m) * m


def _lstm_kernel(x_ref, w_ref, b_ref, wout_ref, bout_ref, out_ref):
    """x_ref:    (Bp, T, Ip) f32, batch-major.
       w_ref:    (Ip+Hp, 4Hp) stacked [W_ih^T ; W_hh^T] (f32 or bf16).
       b_ref:    (1, 4Hp) f32 fused b_ih + b_hh.
       wout_ref: (Hp, Op); bout_ref: (1, Op); out_ref: (Bp, Op) f32."""
    Bp, T, Ip = x_ref.shape
    Hp = w_ref.shape[1] // 4
    mm_dtype = w_ref.dtype

    def step(x_t, h, c):
        # One MXU push per timestep: [x_t || h] (Bp, Ip+Hp) @ W (Ip+Hp, 4Hp).
        # TODO(synk): keep W resident across steps with explicit MXU driving
        # (pltpu.matmul_push_rhs once, matmul_acc_lhs/matmul_pop per step) to
        # drop the per-step systolic weight fill from the serial h->h chain;
        # needs per-generation handling of the 4Hp>256 output split and
        # MRF-vs-MRB differences, so left to a follow-up.
        xh = jnp.concatenate([x_t, h], axis=1).astype(mm_dtype)
        gates = jnp.dot(xh, w_ref[...],
                        preferred_element_type=jnp.float32) + b_ref[...]
        # sigmoid(z) = 0.5*(1 + tanh(z/2)): one EUP op per gate (no divide).
        i_g = 0.5 * (1.0 + jnp.tanh(0.5 * gates[:, 0 * Hp:1 * Hp]))
        f_g = 0.5 * (1.0 + jnp.tanh(0.5 * gates[:, 1 * Hp:2 * Hp]))
        g_g = jnp.tanh(gates[:, 2 * Hp:3 * Hp])
        o_g = 0.5 * (1.0 + jnp.tanh(0.5 * gates[:, 3 * Hp:4 * Hp]))
        c_new = f_g * c + i_g * g_g
        h_new = o_g * jnp.tanh(c_new)
        return h_new, c_new

    h = jnp.zeros((Bp, Hp), jnp.float32)
    c = jnp.zeros((Bp, Hp), jnp.float32)

    if T <= _UNROLL_T_LIMIT:
        # Short sequences: full static unroll (LLO scheduling visibility).
        for t in range(T):
            h, c = step(x_ref[:, t, :], h, c)
    else:
        # Long sequences: bounded live ranges / instruction memory.
        def body(t, carry):
            h_c, c_c = carry
            x_t = x_ref[:, pl.ds(t, 1), :].reshape(Bp, Ip)
            return step(x_t, h_c, c_c)
        h, c = jax.lax.fori_loop(0, T, body, (h, c), unroll=2)

    # Linear head on the last hidden state only (lane-dense output block).
    out_ref[...] = (
        jnp.dot(h.astype(mm_dtype), wout_ref[...],
                preferred_element_type=jnp.float32) + bout_ref[...]
    ).astype(out_ref.dtype)


def prepare_params(params, matmul_dtype=jnp.float32):
    """One-time weight preparation, hoisted out of the per-call path.

    Pads per gate to lane alignment, transposes, stacks [W_ih^T ; W_hh^T] and
    fuses the two LSTM biases.  matmul_dtype=jnp.bfloat16 halves weight
    VMEM/DMA bytes and doubles MXU rate on v6e/v7x (relax tolerances if used);
    gate math stays f32 in the kernel either way."""
    w_ih, w_hh = params["w_ih"], params["w_hh"]
    w_out, b_out = params["w_out"], params["b_out"]
    H = w_hh.shape[1]
    I = w_ih.shape[1]
    O = w_out.shape[0]
    Ip, Hp, Op = _round_up(I, 128), _round_up(H, 128), _round_up(O, 128)

    def pad_gate_w(w, fan_in, fan_in_p):
        # (4H, fan_in) -> per-gate zero pad -> (4Hp, fan_in_p)
        w4 = w.reshape(4, H, fan_in)
        w4 = jnp.pad(w4, ((0, 0), (0, Hp - H), (0, fan_in_p - fan_in)))
        return w4.reshape(4 * Hp, fan_in_p)

    wih_t = jnp.transpose(pad_gate_w(w_ih, I, Ip))            # (Ip, 4Hp)
    whh_t = jnp.transpose(pad_gate_w(w_hh, H, Hp))            # (Hp, 4Hp)
    w_stacked = jnp.concatenate([wih_t, whh_t], axis=0).astype(matmul_dtype)

    b4 = (params["b_ih"] + params["b_hh"]).reshape(4, H)
    b_p = jnp.pad(b4, ((0, 0), (0, Hp - H))).reshape(1, 4 * Hp)
    b_p = b_p.astype(jnp.float32)

    wout_t = jnp.transpose(
        jnp.pad(w_out, ((0, Op - O), (0, Hp - H)))).astype(matmul_dtype)
    bout_p = jnp.pad(b_out, (0, Op - O)).reshape(1, Op).astype(jnp.float32)

    return dict(w=w_stacked, b=b_p, w_out=wout_t, b_out=bout_p,
                dims=(I, H, O, Ip, Hp, Op))


def lstm_wrapper_forward(x, prepared):
    """x: (B, T, I) float32; prepared: output of prepare_params. -> (B, O)."""
    I, H, O, Ip, Hp, Op = prepared["dims"]
    B, T, I_in = x.shape
    assert I_in == I
    Bp = _round_up(B, 8)

    # Single XLA op before the kernel: batch-major zero pad (no transpose).
    x_p = jnp.pad(x.astype(jnp.float32), ((0, Bp - B), (0, 0), (0, Ip - I)))

    # Explicit VMEM budget from the actual block footprint (x2 for buffering).
    w_itemsize = jnp.dtype(prepared["w"].dtype).itemsize
    vmem_need = (
        Bp * T * Ip * 4
        + (Ip + Hp) * 4 * Hp * w_itemsize
        + 4 * Hp * 4
        + Hp * Op * w_itemsize
        + Op * 4
        + Bp * Op * 4
    )
    vmem_limit = int(min(max(2 * vmem_need + (1 << 20), 16 << 20), 64 << 20))

    # TODO(synk): for production sizes add a T-chunk grid axis ("arbitrary")
    # or pltpu.emit_pipeline to stream x per chunk (v7x: 64 MiB VMEM), and a
    # leading "parallel" batch axis to use both v7x TensorCores at large B;
    # for large B*T, re-hoist the input projection into one batched matmul.
    out_p = pl.pallas_call(
        _lstm_kernel,
        out_shape=jax.ShapeDtypeStruct((Bp, Op), jnp.float32),
        grid=(1,),
        in_specs=[
            pl.BlockSpec((Bp, T, Ip), lambda i: (0, 0, 0)),     # x (batch-major)
            pl.BlockSpec((Ip + Hp, 4 * Hp), lambda i: (0, 0)),  # [Wih^T;Whh^T]
            pl.BlockSpec((1, 4 * Hp), lambda i: (0, 0)),        # b_ih + b_hh
            pl.BlockSpec((Hp, Op), lambda i: (0, 0)),           # W_out^T
            pl.BlockSpec((1, Op), lambda i: (0, 0)),            # b_out
        ],
        out_specs=pl.BlockSpec((Bp, Op), lambda i: (0, 0)),
        compiler_params=pltpu.CompilerParams(
            dimension_semantics=("arbitrary",),
            vmem_limit_bytes=vmem_limit),
    )(x_p, prepared["w"], prepared["b"], prepared["w_out"], prepared["b_out"])

    return out_p[:B, :O]


def init_params(key, input_size, hidden_size, output_size):
    """Deterministic init matching PyTorch's LSTM/Linear reset_parameters
    style (uniform(-1/sqrt(fan), 1/sqrt(fan)))."""
    k = 1.0 / math.sqrt(hidden_size)
    ks = jax.random.split(key, 6)
    w_ih = jax.random.uniform(ks[0], (4 * hidden_size, input_size),
                              jnp.float32, -k, k)
    w_hh = jax.random.uniform(ks[1], (4 * hidden_size, hidden_size),
                              jnp.float32, -k, k)
    b_ih = jax.random.uniform(ks[2], (4 * hidden_size,), jnp.float32, -k, k)
    b_hh = jax.random.uniform(ks[3], (4 * hidden_size,), jnp.float32, -k, k)
    w_out = jax.random.uniform(ks[4], (output_size, hidden_size),
                               jnp.float32, -k, k)
    b_out = jax.random.uniform(ks[5], (output_size,), jnp.float32, -k, k)
    return dict(w_ih=w_ih, w_hh=w_hh, b_ih=b_ih, b_hh=b_hh,
                w_out=w_out, b_out=b_out)


def reference_forward(x, params):
    """Pure-JAX reference (lax.scan LSTM), PyTorch gate order [i,f,g,o]."""
    w_ih, w_hh = params["w_ih"], params["w_hh"]
    b = params["b_ih"] + params["b_hh"]
    H = w_hh.shape[1]
    B = x.shape[0]

    def step(carry, x_t):
        h, c = carry
        gates = x_t @ w_ih.T + h @ w_hh.T + b
        i = jax.nn.sigmoid(gates[:, 0 * H:1 * H])
        f = jax.nn.sigmoid(gates[:, 1 * H:2 * H])
        g = jnp.tanh(gates[:, 2 * H:3 * H])
        o = jax.nn.sigmoid(gates[:, 3 * H:4 * H])
        c = f * c + i * g
        h = o * jnp.tanh(c)
        return (h, c), h

    h0 = jnp.zeros((B, H), jnp.float32)
    (_, _), hs = jax.lax.scan(step, (h0, h0), jnp.transpose(x, (1, 0, 2)))
    h_last = hs[-1]
    return h_last @ params["w_out"].T + params["b_out"]


if __name__ == "__main__":
    # Small shapes consistent with the module's forward:
    # batch=2, seq=8, input_size=32, hidden_size=32, output_size=12.
    B, T, I, H, O = 2, 8, 32, 32, 12
    key = jax.random.PRNGKey(0)
    kx, kp = jax.random.split(key)
    x = jax.random.normal(kx, (B, T, I), jnp.float32)
    params = init_params(kp, I, H, O)

    prepared = prepare_params(params)          # one-time weight prep (hoisted)
    out = lstm_wrapper_forward(x, prepared)
    out = jax.block_until_ready(out)

    ref = reference_forward(x, params)
    assert out.shape == (B, O), out.shape
    max_err = float(jnp.max(jnp.abs(out - ref)))
    assert jnp.allclose(out, ref, atol=1e-4, rtol=1e-4), max_err

    print("KERNEL_OK")
</pallas_src>

<mosaic_0001>
module attributes {stable_mosaic.version = 11 : i64} {
  func.func @_lstm_kernel(%arg0: i32, %arg1: memref<8x8x128xf32, #tpu.memory_space<vmem>>, %arg2: memref<256x512xf32, #tpu.memory_space<vmem>>, %arg3: memref<1x512xf32, #tpu.memory_space<vmem>>, %arg4: memref<128x128xf32, #tpu.memory_space<vmem>>, %arg5: memref<1x128xf32, #tpu.memory_space<vmem>>, %arg6: memref<8x128xf32, #tpu.memory_space<vmem>>) attributes {dimension_semantics = [#tpu.dimension_semantics<arbitrary>], iteration_bounds = array<i64: 1>, scalar_prefetch = 0 : i64, scratch_operands = 0 : i64, tpu.core_type = #tpu.core_type<tc>, window_params = [{pipeline_mode = #tpu.pipeline_mode<synchronous>, transform_indices = @transform_0, window_bounds = array<i64: 8, 8, 128>}, {pipeline_mode = #tpu.pipeline_mode<synchronous>, transform_indices = @transform_1, window_bounds = array<i64: 256, 512>}, {pipeline_mode = #tpu.pipeline_mode<synchronous>, transform_indices = @transform_2, window_bounds = array<i64: 1, 512>}, {pipeline_mode = #tpu.pipeline_mode<synchronous>, transform_indices = @transform_3, window_bounds = array<i64: 128, 128>}, {pipeline_mode = #tpu.pipeline_mode<synchronous>, transform_indices = @transform_4, window_bounds = array<i64: 1, 128>}, {pipeline_mode = #tpu.pipeline_mode<synchronous>, transform_indices = @transform_5, window_bounds = array<i64: 8, 128>}]} {
    %cst = arith.constant 0.000000e+00 : f32
    %0 = vector.broadcast %cst : f32 to vector<8x128xf32>
    %cst_0 = arith.constant 0.000000e+00 : f32
    %1 = vector.broadcast %cst_0 : f32 to vector<8x128xf32>
    %c0 = arith.constant 0 : index
    %c0_1 = arith.constant 0 : index
    %c0_2 = arith.constant 0 : index
    %2 = vector.load %arg1[%c0, %c0_1, %c0_2] : memref<8x8x128xf32, #tpu.memory_space<vmem>>, vector<8x1x128xf32>
    %3 = vector.shape_cast %2 : vector<8x1x128xf32> to vector<8x128xf32>
    %4 = tpu.concatenate %3, %0 in 1 : vector<8x128xf32>, vector<8x128xf32> -> vector<8x256xf32>
    %c0_3 = arith.constant 0 : index
    %c0_4 = arith.constant 0 : index
    %5 = vector.load %arg2[%c0_3, %c0_4] : memref<256x512xf32, #tpu.memory_space<vmem>>, vector<256x512xf32>
    %cst_5 = arith.constant dense<0.000000e+00> : vector<8x512xf32>
    %6 = tpu.matmul %4, %5, %cst_5 {dimension_numbers = #tpu.dot_dimension_numbers<[1], [0], [0], [1], [0, 0, 1, 1], [], []>} : vector<8x256xf32>, vector<256x512xf32>, vector<8x512xf32> -> vector<8x512xf32>
    %c0_6 = arith.constant 0 : index
    %c0_7 = arith.constant 0 : index
    %7 = vector.load %arg3[%c0_6, %c0_7] : memref<1x512xf32, #tpu.memory_space<vmem>>, vector<1x512xf32>
    %8 = vector.broadcast %7 : vector<1x512xf32> to vector<8x512xf32>
    %9 = arith.addf %6, %8 : vector<8x512xf32>
    %10 = vector.extract_strided_slice %9 {offsets = [0, 0], sizes = [8, 128], strides = [1, 1]} : vector<8x512xf32> to vector<8x128xf32>
    %cst_8 = arith.constant 5.000000e-01 : f32
    %11 = vector.broadcast %cst_8 : f32 to vector<8x128xf32>
    %12 = arith.mulf %11, %10 : vector<8x128xf32>
    %13 = math.tanh %12 : vector<8x128xf32>
    %cst_9 = arith.constant 1.000000e+00 : f32
    %14 = vector.broadcast %cst_9 : f32 to vector<8x128xf32>
    %15 = arith.addf %14, %13 : vector<8x128xf32>
    %cst_10 = arith.constant 5.000000e-01 : f32
    %16 = vector.broadcast %cst_10 : f32 to vector<8x128xf32>
    %17 = arith.mulf %16, %15 : vector<8x128xf32>
    %18 = vector.extract_strided_slice %9 {offsets = [0, 128], sizes = [8, 128], strides = [1, 1]} : vector<8x512xf32> to vector<8x128xf32>
    %cst_11 = arith.constant 5.000000e-01 : f32
    %19 = vector.broadcast %cst_11 : f32 to vector<8x128xf32>
    %20 = arith.mulf %19, %18 : vector<8x128xf32>
    %21 = math.tanh %20 : vector<8x128xf32>
    %cst_12 = arith.constant 1.000000e+00 : f32
    %22 = vector.broadcast %cst_12 : f32 to vector<8x128xf32>
    %23 = arith.addf %22, %21 : vector<8x128xf32>
    %cst_13 = arith.constant 5.000000e-01 : f32
    %24 = vector.broadcast %cst_13 : f32 to vector<8x128xf32>
    %25 = arith.mulf %24, %23 : vector<8x128xf32>
    %26 = vector.extract_strided_slice %9 {offsets = [0, 256], sizes = [8, 128], strides = [1, 1]} : vector<8x512xf32> to vector<8x128xf32>
    %27 = math.tanh %26 : vector<8x128xf32>
    %28 = vector.extract_strided_slice %9 {offsets = [0, 384], sizes = [8, 128], strides = [1, 1]} : vector<8x512xf32> to vector<8x128xf32>
    %cst_14 = arith.constant 5.000000e-01 : f32
    %29 = vector.broadcast %cst_14 : f32 to vector<8x128xf32>
    %30 = arith.mulf %29, %28 : vector<8x128xf32>
    %31 = math.tanh %30 : vector<8x128xf32>
    %cst_15 = arith.constant 1.000000e+00 : f32
    %32 = vector.broadcast %cst_15 : f32 to vector<8x128xf32>
    %33 = arith.addf %32, %31 : vector<8x128xf32>
    %cst_16 = arith.constant 5.000000e-01 : f32
    %34 = vector.broadcast %cst_16 : f32 to vector<8x128xf32>
    %35 = arith.mulf %34, %33 : vector<8x128xf32>
    %36 = arith.mulf %25, %1 : vector<8x128xf32>
    %37 = arith.mulf %17, %27 : vector<8x128xf32>
    %38 = arith.addf %36, %37 : vector<8x128xf32>
    %39 = math.tanh %38 : vector<8x128xf32>
    %40 = arith.mulf %35, %39 : vector<8x128xf32>
    %c0_17 = arith.constant 0 : index
    %c1 = arith.constant 1 : index
    %c0_18 = arith.constant 0 : index
    %41 = vector.load %arg1[%c0_17, %c1, %c0_18] : memref<8x8x128xf32, #tpu.memory_space<vmem>>, vector<8x1x128xf32>
    %42 = vector.shape_cast %41 : vector<8x1x128xf32> to vector<8x128xf32>
    %43 = tpu.concatenate %42, %40 in 1 : vector<8x128xf32>, vector<8x128xf32> -> vector<8x256xf32>
    %c0_19 = arith.constant 0 : index
    %c0_20 = arith.constant 0 : index
    %44 = vector.load %arg2[%c0_19, %c0_20] : memref<256x512xf32, #tpu.memory_space<vmem>>, vector<256x512xf32>
    %cst_21 = arith.constant dense<0.000000e+00> : vector<8x512xf32>
    %45 = tpu.matmul %43, %44, %cst_21 {dimension_numbers = #tpu.dot_dimension_numbers<[1], [0], [0], [1], [0, 0, 1, 1], [], []>} : vector<8x256xf32>, vector<256x512xf32>, vector<8x512xf32> -> vector<8x512xf32>
    %c0_22 = arith.constant 0 : index
    %c0_23 = arith.constant 0 : index
    %46 = vector.load %arg3[%c0_22, %c0_23] : memref<1x512xf32, #tpu.memory_space<vmem>>, vector<1x512xf32>
    %47 = vector.broadcast %46 : vector<1x512xf32> to vector<8x512xf32>
    %48 = arith.addf %45, %47 : vector<8x512xf32>
    %49 = vector.extract_strided_slice %48 {offsets = [0, 0], sizes = [8, 128], strides = [1, 1]} : vector<8x512xf32> to vector<8x128xf32>
    %cst_24 = arith.constant 5.000000e-01 : f32
    %50 = vector.broadcast %cst_24 : f32 to vector<8x128xf32>
    %51 = arith.mulf %50, %49 : vector<8x128xf32>
    %52 = math.tanh %51 : vector<8x128xf32>
    %cst_25 = arith.constant 1.000000e+00 : f32
    %53 = vector.broadcast %cst_25 : f32 to vector<8x128xf32>
    %54 = arith.addf %53, %52 : vector<8x128xf32>
    %cst_26 = arith.constant 5.000000e-01 : f32
    %55 = vector.broadcast %cst_26 : f32 to vector<8x128xf32>
    %56 = arith.mulf %55, %54 : vector<8x128xf32>
    %57 = vector.extract_strided_slice %48 {offsets = [0, 128], sizes = [8, 128], strides = [1, 1]} : vector<8x512xf32> to vector<8x128xf32>
    %cst_27 = arith.constant 5.000000e-01 : f32
    %58 = vector.broadcast %cst_27 : f32 to vector<8x128xf32>
    %59 = arith.mulf %58, %57 : vector<8x128xf32>
    %60 = math.tanh %59 : vector<8x128xf32>
    %cst_28 = arith.constant 1.000000e+00 : f32
    %61 = vector.broadcast %cst_28 : f32 to vector<8x128xf32>
    %62 = arith.addf %61, %60 : vector<8x128xf32>
    %cst_29 = arith.constant 5.000000e-01 : f32
    %63 = vector.broadcast %cst_29 : f32 to vector<8x128xf32>
    %64 = arith.mulf %63, %62 : vector<8x128xf32>
    %65 = vector.extract_strided_slice %48 {offsets = [0, 256], sizes = [8, 128], strides = [1, 1]} : vector<8x512xf32> to vector<8x128xf32>
    %66 = math.tanh %65 : vector<8x128xf32>
    %67 = vector.extract_strided_slice %48 {offsets = [0, 384], sizes = [8, 128], strides = [1, 1]} : vector<8x512xf32> to vector<8x128xf32>
    %cst_30 = arith.constant 5.000000e-01 : f32
    %68 = vector.broadcast %cst_30 : f32 to vector<8x128xf32>
    %69 = arith.mulf %68, %67 : vector<8x128xf32>
    %70 = math.tanh %69 : vector<8x128xf32>
    %cst_31 = arith.constant 1.000000e+00 : f32
    %71 = vector.broadcast %cst_31 : f32 to vector<8x128xf32>
    %72 = arith.addf %71, %70 : vector<8x128xf32>
    %cst_32 = arith.constant 5.000000e-01 : f32
    %73 = vector.broadcast %cst_32 : f32 to vector<8x128xf32>
    %74 = arith.mulf %73, %72 : vector<8x128xf32>
    %75 = arith.mulf %64, %38 : vector<8x128xf32>
    %76 = arith.mulf %56, %66 : vector<8x128xf32>
    %77 = arith.addf %75, %76 : vector<8x128xf32>
    %78 = math.tanh %77 : vector<8x128xf32>
    %79 = arith.mulf %74, %78 : vector<8x128xf32>
    %c0_33 = arith.constant 0 : index
    %c2 = arith.constant 2 : index
    %c0_34 = arith.constant 0 : index
    %80 = vector.load %arg1[%c0_33, %c2, %c0_34] : memref<8x8x128xf32, #tpu.memory_space<vmem>>, vector<8x1x128xf32>
    %81 = vector.shape_cast %80 : vector<8x1x128xf32> to vector<8x128xf32>
    %82 = tpu.concatenate %81, %79 in 1 : vector<8x128xf32>, vector<8x128xf32> -> vector<8x256xf32>
    %c0_35 = arith.constant 0 : index
    %c0_36 = arith.constant 0 : index
    %83 = vector.load %arg2[%c0_35, %c0_36] : memref<256x512xf32, #tpu.memory_space<vmem>>, vector<256x512xf32>
    %cst_37 = arith.constant dense<0.000000e+00> : vector<8x512xf32>
    %84 = tpu.matmul %82, %83, %cst_37 {dimension_numbers = #tpu.dot_dimension_numbers<[1], [0], [0], [1], [0, 0, 1, 1], [], []>} : vector<8x256xf32>, vector<256x512xf32>, vector<8x512xf32> -> vector<8x512xf32>
    %c0_38 = arith.constant 0 : index
    %c0_39 = arith.constant 0 : index
    %85 = vector.load %arg3[%c0_38, %c0_39] : memref<1x512xf32, #tpu.memory_space<vmem>>, vector<1x512xf32>
    %86 = vector.broadcast %85 : vector<1x512xf32> to vector<8x512xf32>
    %87 = arith.addf %84, %86 : vector<8x512xf32>
    %88 = vector.extract_strided_slice %87 {offsets = [0, 0], sizes = [8, 128], strides = [1, 1]} : vector<8x512xf32> to vector<8x128xf32>
    %cst_40 = arith.constant 5.000000e-01 : f32
    %89 = vector.broadcast %cst_40 : f32 to vector<8x128xf32>
    %90 = arith.mulf %89, %88 : vector<8x128xf32>
    %91 = math.tanh %90 : vector<8x128xf32>
    %cst_41 = arith.constant 1.000000e+00 : f32
    %92 = vector.broadcast %cst_41 : f32 to vector<8x128xf32>
    %93 = arith.addf %92, %91 : vector<8x128xf32>
    %cst_42 = arith.constant 5.000000e-01 : f32
    %94 = vector.broadcast %cst_42 : f32 to vector<8x128xf32>
    %95 = arith.mulf %94, %93 : vector<8x128xf32>
    %96 = vector.extract_strided_slice %87 {offsets = [0, 128], sizes = [8, 128], strides = [1, 1]} : vector<8x512xf32> to vector<8x128xf32>
    %cst_43 = arith.constant 5.000000e-01 : f32
    %97 = vector.broadcast %cst_43 : f32 to vector<8x128xf32>
    %98 = arith.mulf %97, %96 : vector<8x128xf32>
    %99 = math.tanh %98 : vector<8x128xf32>
    %cst_44 = arith.constant 1.000000e+00 : f32
    %100 = vector.broadcast %cst_44 : f32 to vector<8x128xf32>
    %101 = arith.addf %100, %99 : vector<8x128xf32>
    %cst_45 = arith.constant 5.000000e-01 : f32
    %102 = vector.broadcast %cst_45 : f32 to vector<8x128xf32>
    %103 = arith.mulf %102, %101 : vector<8x128xf32>
    %104 = vector.extract_strided_slice %87 {offsets = [0, 256], sizes = [8, 128], strides = [1, 1]} : vector<8x512xf32> to vector<8x128xf32>
    %105 = math.tanh %104 : vector<8x128xf32>
    %106 = vector.extract_strided_slice %87 {offsets = [0, 384], sizes = [8, 128], strides = [1, 1]} : vector<8x512xf32> to vector<8x128xf32>
    %cst_46 = arith.constant 5.000000e-01 : f32
    %107 = vector.broadcast %cst_46 : f32 to vector<8x128xf32>
    %108 = arith.mulf %107, %106 : vector<8x128xf32>
    %109 = math.tanh %108 : vector<8x128xf32>
    %cst_47 = arith.constant 1.000000e+00 : f32
    %110 = vector.broadcast %cst_47 : f32 to vector<8x128xf32>
    %111 = arith.addf %110, %109 : vector<8x128xf32>
    %cst_48 = arith.constant 5.000000e-01 : f32
    %112 = vector.broadcast %cst_48 : f32 to vector<8x128xf32>
    %113 = arith.mulf %112, %111 : vector<8x128xf32>
    %114 = arith.mulf %103, %77 : vector<8x128xf32>
    %115 = arith.mulf %95, %105 : vector<8x128xf32>
    %116 = arith.addf %114, %115 : vector<8x128xf32>
    %117 = math.tanh %116 : vector<8x128xf32>
    %118 = arith.mulf %113, %117 : vector<8x128xf32>
    %c0_49 = arith.constant 0 : index
    %c3 = arith.constant 3 : index
    %c0_50 = arith.constant 0 : index
    %119 = vector.load %arg1[%c0_49, %c3, %c0_50] : memref<8x8x128xf32, #tpu.memory_space<vmem>>, vector<8x1x128xf32>
    %120 = vector.shape_cast %119 : vector<8x1x128xf32> to vector<8x128xf32>
    %121 = tpu.concatenate %120, %118 in 1 : vector<8x128xf32>, vector<8x128xf32> -> vector<8x256xf32>
    %c0_51 = arith.constant 0 : index
    %c0_52 = arith.constant 0 : index
    %122 = vector.load %arg2[%c0_51, %c0_52] : memref<256x512xf32, #tpu.memory_space<vmem>>, vector<256x512xf32>
    %cst_53 = arith.constant dense<0.000000e+00> : vector<8x512xf32>
    %123 = tpu.matmul %121, %122, %cst_53 {dimension_numbers = #tpu.dot_dimension_numbers<[1], [0], [0], [1], [0, 0, 1, 1], [], []>} : vector<8x256xf32>, vector<256x512xf32>, vector<8x512xf32> -> vector<8x512xf32>
    %c0_54 = arith.constant 0 : index
    %c0_55 = arith.constant 0 : index
    %124 = vector.load %arg3[%c0_54, %c0_55] : memref<1x512xf32, #tpu.memory_space<vmem>>, vector<1x512xf32>
    %125 = vector.broadcast %124 : vector<1x512xf32> to vector<8x512xf32>
    %126 = arith.addf %123, %125 : vector<8x512xf32>
    %127 = vector.extract_strided_slice %126 {offsets = [0, 0], sizes = [8, 128], strides = [1, 1]} : vector<8x512xf32> to vector<8x128xf32>
    %cst_56 = arith.constant 5.000000e-01 : f32
    %128 = vector.broadcast %cst_56 : f32 to vector<8x128xf32>
    %129 = arith.mulf %128, %127 : vector<8x128xf32>
    %130 = math.tanh %129 : vector<8x128xf32>
    %cst_57 = arith.constant 1.000000e+00 : f32
    %131 = vector.broadcast %cst_57 : f32 to vector<8x128xf32>
    %132 = arith.addf %131, %130 : vector<8x128xf32>
    %cst_58 = arith.constant 5.000000e-01 : f32
    %133 = vector.broadcast %cst_58 : f32 to vector<8x128xf32>
    %134 = arith.mulf %133, %132 : vector<8x128xf32>
    %135 = vector.extract_strided_slice %126 {offsets = [0, 128], sizes = [8, 128], strides = [1, 1]} : vector<8x512xf32> to vector<8x128xf32>
    %cst_59 = arith.constant 5.000000e-01 : f32
    %136 = vector.broadcast %cst_59 : f32 to vector<8x128xf32>
    %137 = arith.mulf %136, %135 : vector<8x128xf32>
    %138 = math.tanh %137 : vector<8x128xf32>
    %cst_60 = arith.constant 1.000000e+00 : f32
    %139 = vector.broadcast %cst_60 : f32 to vector<8x128xf32>
    %140 = arith.addf %139, %138 : vector<8x128xf32>
    %cst_61 = arith.constant 5.000000e-01 : f32
    %141 = vector.broadcast %cst_61 : f32 to vector<8x128xf32>
    %142 = arith.mulf %141, %140 : vector<8x128xf32>
    %143 = vector.extract_strided_slice %126 {offsets = [0, 256], sizes = [8, 128], strides = [1, 1]} : vector<8x512xf32> to vector<8x128xf32>
    %144 = math.tanh %143 : vector<8x128xf32>
    %145 = vector.extract_strided_slice %126 {offsets = [0, 384], sizes = [8, 128], strides = [1, 1]} : vector<8x512xf32> to vector<8x128xf32>
    %cst_62 = arith.constant 5.000000e-01 : f32
    %146 = vector.broadcast %cst_62 : f32 to vector<8x128xf32>
    %147 = arith.mulf %146, %145 : vector<8x128xf32>
    %148 = math.tanh %147 : vector<8x128xf32>
    %cst_63 = arith.constant 1.000000e+00 : f32
    %149 = vector.broadcast %cst_63 : f32 to vector<8x128xf32>
    %150 = arith.addf %149, %148 : vector<8x128xf32>
    %cst_64 = arith.constant 5.000000e-01 : f32
    %151 = vector.broadcast %cst_64 : f32 to vector<8x128xf32>
    %152 = arith.mulf %151, %150 : vector<8x128xf32>
    %153 = arith.mulf %142, %116 : vector<8x128xf32>
    %154 = arith.mulf %134, %144 : vector<8x128xf32>
    %155 = arith.addf %153, %154 : vector<8x128xf32>
    %156 = math.tanh %155 : vector<8x128xf32>
    %157 = arith.mulf %152, %156 : vector<8x128xf32>
    %c0_65 = arith.constant 0 : index
    %c4 = arith.constant 4 : index
    %c0_66 = arith.constant 0 : index
    %158 = vector.load %arg1[%c0_65, %c4, %c0_66] : memref<8x8x128xf32, #tpu.memory_space<vmem>>, vector<8x1x128xf32>
    %159 = vector.shape_cast %158 : vector<8x1x128xf32> to vector<8x128xf32>
    %160 = tpu.concatenate %159, %157 in 1 : vector<8x128xf32>, vector<8x128xf32> -> vector<8x256xf32>
    %c0_67 = arith.constant 0 : index
    %c0_68 = arith.constant 0 : index
    %161 = vector.load %arg2[%c0_67, %c0_68] : memref<256x512xf32, #tpu.memory_space<vmem>>, vector<256x512xf32>
    %cst_69 = arith.constant dense<0.000000e+00> : vector<8x512xf32>
    %162 = tpu.matmul %160, %161, %cst_69 {dimension_numbers = #tpu.dot_dimension_numbers<[1], [0], [0], [1], [0, 0, 1, 1], [], []>} : vector<8x256xf32>, vector<256x512xf32>, vector<8x512xf32> -> vector<8x512xf32>
    %c0_70 = arith.constant 0 : index
    %c0_71 = arith.constant 0 : index
    %163 = vector.load %arg3[%c0_70, %c0_71] : memref<1x512xf32, #tpu.memory_space<vmem>>, vector<1x512xf32>
    %164 = vector.broadcast %163 : vector<1x512xf32> to vector<8x512xf32>
    %165 = arith.addf %162, %164 : vector<8x512xf32>
    %166 = vector.extract_strided_slice %165 {offsets = [0, 0], sizes = [8, 128], strides = [1, 1]} : vector<8x512xf32> to vector<8x128xf32>
    %cst_72 = arith.constant 5.000000e-01 : f32
    %167 = vector.broadcast %cst_72 : f32 to vector<8x128xf32>
    %168 = arith.mulf %167, %166 : vector<8x128xf32>
    %169 = math.tanh %168 : vector<8x128xf32>
    %cst_73 = arith.constant 1.000000e+00 : f32
    %170 = vector.broadcast %cst_73 : f32 to vector<8x128xf32>
    %171 = arith.addf %170, %169 : vector<8x128xf32>
    %cst_74 = arith.constant 5.000000e-01 : f32
    %172 = vector.broadcast %cst_74 : f32 to vector<8x128xf32>
    %173 = arith.mulf %172, %171 : vector<8x128xf32>
    %174 = vector.extract_strided_slice %165 {offsets = [0, 128], sizes = [8, 128], strides = [1, 1]} : vector<8x512xf32> to vector<8x128xf32>
    %cst_75 = arith.constant 5.000000e-01 : f32
    %175 = vector.broadcast %cst_75 : f32 to vector<8x128xf32>
    %176 = arith.mulf %175, %174 : vector<8x128xf32>
    %177 = math.tanh %176 : vector<8x128xf32>
    %cst_76 = arith.constant 1.000000e+00 : f32
    %178 = vector.broadcast %cst_76 : f32 to vector<8x128xf32>
    %179 = arith.addf %178, %177 : vector<8x128xf32>
    %cst_77 = arith.constant 5.000000e-01 : f32
    %180 = vector.broadcast %cst_77 : f32 to vector<8x128xf32>
    %181 = arith.mulf %180, %179 : vector<8x128xf32>
    %182 = vector.extract_strided_slice %165 {offsets = [0, 256], sizes = [8, 128], strides = [1, 1]} : vector<8x512xf32> to vector<8x128xf32>
    %183 = math.tanh %182 : vector<8x128xf32>
    %184 = vector.extract_strided_slice %165 {offsets = [0, 384], sizes = [8, 128], strides = [1, 1]} : vector<8x512xf32> to vector<8x128xf32>
    %cst_78 = arith.constant 5.000000e-01 : f32
    %185 = vector.broadcast %cst_78 : f32 to vector<8x128xf32>
    %186 = arith.mulf %185, %184 : vector<8x128xf32>
    %187 = math.tanh %186 : vector<8x128xf32>
    %cst_79 = arith.constant 1.000000e+00 : f32
    %188 = vector.broadcast %cst_79 : f32 to vector<8x128xf32>
    %189 = arith.addf %188, %187 : vector<8x128xf32>
    %cst_80 = arith.constant 5.000000e-01 : f32
    %190 = vector.broadcast %cst_80 : f32 to vector<8x128xf32>
    %191 = arith.mulf %190, %189 : vector<8x128xf32>
    %192 = arith.mulf %181, %155 : vector<8x128xf32>
    %193 = arith.mulf %173, %183 : vector<8x128xf32>
    %194 = arith.addf %192, %193 : vector<8x128xf32>
    %195 = math.tanh %194 : vector<8x128xf32>
    %196 = arith.mulf %191, %195 : vector<8x128xf32>
    %c0_81 = arith.constant 0 : index
    %c5 = arith.constant 5 : index
    %c0_82 = arith.constant 0 : index
    %197 = vector.load %arg1[%c0_81, %c5, %c0_82] : memref<8x8x128xf32, #tpu.memory_space<vmem>>, vector<8x1x128xf32>
    %198 = vector.shape_cast %197 : vector<8x1x128xf32> to vector<8x128xf32>
    %199 = tpu.concatenate %198, %196 in 1 : vector<8x128xf32>, vector<8x128xf32> -> vector<8x256xf32>
    %c0_83 = arith.constant 0 : index
    %c0_84 = arith.constant 0 : index
    %200 = vector.load %arg2[%c0_83, %c0_84] : memref<256x512xf32, #tpu.memory_space<vmem>>, vector<256x512xf32>
    %cst_85 = arith.constant dense<0.000000e+00> : vector<8x512xf32>
    %201 = tpu.matmul %199, %200, %cst_85 {dimension_numbers = #tpu.dot_dimension_numbers<[1], [0], [0], [1], [0, 0, 1, 1], [], []>} : vector<8x256xf32>, vector<256x512xf32>, vector<8x512xf32> -> vector<8x512xf32>
    %c0_86 = arith.constant 0 : index
    %c0_87 = arith.constant 0 : index
    %202 = vector.load %arg3[%c0_86, %c0_87] : memref<1x512xf32, #tpu.memory_space<vmem>>, vector<1x512xf32>
    %203 = vector.broadcast %202 : vector<1x512xf32> to vector<8x512xf32>
    %204 = arith.addf %201, %203 : vector<8x512xf32>
    %205 = vector.extract_strided_slice %204 {offsets = [0, 0], sizes = [8, 128], strides = [1, 1]} : vector<8x512xf32> to vector<8x128xf32>
    %cst_88 = arith.constant 5.000000e-01 : f32
    %206 = vector.broadcast %cst_88 : f32 to vector<8x128xf32>
    %207 = arith.mulf %206, %205 : vector<8x128xf32>
    %208 = math.tanh %207 : vector<8x128xf32>
    %cst_89 = arith.constant 1.000000e+00 : f32
    %209 = vector.broadcast %cst_89 : f32 to vector<8x128xf32>
    %210 = arith.addf %209, %208 : vector<8x128xf32>
    %cst_90 = arith.constant 5.000000e-01 : f32
    %211 = vector.broadcast %cst_90 : f32 to vector<8x128xf32>
    %212 = arith.mulf %211, %210 : vector<8x128xf32>
    %213 = vector.extract_strided_slice %204 {offsets = [0, 128], sizes = [8, 128], strides = [1, 1]} : vector<8x512xf32> to vector<8x128xf32>
    %cst_91 = arith.constant 5.000000e-01 : f32
    %214 = vector.broadcast %cst_91 : f32 to vector<8x128xf32>
    %215 = arith.mulf %214, %213 : vector<8x128xf32>
    %216 = math.tanh %215 : vector<8x128xf32>
    %cst_92 = arith.constant 1.000000e+00 : f32
    %217 = vector.broadcast %cst_92 : f32 to vector<8x128xf32>
    %218 = arith.addf %217, %216 : vector<8x128xf32>
    %cst_93 = arith.constant 5.000000e-01 : f32
    %219 = vector.broadcast %cst_93 : f32 to vector<8x128xf32>
    %220 = arith.mulf %219, %218 : vector<8x128xf32>
    %221 = vector.extract_strided_slice %204 {offsets = [0, 256], sizes = [8, 128], strides = [1, 1]} : vector<8x512xf32> to vector<8x128xf32>
    %222 = math.tanh %221 : vector<8x128xf32>
    %223 = vector.extract_strided_slice %204 {offsets = [0, 384], sizes = [8, 128], strides = [1, 1]} : vector<8x512xf32> to vector<8x128xf32>
    %cst_94 = arith.constant 5.000000e-01 : f32
    %224 = vector.broadcast %cst_94 : f32 to vector<8x128xf32>
    %225 = arith.mulf %224, %223 : vector<8x128xf32>
    %226 = math.tanh %225 : vector<8x128xf32>
    %cst_95 = arith.constant 1.000000e+00 : f32
    %227 = vector.broadcast %cst_95 : f32 to vector<8x128xf32>
    %228 = arith.addf %227, %226 : vector<8x128xf32>
    %cst_96 = arith.constant 5.000000e-01 : f32
    %229 = vector.broadcast %cst_96 : f32 to vector<8x128xf32>
    %230 = arith.mulf %229, %228 : vector<8x128xf32>
    %231 = arith.mulf %220, %194 : vector<8x128xf32>
    %232 = arith.mulf %212, %222 : vector<8x128xf32>
    %233 = arith.addf %231, %232 : vector<8x128xf32>
    %234 = math.tanh %233 : vector<8x128xf32>
    %235 = arith.mulf %230, %234 : vector<8x128xf32>
    %c0_97 = arith.constant 0 : index
    %c6 = arith.constant 6 : index
    %c0_98 = arith.constant 0 : index
    %236 = vector.load %arg1[%c0_97, %c6, %c0_98] : memref<8x8x128xf32, #tpu.memory_space<vmem>>, vector<8x1x128xf32>
    %237 = vector.shape_cast %236 : vector<8x1x128xf32> to vector<8x128xf32>
    %238 = tpu.concatenate %237, %235 in 1 : vector<8x128xf32>, vector<8x128xf32> -> vector<8x256xf32>
    %c0_99 = arith.constant 0 : index
    %c0_100 = arith.constant 0 : index
    %239 = vector.load %arg2[%c0_99, %c0_100] : memref<256x512xf32, #tpu.memory_space<vmem>>, vector<256x512xf32>
    %cst_101 = arith.constant dense<0.000000e+00> : vector<8x512xf32>
    %240 = tpu.matmul %238, %239, %cst_101 {dimension_numbers = #tpu.dot_dimension_numbers<[1], [0], [0], [1], [0, 0, 1, 1], [], []>} : vector<8x256xf32>, vector<256x512xf32>, vector<8x512xf32> -> vector<8x512xf32>
    %c0_102 = arith.constant 0 : index
    %c0_103 = arith.constant 0 : index
    %241 = vector.load %arg3[%c0_102, %c0_103] : memref<1x512xf32, #tpu.memory_space<vmem>>, vector<1x512xf32>
    %242 = vector.broadcast %241 : vector<1x512xf32> to vector<8x512xf32>
    %243 = arith.addf %240, %242 : vector<8x512xf32>
    %244 = vector.extract_strided_slice %243 {offsets = [0, 0], sizes = [8, 128], strides = [1, 1]} : vector<8x512xf32> to vector<8x128xf32>
    %cst_104 = arith.constant 5.000000e-01 : f32
    %245 = vector.broadcast %cst_104 : f32 to vector<8x128xf32>
    %246 = arith.mulf %245, %244 : vector<8x128xf32>
    %247 = math.tanh %246 : vector<8x128xf32>
    %cst_105 = arith.constant 1.000000e+00 : f32
    %248 = vector.broadcast %cst_105 : f32 to vector<8x128xf32>
    %249 = arith.addf %248, %247 : vector<8x128xf32>
    %cst_106 = arith.constant 5.000000e-01 : f32
    %250 = vector.broadcast %cst_106 : f32 to vector<8x128xf32>
    %251 = arith.mulf %250, %249 : vector<8x128xf32>
    %252 = vector.extract_strided_slice %243 {offsets = [0, 128], sizes = [8, 128], strides = [1, 1]} : vector<8x512xf32> to vector<8x128xf32>
    %cst_107 = arith.constant 5.000000e-01 : f32
    %253 = vector.broadcast %cst_107 : f32 to vector<8x128xf32>
    %254 = arith.mulf %253, %252 : vector<8x128xf32>
    %255 = math.tanh %254 : vector<8x128xf32>
    %cst_108 = arith.constant 1.000000e+00 : f32
    %256 = vector.broadcast %cst_108 : f32 to vector<8x128xf32>
    %257 = arith.addf %256, %255 : vector<8x128xf32>
    %cst_109 = arith.constant 5.000000e-01 : f32
    %258 = vector.broadcast %cst_109 : f32 to vector<8x128xf32>
    %259 = arith.mulf %258, %257 : vector<8x128xf32>
    %260 = vector.extract_strided_slice %243 {offsets = [0, 256], sizes = [8, 128], strides = [1, 1]} : vector<8x512xf32> to vector<8x128xf32>
    %261 = math.tanh %260 : vector<8x128xf32>
    %262 = vector.extract_strided_slice %243 {offsets = [0, 384], sizes = [8, 128], strides = [1, 1]} : vector<8x512xf32> to vector<8x128xf32>
    %cst_110 = arith.constant 5.000000e-01 : f32
    %263 = vector.broadcast %cst_110 : f32 to vector<8x128xf32>
    %264 = arith.mulf %263, %262 : vector<8x128xf32>
    %265 = math.tanh %264 : vector<8x128xf32>
    %cst_111 = arith.constant 1.000000e+00 : f32
    %266 = vector.broadcast %cst_111 : f32 to vector<8x128xf32>
    %267 = arith.addf %266, %265 : vector<8x128xf32>
    %cst_112 = arith.constant 5.000000e-01 : f32
    %268 = vector.broadcast %cst_112 : f32 to vector<8x128xf32>
    %269 = arith.mulf %268, %267 : vector<8x128xf32>
    %270 = arith.mulf %259, %233 : vector<8x128xf32>
    %271 = arith.mulf %251, %261 : vector<8x128xf32>
    %272 = arith.addf %270, %271 : vector<8x128xf32>
    %273 = math.tanh %272 : vector<8x128xf32>
    %274 = arith.mulf %269, %273 : vector<8x128xf32>
    %c0_113 = arith.constant 0 : index
    %c7 = arith.constant 7 : index
    %c0_114 = arith.constant 0 : index
    %275 = vector.load %arg1[%c0_113, %c7, %c0_114] : memref<8x8x128xf32, #tpu.memory_space<vmem>>, vector<8x1x128xf32>
    %276 = vector.shape_cast %275 : vector<8x1x128xf32> to vector<8x128xf32>
    %277 = tpu.concatenate %276, %274 in 1 : vector<8x128xf32>, vector<8x128xf32> -> vector<8x256xf32>
    %c0_115 = arith.constant 0 : index
    %c0_116 = arith.constant 0 : index
    %278 = vector.load %arg2[%c0_115, %c0_116] : memref<256x512xf32, #tpu.memory_space<vmem>>, vector<256x512xf32>
    %cst_117 = arith.constant dense<0.000000e+00> : vector<8x512xf32>
    %279 = tpu.matmul %277, %278, %cst_117 {dimension_numbers = #tpu.dot_dimension_numbers<[1], [0], [0], [1], [0, 0, 1, 1], [], []>} : vector<8x256xf32>, vector<256x512xf32>, vector<8x512xf32> -> vector<8x512xf32>
    %c0_118 = arith.constant 0 : index
    %c0_119 = arith.constant 0 : index
    %280 = vector.load %arg3[%c0_118, %c0_119] : memref<1x512xf32, #tpu.memory_space<vmem>>, vector<1x512xf32>
    %281 = vector.broadcast %280 : vector<1x512xf32> to vector<8x512xf32>
    %282 = arith.addf %279, %281 : vector<8x512xf32>
    %283 = vector.extract_strided_slice %282 {offsets = [0, 0], sizes = [8, 128], strides = [1, 1]} : vector<8x512xf32> to vector<8x128xf32>
    %cst_120 = arith.constant 5.000000e-01 : f32
    %284 = vector.broadcast %cst_120 : f32 to vector<8x128xf32>
    %285 = arith.mulf %284, %283 : vector<8x128xf32>
    %286 = math.tanh %285 : vector<8x128xf32>
    %cst_121 = arith.constant 1.000000e+00 : f32
    %287 = vector.broadcast %cst_121 : f32 to vector<8x128xf32>
    %288 = arith.addf %287, %286 : vector<8x128xf32>
    %cst_122 = arith.constant 5.000000e-01 : f32
    %289 = vector.broadcast %cst_122 : f32 to vector<8x128xf32>
    %290 = arith.mulf %289, %288 : vector<8x128xf32>
    %291 = vector.extract_strided_slice %282 {offsets = [0, 128], sizes = [8, 128], strides = [1, 1]} : vector<8x512xf32> to vector<8x128xf32>
    %cst_123 = arith.constant 5.000000e-01 : f32
    %292 = vector.broadcast %cst_123 : f32 to vector<8x128xf32>
    %293 = arith.mulf %292, %291 : vector<8x128xf32>
    %294 = math.tanh %293 : vector<8x128xf32>
    %cst_124 = arith.constant 1.000000e+00 : f32
    %295 = vector.broadcast %cst_124 : f32 to vector<8x128xf32>
    %296 = arith.addf %295, %294 : vector<8x128xf32>
    %cst_125 = arith.constant 5.000000e-01 : f32
    %297 = vector.broadcast %cst_125 : f32 to vector<8x128xf32>
    %298 = arith.mulf %297, %296 : vector<8x128xf32>
    %299 = vector.extract_strided_slice %282 {offsets = [0, 256], sizes = [8, 128], strides = [1, 1]} : vector<8x512xf32> to vector<8x128xf32>
    %300 = math.tanh %299 : vector<8x128xf32>
    %301 = vector.extract_strided_slice %282 {offsets = [0, 384], sizes = [8, 128], strides = [1, 1]} : vector<8x512xf32> to vector<8x128xf32>
    %cst_126 = arith.constant 5.000000e-01 : f32
    %302 = vector.broadcast %cst_126 : f32 to vector<8x128xf32>
    %303 = arith.mulf %302, %301 : vector<8x128xf32>
    %304 = math.tanh %303 : vector<8x128xf32>
    %cst_127 = arith.constant 1.000000e+00 : f32
    %305 = vector.broadcast %cst_127 : f32 to vector<8x128xf32>
    %306 = arith.addf %305, %304 : vector<8x128xf32>
    %cst_128 = arith.constant 5.000000e-01 : f32
    %307 = vector.broadcast %cst_128 : f32 to vector<8x128xf32>
    %308 = arith.mulf %307, %306 : vector<8x128xf32>
    %309 = arith.mulf %298, %272 : vector<8x128xf32>
    %310 = arith.mulf %290, %300 : vector<8x128xf32>
    %311 = arith.addf %309, %310 : vector<8x128xf32>
    %312 = math.tanh %311 : vector<8x128xf32>
    %313 = arith.mulf %308, %312 : vector<8x128xf32>
    %c0_129 = arith.constant 0 : index
    %c0_130 = arith.constant 0 : index
    %314 = vector.load %arg4[%c0_129, %c0_130] : memref<128x128xf32, #tpu.memory_space<vmem>>, vector<128x128xf32>
    %cst_131 = arith.constant dense<0.000000e+00> : vector<8x128xf32>
    %315 = tpu.matmul %313, %314, %cst_131 {dimension_numbers = #tpu.dot_dimension_numbers<[1], [0], [0], [1], [0, 0, 1, 1], [], []>} : vector<8x128xf32>, vector<128x128xf32>, vector<8x128xf32> -> vector<8x128xf32>
    %c0_132 = arith.constant 0 : index
    %c0_133 = arith.constant 0 : index
    %316 = vector.load %arg5[%c0_132, %c0_133] : memref<1x128xf32, #tpu.memory_space<vmem>>, vector<1x128xf32>
    %317 = vector.broadcast %316 : vector<1x128xf32> to vector<8x128xf32>
    %318 = arith.addf %315, %317 : vector<8x128xf32>
    %c0_134 = arith.constant 0 : index
    %c0_135 = arith.constant 0 : index
    %319 = vector.load %arg6[%c0_134, %c0_135] : memref<8x128xf32, #tpu.memory_space<vmem>>, vector<8x128xf32>
    tpu.vector_store %arg6[%c0_134, %c0_135], %318 {strides = array<i32>} : memref<8x128xf32, #tpu.memory_space<vmem>>, vector<8x128xf32>,
    return
  }
  func.func @transform_0(%arg0: i32) -> (i32, i32, i32) {
    %c0_i32 = arith.constant 0 : i32
    %c0_i32_0 = arith.constant 0 : i32
    %c0_i32_1 = arith.constant 0 : i32
    %c0_i32_2 = arith.constant 0 : i32
    return %c0_i32, %c0_i32_0, %c0_i32_1 : i32, i32, i32
  }
  func.func @transform_1(%arg0: i32) -> (i32, i32) {
    %c0_i32 = arith.constant 0 : i32
    %c0_i32_0 = arith.constant 0 : i32
    %c0_i32_1 = arith.constant 0 : i32
    return %c0_i32, %c0_i32_0 : i32, i32
  }
  func.func @transform_2(%arg0: i32) -> (i32, i32) {
    %c0_i32 = arith.constant 0 : i32
    %c0_i32_0 = arith.constant 0 : i32
    %c0_i32_1 = arith.constant 0 : i32
    return %c0_i32, %c0_i32_0 : i32, i32
  }
  func.func @transform_3(%arg0: i32) -> (i32, i32) {
    %c0_i32 = arith.constant 0 : i32
    %c0_i32_0 = arith.constant 0 : i32
    %c0_i32_1 = arith.constant 0 : i32
    return %c0_i32, %c0_i32_0 : i32, i32
  }
  func.func @transform_4(%arg0: i32) -> (i32, i32) {
    %c0_i32 = arith.constant 0 : i32
    %c0_i32_0 = arith.constant 0 : i32
    %c0_i32_1 = arith.constant 0 : i32
    return %c0_i32, %c0_i32_0 : i32, i32
  }
  func.func @transform_5(%arg0: i32) -> (i32, i32) {
    %c0_i32 = arith.constant 0 : i32
    %c0_i32_0 = arith.constant 0 : i32
    %c0_i32_1 = arith.constant 0 : i32
    return %c0_i32, %c0_i32_0 : i32, i32
  }
}

</mosaic_0001>

<bundles_post_ra>
// kernel: tpu_custom_call.1
= control target key start
LH: loop header
LB: loop body
LE: loop exit
PB: predicated region body
PF: predicated region fallthrough
CT: control target
= control target key end

     0   :  { %10 = vsyncpa [#allocation3], 0  ;;  %s4408_s0 = inlined_call_operand.hbm [shape: f32[8,8,128], index: 0, kind: input, shape index: {}]   ;;  %s4409_s1 = inlined_call_operand.hbm [shape: f32[256,512], index: 1, kind: input, shape index: {}]   ;;  %s4410_s2 = inlined_call_operand.hbm [shape: f32[1,512], index: 2, kind: input, shape index: {}]   ;;  %s4411_s3 = inlined_call_operand.hbm [shape: f32[128,128], index: 3, kind: input, shape index: {}]   ;;  %s4412_s4 = inlined_call_operand.vmem [shape: f32[1,128], index: 4, kind: input, shape index: {}]   ;;  %s4413_s5 = inlined_call_operand.hbm [shape: f32[8,128], index: 5, kind: output, shape index: {}]  }
   0x1   :  { %11 = vsyncpa [#allocation6], 0 }
   0x2   :  { %12 = vsyncpa [#allocation9], 0  ;;  %s31_s20 = sshll.u32 %s4409_s1, 4  ;;  %s32_s20 = int_to_ptr.hbm [resolvable:$true] %s31_s20 }
   0x3   :  { %13 = vsyncpa [#allocation4], 0  ;;  %s2434_s21 = smov [#allocation5]   ;;  %s18_s25 = sshll.u32 %s4408_s0, 4  ;;  %s19_s25 = int_to_ptr.hbm [resolvable:$true] %s18_s25 }
   0x4   :  { %s33_s22 = sshll.u32 %s2434_s21, 4  ;;  %s2435_s26 = smov 512   ;;  %s34_s22 = int_to_ptr.vmem [resolvable:$true] %s33_s22 }
   0x5   :  { %s2436_s27 = smov 32   ;;  %s2437_s28 = smov [#allocation2]  }
   0x6   :  { %39 = dma.hbm_to_vmem [thread:$0]  %s32_s20, 16384, %s34_s22, [#allocation6], %s2435_s26, %s2435_s26, %s2436_s27  }
   0x7   :  { %s20_s29 = sshll.u32 %s2437_s28, 4  ;;  %s2438_s30 = smov 128   ;;  %s21_s29 = int_to_ptr.vmem [resolvable:$true] %s20_s29 }
   0x8   :  { %s2439_s6 = smov 8   ;;  %s45_s8 = sshll.u32 %s4410_s2, 4  ;;  %s46_s8 = int_to_ptr.hbm [resolvable:$true] %s45_s8 }
   0x9   :  { %26 = dma.hbm_to_vmem [thread:$0]  %s19_s25, 1024, %s21_s29, [#allocation3], %s2438_s30, %s2438_s30, %s2439_s6  }
   0xa   :  { %s2440_s9 = smov [#allocation7]   ;;  %s55_s12 = sshll.u32 %s4411_s3, 4  ;;  %s56_s12 = int_to_ptr.hbm [resolvable:$true] %s55_s12 }
   0xb   :  { %s47_s10 = sshll.u32 %s2440_s9, 4  ;;  %s2441_s13 = smov [#allocation8]   ;;  %s48_s10 = int_to_ptr.vmem [resolvable:$true] %s47_s10 }
   0xc   :  { %50 = dma.hbm_to_vmem [thread:$0]  %s46_s8, 64, %s48_s10, [#allocation6]  }
   0xd   :  { %s57_s14 = sshll.u32 %s2441_s13, 4  ;;  %s58_s14 = int_to_ptr.vmem [resolvable:$true] %s57_s14 }
   0xe   :  { %63 = dma.hbm_to_vmem [thread:$0]  %s56_s12, 2048, %s58_s14, [#allocation9], %s2438_s30, %s2438_s30, %s2439_s6  }
   0xf   :  { %2426 = dma.done.wait [#allocation3], 1024  }
  0x10   :  { %2427 = vsyncadd [#allocation3], 4294966272 }
  0x11   :  { %2428 = dma.done.wait [#allocation6], 16448  }
  0x12   :  { %2429 = vsyncadd [#allocation6], 4294950848 }
  0x13   :  { %2430 = dma.done.wait [#allocation9], 2048  }
  0x14   :  { %2431 = vsyncadd [#allocation9], 4294965248  ;;  %v2486_v0 = vld [vmem:[#allocation5 + $0x1e0] sm:$0xff]  ;;  %v2488_v1 = vld [vmem:[#allocation5 + $0x1e8] sm:$0xff]  ;;  %vm99_vm0 = vcmask 1041409   ;;  %vm102_vm1 = vcmask 1042434  }
  0x15   :  { %v2490_v2 = vld [vmem:[#allocation5 + $0x1c0] sm:$0xff]  ;;  %258 = vmatpush.msra.mxu0 %v2486_v0  ;;  %298 = vmatpush.msra.mxu2 %v2488_v1  ;;  %v2496_v4 = vld [vmem:[#allocation5 + $0x1c8] sm:$0xff]  ;;  %v2668_v62 = vld [vmem:[#allocation5 + $0x1f0] sm:$0xff]  ;;  %vm105_vm2 = vcmask 1043459   ;;  %vm108_vm3 = vcmask 1044484   ;;  %vm111_vm4 = vcmask 1045509  }
  0x16   :  { %v2494_v3 = vld [vmem:[#allocation5 + $0x3e0] sm:$0xff]  ;;  %v2498_v5 = vld [vmem:[#allocation5 + $0x3e8] sm:$0xff]  ;;  %4866 = vst [vmem:[#allocation45_spill] sm:$0xff] %v2668_v62  ;;  %v2670_v63 = vld [vmem:[#allocation5 + $0x1f8] sm:$0xff]  ;;  %vm114_vm5 = vcmask 1046534   ;;  %vm117_vm6 = vcmask 1047559  }
  0x17   :  { %278 = vmatpush.msra.mxu1 %v2494_v3  ;;  %318 = vmatpush.msra.mxu3 %v2498_v5  ;;  %v2502_v6 = vld [vmem:[#allocation5 + $0x1a0] sm:$0xff]  ;;  %v2506_v8 = vld [vmem:[#allocation5 + $0x1a8] sm:$0xff]  ;;  %4867 = vst [vmem:[#allocation46_spill] sm:$0xff] %v2670_v63  ;;  %s2443_s15 = smov [#allocation10]   ;;  %s1947_s19 = sshll.u32 %s4413_s5, 4  ;;  %s1948_s19 = int_to_ptr.hbm [resolvable:$true] %s1947_s19 }
  0x18   :  { %v2504_v7 = vld [vmem:[#allocation5 + $0x3c0] sm:$0xff]  ;;  %259 = vmatpush.msra.mxu0 %v2490_v2  ;;  %299 = vmatpush.msra.mxu2 %v2496_v4  ;;  %v2510_v9 = vld [vmem:[#allocation5 + $0x3c8] sm:$0xff]  ;;  %s1945_s16 = sshll.u32 %s2443_s15, 4  ;;  %s1946_s16 = int_to_ptr.vmem [resolvable:$true] %s1945_s16 }
  0x19   :  { %v2512_v10 = vld [vmem:[#allocation5 + $0x3a0] sm:$0xff]  ;;  %279 = vmatpush.msra.mxu1 %v2504_v7  ;;  %319 = vmatpush.msra.mxu3 %v2510_v9  ;;  %v2518_v12 = vld [vmem:[#allocation5 + $0x188] sm:$0xff] }
  0x1a   :  { %v2516_v11 = vld [vmem:[#allocation5 + $0x180] sm:$0xff]  ;;  %v2520_v13 = vld [vmem:[#allocation5 + $0x3a8] sm:$0xff]  ;;  %260 = vmatpush.msra.mxu0 %v2502_v6  ;;  %300 = vmatpush.msra.mxu2 %v2506_v8 }
  0x1b   :  { %v2524_v14 = vld [vmem:[#allocation5 + $0x380] sm:$0xff]  ;;  %v2526_v15 = vld [vmem:[#allocation5 + $0x388] sm:$0xff]  ;;  %280 = vmatpush.msra.mxu1 %v2512_v10  ;;  %320 = vmatpush.msra.mxu3 %v2520_v13 }
  0x1c   :  { %v2530_v16 = vld [vmem:[#allocation5 + $0x160] sm:$0xff]  ;;  %v2532_v17 = vld [vmem:[#allocation5 + $0x168] sm:$0xff]  ;;  %261 = vmatpush.msra.mxu0 %v2516_v11  ;;  %301 = vmatpush.msra.mxu2 %v2518_v12 }
  0x1d   :  { %v2536_v18 = vld [vmem:[#allocation5 + $0x360] sm:$0xff]  ;;  %v2538_v19 = vld [vmem:[#allocation5 + $0x368] sm:$0xff]  ;;  %281 = vmatpush.msra.mxu1 %v2524_v14  ;;  %321 = vmatpush.msra.mxu3 %v2526_v15 }
  0x1e   :  { %v2542_v20 = vld [vmem:[#allocation5 + $0x140] sm:$0xff]  ;;  %v2544_v21 = vld [vmem:[#allocation5 + $0x148] sm:$0xff]  ;;  %262 = vmatpush.msra.mxu0 %v2530_v16  ;;  %302 = vmatpush.msra.mxu2 %v2532_v17 }
  0x1f   :  { %v2548_v22 = vld [vmem:[#allocation5 + $0x340] sm:$0xff]  ;;  %v2550_v23 = vld [vmem:[#allocation5 + $0x348] sm:$0xff]  ;;  %282 = vmatpush.msra.mxu1 %v2536_v18  ;;  %322 = vmatpush.msra.mxu3 %v2538_v19 }
  0x20   :  { %4836 = vst [vmem:[#allocation15_spill] sm:$0xff] %v2548_v22  ;;  %v2554_v24 = vld [vmem:[#allocation5 + $0x120] sm:$0xff]  ;;  %v2556_v25 = vld [vmem:[#allocation5 + $0x128] sm:$0xff]  ;;  %263 = vmatpush.msra.mxu0 %v2542_v20  ;;  %303 = vmatpush.msra.mxu2 %v2544_v21 }
  0x21   :  { %4837 = vst [vmem:[#allocation16_spill] sm:$0xff] %v2550_v23  ;;  %v2560_v26 = vld [vmem:[#allocation5 + $0x320] sm:$0xff]  ;;  %v2562_v27 = vld [vmem:[#allocation5 + $0x328] sm:$0xff]  ;;  %283 = vmatpush.msra.mxu1 %v2548_v22  ;;  %323 = vmatpush.msra.mxu3 %v2550_v23 }
  0x22   :  { %4838 = vst [vmem:[#allocation17_spill] sm:$0xff] %v2560_v26  ;;  %v2566_v28 = vld [vmem:[#allocation5 + $0x100] sm:$0xff]  ;;  %v2568_v29 = vld [vmem:[#allocation5 + $0x108] sm:$0xff]  ;;  %264 = vmatpush.msra.mxu0 %v2554_v24  ;;  %304 = vmatpush.msra.mxu2 %v2556_v25 }
  0x23   :  { %4839 = vst [vmem:[#allocation18_spill] sm:$0xff] %v2562_v27  ;;  %v2572_v30 = vld [vmem:[#allocation5 + $0x300] sm:$0xff]  ;;  %v2574_v31 = vld [vmem:[#allocation5 + $0x308] sm:$0xff]  ;;  %284 = vmatpush.msra.mxu1 %v2560_v26  ;;  %324 = vmatpush.msra.mxu3 %v2562_v27 }
  0x24   :  { %4840 = vst [vmem:[#allocation19_spill] sm:$0xff] %v2572_v30  ;;  %v2578_v32 = vld [vmem:[#allocation5 + $0xe0] sm:$0xff]  ;;  %v2580_v33 = vld [vmem:[#allocation5 + $0xe8] sm:$0xff]  ;;  %265 = vmatpush.msra.mxu0 %v2566_v28  ;;  %305 = vmatpush.msra.mxu2 %v2568_v29 }
  0x25   :  { %4841 = vst [vmem:[#allocation20_spill] sm:$0xff] %v2574_v31  ;;  %v2584_v34 = vld [vmem:[#allocation5 + $0x2e0] sm:$0xff]  ;;  %v2586_v35 = vld [vmem:[#allocation5 + $0x2e8] sm:$0xff]  ;;  %285 = vmatpush.msra.mxu1 %v2572_v30  ;;  %325 = vmatpush.msra.mxu3 %v2574_v31 }
  0x26   :  { %4842 = vst [vmem:[#allocation21_spill] sm:$0xff] %v2584_v34  ;;  %v2590_v36 = vld [vmem:[#allocation5 + $0xc0] sm:$0xff]  ;;  %v2592_v37 = vld [vmem:[#allocation5 + $0xc8] sm:$0xff]  ;;  %266 = vmatpush.msra.mxu0 %v2578_v32  ;;  %306 = vmatpush.msra.mxu2 %v2580_v33 }
  0x27   :  { %4843 = vst [vmem:[#allocation22_spill] sm:$0xff] %v2586_v35  ;;  %v2596_v38 = vld [vmem:[#allocation5 + $0x2c0] sm:$0xff]  ;;  %v2598_v39 = vld [vmem:[#allocation5 + $0x2c8] sm:$0xff]  ;;  %286 = vmatpush.msra.mxu1 %v2584_v34  ;;  %326 = vmatpush.msra.mxu3 %v2586_v35 }
  0x28   :  { %4844 = vst [vmem:[#allocation23_spill] sm:$0xff] %v2596_v38  ;;  %v2602_v40 = vld [vmem:[#allocation5 + $0xa0] sm:$0xff]  ;;  %v2604_v41 = vld [vmem:[#allocation5 + $0xa8] sm:$0xff]  ;;  %267 = vmatpush.msra.mxu0 %v2590_v36  ;;  %307 = vmatpush.msra.mxu2 %v2592_v37 }
  0x29   :  { %4845 = vst [vmem:[#allocation24_spill] sm:$0xff] %v2598_v39  ;;  %v2608_v42 = vld [vmem:[#allocation5 + $0x2a0] sm:$0xff]  ;;  %v2610_v43 = vld [vmem:[#allocation5 + $0x2a8] sm:$0xff]  ;;  %287 = vmatpush.msra.mxu1 %v2596_v38  ;;  %327 = vmatpush.msra.mxu3 %v2598_v39 }
  0x2a   :  { %4846 = vst [vmem:[#allocation25_spill] sm:$0xff] %v2608_v42  ;;  %v2614_v44 = vld [vmem:[#allocation5 + $0x80] sm:$0xff]  ;;  %v2616_v45 = vld [vmem:[#allocation5 + $0x88] sm:$0xff]  ;;  %268 = vmatpush.msra.mxu0 %v2602_v40  ;;  %308 = vmatpush.msra.mxu2 %v2604_v41 }
  0x2b   :  { %4847 = vst [vmem:[#allocation26_spill] sm:$0xff] %v2610_v43  ;;  %v2620_v46 = vld [vmem:[#allocation5 + $0x280] sm:$0xff]  ;;  %v2622_v47 = vld [vmem:[#allocation5 + $0x288] sm:$0xff]  ;;  %288 = vmatpush.msra.mxu1 %v2608_v42  ;;  %328 = vmatpush.msra.mxu3 %v2610_v43 }
  0x2c   :  { %4848 = vst [vmem:[#allocation27_spill] sm:$0xff] %v2614_v44  ;;  %v2626_v48 = vld [vmem:[#allocation5 + $0x60] sm:$0xff]  ;;  %v2628_v49 = vld [vmem:[#allocation5 + $0x68] sm:$0xff]  ;;  %269 = vmatpush.msra.mxu0 %v2614_v44  ;;  %309 = vmatpush.msra.mxu2 %v2616_v45  ;;  %v2724_v44 = vld [vmem:[#allocation5 + $0x398] sm:$0xff] }
  0x2d   :  { %4849 = vst [vmem:[#allocation28_spill] sm:$0xff] %v2616_v45  ;;  %v2632_v50 = vld [vmem:[#allocation5 + $0x260] sm:$0xff]  ;;  %v2634_v51 = vld [vmem:[#allocation5 + $0x268] sm:$0xff]  ;;  %289 = vmatpush.msra.mxu1 %v2620_v46  ;;  %329 = vmatpush.msra.mxu3 %v2622_v47 }
  0x2e   :  { %4850 = vst [vmem:[#allocation29_spill] sm:$0xff] %v2620_v46  ;;  %v2638_v52 = vld [vmem:[#allocation5 + $0x40] sm:$0xff]  ;;  %v2640_v53 = vld [vmem:[#allocation5 + $0x48] sm:$0xff]  ;;  %270 = vmatpush.msra.mxu0 %v2626_v48  ;;  %310 = vmatpush.msra.mxu2 %v2628_v49 }
  0x2f   :  { %4851 = vst [vmem:[#allocation30_spill] sm:$0xff] %v2622_v47  ;;  %v2644_v54 = vld [vmem:[#allocation5 + $0x240] sm:$0xff]  ;;  %v2646_v55 = vld [vmem:[#allocation5 + $0x248] sm:$0xff]  ;;  %290 = vmatpush.msra.mxu1 %v2632_v50  ;;  %330 = vmatpush.msra.mxu3 %v2634_v51 }
  0x30   :  { %4852 = vst [vmem:[#allocation31_spill] sm:$0xff] %v2626_v48  ;;  %v2650_v56 = vld [vmem:[#allocation5 + $0x20] sm:$0xff]  ;;  %v2652_v57 = vld [vmem:[#allocation5 + $0x28] sm:$0xff]  ;;  %271 = vmatpush.msra.mxu0 %v2638_v52  ;;  %311 = vmatpush.msra.mxu2 %v2640_v53  ;;  %v2710_v48 = vld [vmem:[#allocation5 + $0x198] sm:$0xff] }
  0x31   :  { %4853 = vst [vmem:[#allocation32_spill] sm:$0xff] %v2628_v49  ;;  %v2656_v58 = vld [vmem:[#allocation5 + $0x220] sm:$0xff]  ;;  %v2658_v59 = vld [vmem:[#allocation5 + $0x228] sm:$0xff]  ;;  %291 = vmatpush.msra.mxu1 %v2644_v54  ;;  %331 = vmatpush.msra.mxu3 %v2646_v55 }
  0x32   :  { %4854 = vst [vmem:[#allocation33_spill] sm:$0xff] %v2632_v50  ;;  %v2662_v60 = vld [vmem:[#allocation5] sm:$0xff]  ;;  %v2664_v61 = vld [vmem:[#allocation5 + $0x8] sm:$0xff]  ;;  %272 = vmatpush.msra.mxu0 %v2650_v56  ;;  %312 = vmatpush.msra.mxu2 %v2652_v57  ;;  %v84_v50 = vld [vmem:[#allocation2 + $0x10] sm:$0x1] }
  0x33   :  { %4855 = vst [vmem:[#allocation34_spill] sm:$0xff] %v2634_v51  ;;  %292 = vmatpush.msra.mxu1 %v2656_v58  ;;  %332 = vmatpush.msra.mxu3 %v2658_v59  ;;  %v2700_v51 = vld [vmem:[#allocation5 + $0x190] sm:$0xff]  ;;  %v86_v49 = vld [vmem:[#allocation2 + $0x20] sm:$0x1]  ;;  %v101_v46 = vrot.slane %v84_v50, 6 }
  0x34   :  { %4856 = vst [vmem:[#allocation35_spill] sm:$0xff] %v2638_v52  ;;  %273 = vmatpush.msra.mxu0 %v2662_v60  ;;  %313 = vmatpush.msra.mxu2 %v2664_v61  ;;  %v2692_v52 = vld [vmem:[#allocation5 + $0x3d0] sm:$0xff] }
  0x35   :  { %4857 = vst [vmem:[#allocation36_spill] sm:$0xff] %v2640_v53  ;;  %v2674_v53 = vld [vmem:[#allocation5 + $0x200] sm:$0xff] }
  0x36   :  { %4858 = vst [vmem:[#allocation37_spill] sm:$0xff] %v2644_v54  ;;  %v2676_v54 = vld [vmem:[#allocation5 + $0x208] sm:$0xff]  ;;  %338 = vmatpush.msrb.mxu0 %v2668_v62  ;;  %378 = vmatpush.msrb.mxu2 %v2670_v63  ;;  %v2704_v63 = vld [vmem:[#allocation5 + $0x3b0] sm:$0xff] }
  0x37   :  { %4859 = vst [vmem:[#allocation38_spill] sm:$0xff] %v2646_v55  ;;  %v2680_v55 = vld [vmem:[#allocation5 + $0x1d0] sm:$0xff]  ;;  %293 = vmatpush.msra.mxu1 %v2674_v53  ;;  %333 = vmatpush.msra.mxu3 %v2676_v54  ;;  %v83_v62 = vld [vmem:[#allocation2 + $0x8] sm:$0x1] }
  0x38   :  { %4860 = vst [vmem:[#allocation39_spill] sm:$0xff] %v2650_v56  ;;  %v2682_v56 = vld [vmem:[#allocation5 + $0x3f0] sm:$0xff]  ;;  %339 = vmatpush.msrb.mxu0 %v2680_v55  ;;  %v98_v47 = vrot.slane %v83_v62, 7 }
  0x39   :  { %4861 = vst [vmem:[#allocation40_spill] sm:$0xff] %v2652_v57  ;;  %v2684_v57 = vld [vmem:[#allocation5 + $0x1d8] sm:$0xff]  ;;  %358 = vmatpush.msrb.mxu1 %v2682_v56  ;;  %v2729_v62 = vld [vmem:[#allocation5 + $0x150] sm:$0xff] }
  0x3a   :  { %4862 = vst [vmem:[#allocation41_spill] sm:$0xff] %v2656_v58  ;;  %v2688_v58 = vld [vmem:[#allocation5 + $0x3f8] sm:$0xff]  ;;  %379 = vmatpush.msrb.mxu2 %v2684_v57 }
  0x3b   :  { %4863 = vst [vmem:[#allocation42_spill] sm:$0xff] %v2658_v59  ;;  %v2690_v59 = vld [vmem:[#allocation5 + $0x1b0] sm:$0xff]  ;;  %398 = vmatpush.msrb.mxu3 %v2688_v58  ;;  %359 = vmatpush.msrb.mxu1 %v2692_v52 }
  0x3c   :  { %4864 = vst [vmem:[#allocation43_spill] sm:$0xff] %v2662_v60  ;;  %v2698_v60 = vld [vmem:[#allocation5 + $0x3d8] sm:$0xff]  ;;  %340 = vmatpush.msrb.mxu0 %v2690_v59 }
  0x3d   :  { %4865 = vst [vmem:[#allocation44_spill] sm:$0xff] %v2664_v61  ;;  %v2696_v61 = vld [vmem:[#allocation5 + $0x1b8] sm:$0xff]  ;;  %399 = vmatpush.msrb.mxu3 %v2698_v60  ;;  %360 = vmatpush.msrb.mxu1 %v2704_v63 }
  0x3e   :  { %4868 = vst [vmem:[#allocation47_spill] sm:$0xff] %v2674_v53  ;;  %v85_v53 = vld [vmem:[#allocation2 + $0x18] sm:$0x1]  ;;  %380 = vmatpush.msrb.mxu2 %v2696_v61  ;;  %341 = vmatpush.msrb.mxu0 %v2700_v51 }
  0x3f   :  { %4869 = vst [vmem:[#allocation48_spill] sm:$0xff] %v2676_v54  ;;  %v82_v54 = vld [vmem:[#allocation2] sm:$0x1]  ;;  %v104_v45 = vrot.slane %v85_v53, 5  ;;  %v2731_v53 = vld [vmem:[#allocation5 + $0x370] sm:$0xff] }
  0x40   :  { %4870 = vst [vmem:[#allocation49_spill] sm:$0xff] %v2680_v55  ;;  %v2712_v55 = vld [vmem:[#allocation5 + $0x3b8] sm:$0xff]  ;;  %v100_v50 = vsel %vm99_vm0, %v98_v47, %v82_v54  ;;  %381 = vmatpush.msrb.mxu2 %v2710_v48 }
  0x41   :  { %4871 = vst [vmem:[#allocation50_spill] sm:$0xff] %v2682_v56  ;;  %v87_v56 = vld [vmem:[#allocation2 + $0x28] sm:$0x1]  ;;  %400 = vmatpush.msrb.mxu3 %v2712_v55  ;;  %v2738_v47 = vld [vmem:[#allocation5 + $0x378] sm:$0xff] }
  0x42   :  { %4872 = vst [vmem:[#allocation51_spill] sm:$0xff] %v2684_v57  ;;  %v2716_v57 = vld [vmem:[#allocation5 + $0x170] sm:$0xff] }
  0x43   :  { %4873 = vst [vmem:[#allocation52_spill] sm:$0xff] %v2688_v58  ;;  %v2718_v58 = vld [vmem:[#allocation5 + $0x390] sm:$0xff]  ;;  %342 = vmatpush.msrb.mxu0 %v2716_v57  ;;  %401 = vmatpush.msrb.mxu3 %v2724_v44 }
  0x44   :  { %4874 = vst [vmem:[#allocation53_spill] sm:$0xff] %v2690_v59  ;;  %v107_v59 = vrot.slane %v86_v49, 4  ;;  %v88_v49 = vld [vmem:[#allocation2 + $0x30] sm:$0x1]  ;;  %361 = vmatpush.msrb.mxu1 %v2718_v58 }
  0x45   :  { %4875 = vst [vmem:[#allocation54_spill] sm:$0xff] %v2692_v52  ;;  %v2722_v52 = vld [vmem:[#allocation5 + $0x178] sm:$0xff]  ;;  %343 = vmatpush.msrb.mxu0 %v2729_v62  ;;  %402 = vmatpush.msrb.mxu3 %v2738_v47 }
  0x46   :  { %4876 = vst [vmem:[#allocation55_spill] sm:$0xff] %v2698_v60  ;;  %v110_v60 = vrot.slane %v87_v56, 3  ;;  %382 = vmatpush.msrb.mxu2 %v2722_v52  ;;  %362 = vmatpush.msrb.mxu1 %v2731_v53  ;;  %v2750_v56 = vld [vmem:[#allocation5 + $0x138] sm:$0xff] }
  0x47   :  { %4877 = vst [vmem:[#allocation56_spill] sm:$0xff] %v2700_v51  ;;  %v103_v51 = vsel %vm102_vm1, %v101_v46, %v100_v50  ;;  %v2752_v50 = vld [vmem:[#allocation5 + $0x358] sm:$0xff] }
  0x48   :  { %4878 = vst [vmem:[#allocation57_spill] sm:$0xff] %v2704_v63  ;;  %v2736_v63 = vld [vmem:[#allocation5 + $0x158] sm:$0xff]  ;;  %v106_v54 = vsel %vm105_vm2, %v104_v45, %v103_v51  ;;  %v113_v51 = vrot.slane %v88_v49, 2  ;;  %403 = vmatpush.msrb.mxu3 %v2752_v50  ;;  %v2769_v49 = vld [vmem:[#allocation5 + $0xf0] sm:$0xff] }
  0x49   :  { %4879 = vst [vmem:[#allocation58_spill] sm:$0xff] %v2710_v48  ;;  %v2745_v48 = vld [vmem:[#allocation5 + $0x350] sm:$0xff]  ;;  %v109_v46 = vsel %vm108_vm3, %v107_v59, %v106_v54  ;;  %v89_v45 = vld [vmem:[#allocation2 + $0x38] sm:$0x1]  ;;  %383 = vmatpush.msrb.mxu2 %v2736_v63 }
  0x4a   :  { %4880 = vst [vmem:[#allocation59_spill] sm:$0xff] %v2712_v55  ;;  %v2743_v55 = vld [vmem:[#allocation5 + $0x130] sm:$0xff]  ;;  %v112_v59 = vsel %vm111_vm4, %v110_v60, %v109_v46  ;;  %363 = vmatpush.msrb.mxu1 %v2745_v48  ;;  %v2763_v54 = vld [vmem:[#allocation5 + $0x118] sm:$0xff] }
  0x4b   :  { %4881 = vst [vmem:[#allocation60_spill] sm:$0xff] %v2716_v57  ;;  %344 = vmatpush.msrb.mxu0 %v2743_v55  ;;  %384 = vmatpush.msrb.mxu2 %v2750_v56  ;;  %v2775_v60 = vld [vmem:[#allocation5 + $0xf8] sm:$0xff] }
  0x4c   :  { %4882 = vst [vmem:[#allocation61_spill] sm:$0xff] %v2718_v58  ;;  %v2777_v46 = vld [vmem:[#allocation5 + $0x318] sm:$0xff] }
  0x4d   :  { %4883 = vst [vmem:[#allocation62_spill] sm:$0xff] %v2722_v52  ;;  %v2758_v52 = vld [vmem:[#allocation5 + $0x330] sm:$0xff]  ;;  %385 = vmatpush.msrb.mxu2 %v2763_v54 }
  0x4e   :  { %4884 = vst [vmem:[#allocation63_spill] sm:$0xff] %v2724_v44  ;;  %v2756_v44 = vld [vmem:[#allocation5 + $0x110] sm:$0xff]  ;;  %364 = vmatpush.msrb.mxu1 %v2758_v52 }
  0x4f   :  { %4885 = vst [vmem:[#allocation64_spill] sm:$0xff] %v2731_v53  ;;  %v2765_v53 = vld [vmem:[#allocation5 + $0x338] sm:$0xff]  ;;  %345 = vmatpush.msrb.mxu0 %v2756_v44  ;;  %386 = vmatpush.msrb.mxu2 %v2775_v60 }
  0x50   :  { %4886 = vst [vmem:[#allocation65_spill] sm:$0xff] %v2736_v63  ;;  %v116_v63 = vrot.slane %v89_v45, 1  ;;  %404 = vmatpush.msrb.mxu3 %v2765_v53  ;;  %v2788_v45 = vld [vmem:[#allocation5 + $0xd8] sm:$0xff] }
  0x51   :  { %4887 = vst [vmem:[#allocation66_spill] sm:$0xff] %v2738_v47  ;;  %v2771_v47 = vld [vmem:[#allocation5 + $0x310] sm:$0xff]  ;;  %346 = vmatpush.msrb.mxu0 %v2769_v49  ;;  %387 = vmatpush.msrb.mxu2 %v2788_v45 }
  0x52   :  { %4888 = vst [vmem:[#allocation67_spill] sm:$0xff] %v2743_v55  ;;  %365 = vmatpush.msrb.mxu1 %v2771_v47  ;;  %405 = vmatpush.msrb.mxu3 %v2777_v46 }
  0x53   :  { %4889 = vst [vmem:[#allocation68_spill] sm:$0xff] %v2745_v48  ;;  %v115_v48 = vsel %vm114_vm5, %v113_v51, %v112_v59  ;;  %v2795_v59 = vld [vmem:[#allocation5 + $0xb0] sm:$0xff] }
  0x54   :  { %4890 = vst [vmem:[#allocation69_spill] sm:$0xff] %v2750_v56  ;;  %v2784_v56 = vld [vmem:[#allocation5 + $0x2f0] sm:$0xff]  ;;  %v118_v51 = vsel %vm117_vm6, %v116_v63, %v115_v48  ;;  %v2814_v63 = vld [vmem:[#allocation5 + $0x98] sm:$0xff] }
  0x55   :  { %4891 = vst [vmem:[#allocation70_spill] sm:$0xff] %v2752_v50  ;;  %v2782_v50 = vld [vmem:[#allocation5 + $0xd0] sm:$0xff]  ;;  %366 = vmatpush.msrb.mxu1 %v2784_v56  ;;  %314 = vmatmul.f32.vlgmr.msra.gmra.mxu2 %v118_v51 }
  0x56   :  { %4892 = vst [vmem:[#allocation71_spill] sm:$0xff] %v2756_v44  ;;  %347 = vmatpush.msrb.mxu0 %v2782_v50  ;;  %v2810_v48 = vld [vmem:[#allocation5 + $0x2b0] sm:$0xff] }
  0x57   :  { %4893 = vst [vmem:[#allocation72_spill] sm:$0xff] %v2758_v52  ;;  %v2790_v52 = vld [vmem:[#allocation5 + $0x2f8] sm:$0xff]  ;;  %274 = vmatmul.f32.vlgmr.msra.gmra.mxu0 %v118_v51 }
  0x58   :  { %4894 = vst [vmem:[#allocation73_spill] sm:$0xff] %v2763_v54  ;;  %406 = vmatpush.msrb.mxu3 %v2790_v52  ;;  %348 = vmatpush.msrb.mxu0 %v2795_v59 }
  0x59   :  { %4895 = vst [vmem:[#allocation74_spill] sm:$0xff] %v2765_v53  ;;  %v2799_v53 = vld [vmem:[#allocation5 + $0x2d0] sm:$0xff] }
  0x5a   :  { %4896 = vst [vmem:[#allocation75_spill] sm:$0xff] %v2769_v49  ;;  %v2801_v49 = vld [vmem:[#allocation5 + $0xb8] sm:$0xff]  ;;  %367 = vmatpush.msrb.mxu1 %v2799_v53 }
  0x5b   :  { %4897 = vst [vmem:[#allocation76_spill] sm:$0xff] %v2771_v47  ;;  %v2805_v47 = vld [vmem:[#allocation5 + $0x2d8] sm:$0xff]  ;;  %388 = vmatpush.msrb.mxu2 %v2801_v49 }
  0x5c   :  { %4898 = vst [vmem:[#allocation77_spill] sm:$0xff] %v2775_v60  ;;  %v2807_v60 = vld [vmem:[#allocation5 + $0x90] sm:$0xff]  ;;  %407 = vmatpush.msrb.mxu3 %v2805_v47  ;;  %368 = vmatpush.msrb.mxu1 %v2810_v48 }
  0x5d   :  { %4899 = vst [vmem:[#allocation78_spill] sm:$0xff] %v2777_v46  ;;  %349 = vmatpush.msrb.mxu0 %v2807_v60  ;;  %389 = vmatpush.msrb.mxu2 %v2814_v63  ;;  %v2861_v46 = vld [vmem:[#allocation5 + $0x18] sm:$0xff] }
  0x5e   :  { %4900 = vst [vmem:[#allocation79_spill] sm:$0xff] %v2782_v50  ;;  %v2825_v50 = vld [vmem:[#allocation5 + $0x78] sm:$0xff] }
  0x5f   :  { %4901 = vst [vmem:[#allocation80_spill] sm:$0xff] %v2784_v56  ;;  %v2816_v56 = vld [vmem:[#allocation5 + $0x2b8] sm:$0xff]  ;;  %390 = vmatpush.msrb.mxu2 %v2825_v50 }
  0x60   :  { %4902 = vst [vmem:[#allocation81_spill] sm:$0xff] %v2788_v45  ;;  %v2442_v45 = vmov 0.0   ;;  %408 = vmatpush.msrb.mxu3 %v2816_v56 }
  0x61   :  { %4903 = vst [vmem:[#allocation82_spill] sm:$0xff] %v2790_v52  ;;  %v2820_v52 = vld [vmem:[#allocation5 + $0x290] sm:$0xff]  ;;  %334 = vmatmul.f32.vlgmr.msra.gmra.mxu3 %v2442_v45  ;;  %294 = vmatmul.f32.vlgmr.msra.gmra.mxu1 %v2442_v45 }
  0x62   :  { %4904 = vst [vmem:[#allocation83_spill] sm:$0xff] %v2795_v59  ;;  %v2823_v59 = vld [vmem:[#allocation5 + $0x70] sm:$0xff]  ;;  %369 = vmatpush.msrb.mxu1 %v2820_v52 }
  0x63   :  { %4905 = vst [vmem:[#allocation84_spill] sm:$0xff] %v2799_v53  ;;  %350 = vmatpush.msrb.mxu0 %v2823_v59  ;;  %v2840_v53 = vld [vmem:[#allocation5 + $0x278] sm:$0xff] }
  0x64   :  { %4906 = vst [vmem:[#allocation85_spill] sm:$0xff] %v2801_v49  ;;  %v2829_v49 = vld [vmem:[#allocation5 + $0x298] sm:$0xff] }
  0x65   :  { %4907 = vst [vmem:[#allocation86_spill] sm:$0xff] %v2805_v47  ;;  %v2834_v47 = vld [vmem:[#allocation5 + $0x270] sm:$0xff]  ;;  %409 = vmatpush.msrb.mxu3 %v2829_v49 }
  0x66   :  { %4908 = vst [vmem:[#allocation87_spill] sm:$0xff] %v2807_v60  ;;  %v2832_v60 = vld [vmem:[#allocation5 + $0x50] sm:$0xff]  ;;  %370 = vmatpush.msrb.mxu1 %v2834_v47 }
  0x67   :  { %4909 = vst [vmem:[#allocation88_spill] sm:$0xff] %v2810_v48  ;;  %v2838_v48 = vld [vmem:[#allocation5 + $0x58] sm:$0xff]  ;;  %351 = vmatpush.msrb.mxu0 %v2832_v60  ;;  %410 = vmatpush.msrb.mxu3 %v2840_v53 }
  0x68   :  { %4910 = vst [vmem:[#allocation89_spill] sm:$0xff] %v2814_v63  ;;  %v2845_v63 = vld [vmem:[#allocation5 + $0x250] sm:$0xff]  ;;  %391 = vmatpush.msrb.mxu2 %v2838_v48 }
  0x69   :  { %4911 = vst [vmem:[#allocation90_spill] sm:$0xff] %v2816_v56  ;;  %v2843_v56 = vld [vmem:[#allocation5 + $0x30] sm:$0xff]  ;;  %371 = vmatpush.msrb.mxu1 %v2845_v63 }
  0x6a   :  { %4912 = vst [vmem:[#allocation91_spill] sm:$0xff] %v2820_v52  ;;  %v2849_v52 = vld [vmem:[#allocation5 + $0x38] sm:$0xff]  ;;  %352 = vmatpush.msrb.mxu0 %v2843_v56 }
  0x6b   :  { %4913 = vst [vmem:[#allocation92_spill] sm:$0xff] %v2823_v59  ;;  %v2851_v59 = vld [vmem:[#allocation5 + $0x258] sm:$0xff]  ;;  %392 = vmatpush.msrb.mxu2 %v2849_v52 }
  0x6c   :  { %4914 = vst [vmem:[#allocation93_spill] sm:$0xff] %v2825_v50  ;;  %v2855_v50 = vld [vmem:[#allocation5 + $0x10] sm:$0xff]  ;;  %411 = vmatpush.msrb.mxu3 %v2851_v59 }
  0x6d   :  { %4915 = vst [vmem:[#allocation94_spill] sm:$0xff] %v2829_v49  ;;  %v2857_v49 = vld [vmem:[#allocation5 + $0x230] sm:$0xff]  ;;  %353 = vmatpush.msrb.mxu0 %v2855_v50  ;;  %393 = vmatpush.msrb.mxu2 %v2861_v46 }
  0x6e   :  { %4916 = vst [vmem:[#allocation95_spill] sm:$0xff] %v2832_v60  ;;  %v2863_v60 = vld [vmem:[#allocation5 + $0x238] sm:$0xff]  ;;  %372 = vmatpush.msrb.mxu1 %v2857_v49  ;;  %354 = vmatmul.f32.vlgmr.msrb.gmra.mxu0 %v118_v51 }
  0x6f   :  { %4917 = vst [vmem:[#allocation96_spill] sm:$0xff] %v2834_v47  ;;  %412 = vmatpush.msrb.mxu3 %v2863_v60  ;;  %394 = vmatmul.f32.vlgmr.msrb.gmra.mxu2 %v118_v51  ;;  %v4941_v51 = vld [vmem:[#allocation38_spill] sm:$0xff] }
  0x70   :  { %4918 = vst [vmem:[#allocation97_spill] sm:$0xff] %v2838_v48  ;;  %v2871_v48 = vld [vmem:[#allocation5 + $0x218] sm:$0xff]  ;;  %467 = vmatpush.msra.mxu0 %v2486_v0  ;;  %507 = vmatpush.msra.mxu2 %v2488_v1 }
  0x71   :  { %4919 = vst [vmem:[#allocation98_spill] sm:$0xff] %v2840_v53  ;;  %v2869_v53 = vld [vmem:[#allocation5 + $0x210] sm:$0xff]  ;;  %413 = vmatpush.msrb.mxu3 %v2871_v48 }
  0x72   :  { %4920 = vst [vmem:[#allocation99_spill] sm:$0xff] %v2843_v56  ;;  %373 = vmatpush.msrb.mxu1 %v2869_v53  ;;  %414 = vmatmul.f32.vlgmr.msrb.gmra.mxu3 %v2442_v45 }
  0x73   :  { %4921 = vst [vmem:[#allocation100_spill] sm:$0xff] %v2845_v63  ;;  %374 = vmatmul.f32.vlgmr.msrb.gmra.mxu1 %v2442_v45  ;;  %527 = vmatpush.msra.mxu3 %v2498_v5  ;;  %v4931_v5 = vld [vmem:[#allocation28_spill] sm:$0xff]  ;;  %v4940_v45 = vld [vmem:[#allocation37_spill] sm:$0xff] }
  0x74   :  { %4922 = vst [vmem:[#allocation101_spill] sm:$0xff] %v2849_v52  ;;  %487 = vmatpush.msra.mxu1 %v2494_v3  ;;  %468 = vmatpush.msra.mxu0 %v2490_v2  ;;  %v4930_v3 = vld [vmem:[#allocation27_spill] sm:$0xff] }
  0x75   :  { %4923 = vst [vmem:[#allocation102_spill] sm:$0xff] %v2851_v59  ;;  %508 = vmatpush.msra.mxu2 %v2496_v4  ;;  %528 = vmatpush.msra.mxu3 %v2510_v9  ;;  %v4933_v9 = vld [vmem:[#allocation30_spill] sm:$0xff] }
  0x76   :  { %4924 = vst [vmem:[#allocation103_spill] sm:$0xff] %v2855_v50  ;;  %488 = vmatpush.msra.mxu1 %v2504_v7  ;;  %469 = vmatpush.msra.mxu0 %v2502_v6  ;;  %v4932_v7 = vld [vmem:[#allocation29_spill] sm:$0xff] }
  0x77   :  { %4925 = vst [vmem:[#allocation104_spill] sm:$0xff] %v2857_v49  ;;  %509 = vmatpush.msra.mxu2 %v2506_v8  ;;  %529 = vmatpush.msra.mxu3 %v2520_v13  ;;  %v4935_v13 = vld [vmem:[#allocation32_spill] sm:$0xff] }
  0x78   :  { %4926 = vst [vmem:[#allocation105_spill] sm:$0xff] %v2861_v46  ;;  %489 = vmatpush.msra.mxu1 %v2512_v10  ;;  %470 = vmatpush.msra.mxu0 %v2516_v11  ;;  %v4934_v10 = vld [vmem:[#allocation31_spill] sm:$0xff] }
  0x79   :  { %4927 = vst [vmem:[#allocation106_spill] sm:$0xff] %v2863_v60  ;;  %510 = vmatpush.msra.mxu2 %v2518_v12  ;;  %530 = vmatpush.msra.mxu3 %v2526_v15  ;;  %v4937_v15 = vld [vmem:[#allocation34_spill] sm:$0xff] }
  0x7a   :  { %4928 = vst [vmem:[#allocation107_spill] sm:$0xff] %v2869_v53  ;;  %490 = vmatpush.msra.mxu1 %v2524_v14  ;;  %471 = vmatpush.msra.mxu0 %v2530_v16  ;;  %v4936_v14 = vld [vmem:[#allocation33_spill] sm:$0xff] }
  0x7b   :  { %4929 = vst [vmem:[#allocation108_spill] sm:$0xff] %v2871_v48  ;;  %511 = vmatpush.msra.mxu2 %v2532_v17  ;;  %531 = vmatpush.msra.mxu3 %v2538_v19  ;;  %v4939_v19 = vld [vmem:[#allocation36_spill] sm:$0xff] }
  0x7c   :  { %491 = vmatpush.msra.mxu1 %v2536_v18  ;;  %472 = vmatpush.msra.mxu0 %v2542_v20  ;;  %v4938_v18 = vld [vmem:[#allocation35_spill] sm:$0xff] }
  0x7d   :  { %512 = vmatpush.msra.mxu2 %v2544_v21  ;;  %532 = vmatpush.msra.mxu3 %v2550_v23  ;;  %v4962_v23 = vld [vmem:[#allocation59_spill] sm:$0xff] }
  0x7e   :  { %492 = vmatpush.msra.mxu1 %v2548_v22  ;;  %473 = vmatpush.msra.mxu0 %v2554_v24  ;;  %v4967_v22 = vld [vmem:[#allocation66_spill] sm:$0xff] }
  0x7f   :  { %513 = vmatpush.msra.mxu2 %v2556_v25  ;;  %533 = vmatpush.msra.mxu3 %v2562_v27  ;;  %v4958_v27 = vld [vmem:[#allocation55_spill] sm:$0xff] }
  0x80   :  { %493 = vmatpush.msra.mxu1 %v2560_v26  ;;  %474 = vmatpush.msra.mxu0 %v2566_v28  ;;  %v4959_v26 = vld [vmem:[#allocation56_spill] sm:$0xff] }
  0x81   :  { %514 = vmatpush.msra.mxu2 %v2568_v29  ;;  %534 = vmatpush.msra.mxu3 %v2574_v31  ;;  %v4954_v31 = vld [vmem:[#allocation51_spill] sm:$0xff] }
  0x82   :  { %494 = vmatpush.msra.mxu1 %v2572_v30  ;;  %475 = vmatpush.msra.mxu0 %v2578_v32  ;;  %v4957_v30 = vld [vmem:[#allocation54_spill] sm:$0xff] }
  0x83   :  { %515 = vmatpush.msra.mxu2 %v2580_v33  ;;  %535 = vmatpush.msra.mxu3 %v2586_v35  ;;  %v4950_v35 = vld [vmem:[#allocation47_spill] sm:$0xff] }
  0x84   :  { %495 = vmatpush.msra.mxu1 %v2584_v34  ;;  %476 = vmatpush.msra.mxu0 %v2590_v36  ;;  %v4953_v34 = vld [vmem:[#allocation50_spill] sm:$0xff] }
  0x85   :  { %516 = vmatpush.msra.mxu2 %v2592_v37  ;;  %536 = vmatpush.msra.mxu3 %v2598_v39  ;;  %v4946_v39 = vld [vmem:[#allocation43_spill] sm:$0xff] }
  0x86   :  { %496 = vmatpush.msra.mxu1 %v2596_v38  ;;  %477 = vmatpush.msra.mxu0 %v2602_v40  ;;  %v4949_v38 = vld [vmem:[#allocation46_spill] sm:$0xff] }
  0x87   :  { %517 = vmatpush.msra.mxu2 %v2604_v41  ;;  %537 = vmatpush.msra.mxu3 %v2610_v43  ;;  %v4942_v43 = vld [vmem:[#allocation39_spill] sm:$0xff] }
  0x88   :  { %497 = vmatpush.msra.mxu1 %v2608_v42  ;;  %478 = vmatpush.msra.mxu0 %v4930_v3  ;;  %v4945_v42 = vld [vmem:[#allocation42_spill] sm:$0xff] }
  0x89   :  { %518 = vmatpush.msra.mxu2 %v4931_v5  ;;  %538 = vmatpush.msra.mxu3 %v4933_v9  ;;  %v4944_v9 = vld [vmem:[#allocation41_spill] sm:$0xff] }
  0x8a   :  { %498 = vmatpush.msra.mxu1 %v4932_v7  ;;  %479 = vmatpush.msra.mxu0 %v4934_v10  ;;  %v4943_v7 = vld [vmem:[#allocation40_spill] sm:$0xff] }
  0x8b   :  { %519 = vmatpush.msra.mxu2 %v4935_v13  ;;  %539 = vmatpush.msra.mxu3 %v4937_v15  ;;  %v4948_v15 = vld [vmem:[#allocation45_spill] sm:$0xff] }
  0x8c   :  { %499 = vmatpush.msra.mxu1 %v4936_v14  ;;  %480 = vmatpush.msra.mxu0 %v4938_v18  ;;  %v4947_v14 = vld [vmem:[#allocation44_spill] sm:$0xff] }
  0x8d   :  { %520 = vmatpush.msra.mxu2 %v4939_v19  ;;  %540 = vmatpush.msra.mxu3 %v4941_v51  ;;  %v4952_v51 = vld [vmem:[#allocation49_spill] sm:$0xff] }
  0x8e   :  { %500 = vmatpush.msra.mxu1 %v4940_v45  ;;  %481 = vmatpush.msra.mxu0 %v4942_v43  ;;  %v4951_v45 = vld [vmem:[#allocation48_spill] sm:$0xff] }
  0x8f   :  { %521 = vmatpush.msra.mxu2 %v4943_v7  ;;  %541 = vmatpush.msra.mxu3 %v4945_v42  ;;  %v4956_v42 = vld [vmem:[#allocation53_spill] sm:$0xff] }
  0x90   :  { %501 = vmatpush.msra.mxu1 %v4944_v9  ;;  %482 = vmatpush.msra.mxu0 %v4946_v39  ;;  %v4955_v9 = vld [vmem:[#allocation52_spill] sm:$0xff] }
  0x91   :  { %522 = vmatpush.msra.mxu2 %v4947_v14  ;;  %542 = vmatpush.msra.mxu3 %v4951_v45  ;;  %v4961_v45 = vld [vmem:[#allocation58_spill] sm:$0xff] }
  0x92   :  { %547 = vmatpush.msrb.mxu0 %v4948_v15  ;;  %502 = vmatpush.msra.mxu1 %v4950_v35  ;;  %v4960_v35 = vld [vmem:[#allocation57_spill] sm:$0xff] }
  0x93   :  { %587 = vmatpush.msrb.mxu2 %v4949_v38  ;;  %607 = vmatpush.msrb.mxu3 %v4955_v9  ;;  %v4963_v9 = vld [vmem:[#allocation62_spill] sm:$0xff] }
  0x94   :  { %548 = vmatpush.msrb.mxu0 %v4952_v51  ;;  %567 = vmatpush.msrb.mxu1 %v4953_v34  ;;  %v4964_v34 = vld [vmem:[#allocation63_spill] sm:$0xff] }
  0x95   :  { %588 = vmatpush.msrb.mxu2 %v4954_v31  ;;  %608 = vmatpush.msrb.mxu3 %v4958_v27  ;;  %v4966_v27 = vld [vmem:[#allocation65_spill] sm:$0xff] }
  0x96   :  { %549 = vmatpush.msrb.mxu0 %v4956_v42  ;;  %568 = vmatpush.msrb.mxu1 %v4957_v30  ;;  %v4965_v30 = vld [vmem:[#allocation64_spill] sm:$0xff] }
  0x97   :  { %589 = vmatpush.msrb.mxu2 %v2696_v61  ;;  %609 = vmatpush.msrb.mxu3 %v4962_v23  ;;  %v4969_v23 = vld [vmem:[#allocation69_spill] sm:$0xff] }
  0x98   :  { %550 = vmatpush.msrb.mxu0 %v4959_v26  ;;  %569 = vmatpush.msrb.mxu1 %v4960_v35  ;;  %v4968_v35 = vld [vmem:[#allocation68_spill] sm:$0xff] }
  0x99   :  { %590 = vmatpush.msrb.mxu2 %v4961_v45  ;;  %610 = vmatpush.msrb.mxu3 %v4964_v34  ;;  %v4972_v34 = vld [vmem:[#allocation74_spill] sm:$0xff] }
  0x9a   :  { %551 = vmatpush.msrb.mxu0 %v2716_v57  ;;  %570 = vmatpush.msrb.mxu1 %v2718_v58  ;;  %v4970_v57 = vld [vmem:[#allocation70_spill] sm:$0xff]  ;;  %v4971_v58 = vld [vmem:[#allocation72_spill] sm:$0xff] }
  0x9b   :  { %591 = vmatpush.msrb.mxu2 %v4963_v9  ;;  %611 = vmatpush.msrb.mxu3 %v4967_v22  ;;  %v4975_v22 = vld [vmem:[#allocation77_spill] sm:$0xff] }
  0x9c   :  { %552 = vmatpush.msrb.mxu0 %v2729_v62  ;;  %571 = vmatpush.msrb.mxu1 %v4965_v30  ;;  %v4973_v30 = vld [vmem:[#allocation75_spill] sm:$0xff] }
  0x9d   :  { %592 = vmatpush.msrb.mxu2 %v4966_v27  ;;  %612 = vmatpush.msrb.mxu3 %v4970_v57  ;;  %v4974_v27 = vld [vmem:[#allocation76_spill] sm:$0xff]  ;;  %v4979_v57 = vld [vmem:[#allocation81_spill] sm:$0xff] }
  0x9e   :  { %553 = vmatpush.msrb.mxu0 %v2743_v55  ;;  %572 = vmatpush.msrb.mxu1 %v4968_v35  ;;  %v4976_v55 = vld [vmem:[#allocation78_spill] sm:$0xff]  ;;  %v4977_v35 = vld [vmem:[#allocation79_spill] sm:$0xff] }
  0x9f   :  { %593 = vmatpush.msrb.mxu2 %v4969_v23  ;;  %613 = vmatpush.msrb.mxu3 %v4972_v34  ;;  %v4978_v23 = vld [vmem:[#allocation80_spill] sm:$0xff]  ;;  %v4983_v34 = vld [vmem:[#allocation85_spill] sm:$0xff] }
  0xa0   :  { %554 = vmatpush.msrb.mxu0 %v2756_v44  ;;  %573 = vmatpush.msrb.mxu1 %v4971_v58  ;;  %v4980_v44 = vld [vmem:[#allocation82_spill] sm:$0xff]  ;;  %v4981_v58 = vld [vmem:[#allocation83_spill] sm:$0xff] }
  0xa1   :  { %594 = vmatpush.msrb.mxu2 %v2763_v54  ;;  %614 = vmatpush.msrb.mxu3 %v4976_v55  ;;  %v4982_v54 = vld [vmem:[#allocation84_spill] sm:$0xff]  ;;  %v4987_v55 = vld [vmem:[#allocation89_spill] sm:$0xff] }
  0xa2   :  { %555 = vmatpush.msrb.mxu0 %v4973_v30  ;;  %574 = vmatpush.msrb.mxu1 %v4974_v27  ;;  %v4984_v30 = vld [vmem:[#allocation86_spill] sm:$0xff]  ;;  %v4985_v27 = vld [vmem:[#allocation87_spill] sm:$0xff] }
  0xa3   :  { %595 = vmatpush.msrb.mxu2 %v4975_v22  ;;  %615 = vmatpush.msrb.mxu3 %v4980_v44  ;;  %v4986_v22 = vld [vmem:[#allocation88_spill] sm:$0xff]  ;;  %v4991_v44 = vld [vmem:[#allocation93_spill] sm:$0xff] }
  0xa4   :  { %556 = vmatpush.msrb.mxu0 %v4977_v35  ;;  %575 = vmatpush.msrb.mxu1 %v4978_v23  ;;  %v4988_v35 = vld [vmem:[#allocation90_spill] sm:$0xff]  ;;  %v4989_v23 = vld [vmem:[#allocation92_spill] sm:$0xff] }
  0xa5   :  { %596 = vmatpush.msrb.mxu2 %v4979_v57  ;;  %616 = vmatpush.msrb.mxu3 %v4984_v30  ;;  %v4990_v57 = vld [vmem:[#allocation91_spill] sm:$0xff]  ;;  %v4994_v30 = vld [vmem:[#allocation97_spill] sm:$0xff] }
  0xa6   :  { %557 = vmatpush.msrb.mxu0 %v4981_v58  ;;  %576 = vmatpush.msrb.mxu1 %v4982_v54  ;;  %v4992_v58 = vld [vmem:[#allocation94_spill] sm:$0xff]  ;;  %v4993_v54 = vld [vmem:[#allocation95_spill] sm:$0xff] }
  0xa7   :  { %597 = vmatpush.msrb.mxu2 %v4983_v34  ;;  %617 = vmatpush.msrb.mxu3 %v4988_v35 }
  0xa8   :  { %558 = vmatpush.msrb.mxu0 %v4985_v27  ;;  %577 = vmatpush.msrb.mxu1 %v4986_v22  ;;  %v4995_v27 = vld [vmem:[#allocation98_spill] sm:$0xff]  ;;  %v248_v22 = vld [vmem:[#allocation7] sm:$0xf] }
  0xa9   :  { %598 = vmatpush.msrb.mxu2 %v4987_v55  ;;  %618 = vmatpush.msrb.mxu3 %v4992_v58 }
  0xaa   :  { %559 = vmatpush.msrb.mxu0 %v4989_v23  ;;  %578 = vmatpush.msrb.mxu1 %v4990_v57  ;;  %v439_v57 = vld [vmem:[#allocation2 + $0x19] sm:$0x1] }
  0xab   :  { %599 = vmatpush.msrb.mxu2 %v4991_v44  ;;  %619 = vmatpush.msrb.mxu3 %v4995_v27  ;;  %v437_v27 = vld [vmem:[#allocation2 + $0x9] sm:$0x1] }
  0xac   :  { %560 = vmatpush.msrb.mxu0 %v4993_v54  ;;  %579 = vmatpush.msrb.mxu1 %v2834_v47  ;;  %v438_v47 = vld [vmem:[#allocation2 + $0x11] sm:$0x1]  ;;  %v452_v58 = vrot.slane %v437_v27, 7  ;;  %v443_v54 = vld [vmem:[#allocation2 + $0x39] sm:$0x1] }
  0xad   :  { %600 = vmatpush.msrb.mxu2 %v4994_v30  ;;  %620 = vmatpush.msrb.mxu3 %v2851_v59  ;;  %v454_v35 = vrot.slane %v438_v47, 6  ;;  %v440_v59 = vld [vmem:[#allocation2 + $0x21] sm:$0x1]  ;;  %v3011_v47 = vperm.slane %v248_v22, 1 }
  0xae   :  { %561 = vmatpush.msrb.mxu0 %v2843_v56  ;;  %580 = vmatpush.msrb.mxu1 %v2845_v63  ;;  %v436_v63 = vld [vmem:[#allocation2 + $0x1] sm:$0x1]  ;;  %v458_v56 = vrot.slane %v440_v59, 4 }
  0xaf   :  { %601 = vmatpush.msrb.mxu2 %v2849_v52  ;;  %621 = vmatpush.msrb.mxu3 %v2863_v60  ;;  %v456_v52 = vrot.slane %v439_v57, 5  ;;  %v442_v60 = vld [vmem:[#allocation2 + $0x31] sm:$0x1] }
  0xb0   :  { %562 = vmatpush.msrb.mxu0 %v2855_v50  ;;  %581 = vmatpush.msrb.mxu1 %v2857_v49  ;;  %v453_v50 = vsel %vm99_vm0, %v452_v58, %v436_v63  ;;  %v441_v49 = vld [vmem:[#allocation2 + $0x29] sm:$0x1]  ;;  %v462_v44 = vrot.slane %v442_v60, 2  ;;  %v464_v58 = vrot.slane %v443_v54, 1 }
  0xb1   :  { %602 = vmatpush.msrb.mxu2 %v2861_v46  ;;  %622 = vmatpush.msrb.mxu3 %v2871_v48  ;;  %v455_v46 = vsel %vm102_vm1, %v454_v35, %v453_v50  ;;  %v460_v30 = vrot.slane %v441_v49, 3  ;;  %v3008_v48 = vperm.slane %v248_v22, 0 }
  0xb2   :  { %582 = vmatpush.msrb.mxu1 %v2869_v53  ;;  %v457_v53 = vsel %vm105_vm2, %v456_v52, %v455_v46 }
  0xb3   :  { %v459_v27 = vsel %vm108_vm3, %v458_v56, %v457_v53  ;;  %v3022_v56 = vperm.slane %v248_v22, 2 }
  0xb4   :  { %v461_v23 = vsel %vm111_vm4, %v460_v30, %v459_v27 }
  0xb5   :  { %v463_v57 = vsel %vm114_vm5, %v462_v44, %v461_v23 }
  0xb6   :  { %v465_v35 = vsel %vm117_vm6, %v464_v58, %v463_v57  ;;  %v5015_v57 = vld [vmem:[#allocation73_spill] sm:$0xff] }
  0xb7   :  { %483 = vmatmul.f32.vlgmr.msra.gmra.mxu0 %v465_v35  ;;  %523 = vmatmul.f32.vlgmr.msra.gmra.mxu2 %v465_v35 }
  0xb8   :  { %676 = vmatpush.msra.mxu0 %v2486_v0  ;;  %716 = vmatpush.msra.mxu2 %v2488_v1 }
  0xba   :  { %677 = vmatpush.msra.mxu0 %v2490_v2  ;;  %717 = vmatpush.msra.mxu2 %v2496_v4 }
  0xbc   :  { %678 = vmatpush.msra.mxu0 %v2502_v6  ;;  %718 = vmatpush.msra.mxu2 %v2506_v8  ;;  %v3031_v6 = vperm.slane %v248_v22, 3 }
  0xbe   :  { %679 = vmatpush.msra.mxu0 %v2516_v11  ;;  %719 = vmatpush.msra.mxu2 %v2518_v12 }
  0xbf   :  { %563 = vmatmul.f32.vlgmr.msrb.gmra.mxu0 %v465_v35  ;;  %603 = vmatmul.f32.vlgmr.msrb.gmra.mxu2 %v465_v35  ;;  %v5018_v35 = vld [vmem:[#allocation75_spill] sm:$0xff] }
  0xc0   :  { %680 = vmatpush.msra.mxu0 %v2530_v16  ;;  %720 = vmatpush.msra.mxu2 %v2532_v17 }
  0xc2   :  { %681 = vmatpush.msra.mxu0 %v2542_v20  ;;  %721 = vmatpush.msra.mxu2 %v2544_v21 }
  0xc4   :  { %682 = vmatpush.msra.mxu0 %v2554_v24  ;;  %722 = vmatpush.msra.mxu2 %v2556_v25 }
  0xc6   :  { %683 = vmatpush.msra.mxu0 %v2566_v28  ;;  %723 = vmatpush.msra.mxu2 %v2568_v29 }
  0xc8   :  { %684 = vmatpush.msra.mxu0 %v2578_v32  ;;  %724 = vmatpush.msra.mxu2 %v2580_v33 }
  0xca   :  { %685 = vmatpush.msra.mxu0 %v2590_v36  ;;  %725 = vmatpush.msra.mxu2 %v2592_v37 }
  0xcc   :  { %686 = vmatpush.msra.mxu0 %v2602_v40  ;;  %726 = vmatpush.msra.mxu2 %v2604_v41  ;;  %v3061_v40 = vld [vmem:[#allocation5 + $0x3e0] sm:$0xff]  ;;  %v3064_v41 = vld [vmem:[#allocation5 + $0x3e8] sm:$0xff] }
  0xce   :  { %687 = vmatpush.msra.mxu0 %v4930_v3  ;;  %727 = vmatpush.msra.mxu2 %v4931_v5  ;;  %v3080_v3 = vld [vmem:[#allocation5 + $0x3a8] sm:$0xff] }
  0xcf   :  { %4999 = vst [vmem:[#allocation32_spill] sm:$0xff] %v3080_v3  ;;  %v3088_v5 = vld [vmem:[#allocation5 + $0x388] sm:$0xff] }
  0xd0   :  { %688 = vmatpush.msra.mxu0 %v4934_v10  ;;  %728 = vmatpush.msra.mxu2 %v4935_v13  ;;  %5001 = vst [vmem:[#allocation36_spill] sm:$0xff] %v3088_v5  ;;  %v5006_v10 = vld [vmem:[#allocation16_spill] sm:$0xff]  ;;  %v5007_v13 = vld [vmem:[#allocation65_spill] sm:$0xff] }
  0xd2   :  { %689 = vmatpush.msra.mxu0 %v4938_v18  ;;  %729 = vmatpush.msra.mxu2 %v4939_v19  ;;  %v5010_v18 = vld [vmem:[#allocation67_spill] sm:$0xff]  ;;  %v5011_v19 = vld [vmem:[#allocation69_spill] sm:$0xff] }
  0xd4   :  { %v275_v63 = vpop.f32.mrf.mxu0  ;;  %690 = vmatpush.msra.mxu0 %v4942_v43  ;;  %730 = vmatpush.msra.mxu2 %v4943_v7  ;;  %v3072_v43 = vld [vmem:[#allocation5 + $0x3c8] sm:$0xff] }
  0xd5   :  { %v276_v50 = vadd.f32 %v275_v63, %v3008_v48  ;;  %4997 = vst [vmem:[#allocation28_spill] sm:$0xff] %v3072_v43  ;;  %v5005_v7 = vld [vmem:[#allocation15_spill] sm:$0xff]  ;;  %v5016_v63 = vld [vmem:[#allocation21_spill] sm:$0xff] }
  0xd6   :  { %691 = vmatpush.msra.mxu0 %v4946_v39  ;;  %731 = vmatpush.msra.mxu2 %v4947_v14  ;;  %v3069_v39 = vld [vmem:[#allocation5 + $0x3c0] sm:$0xff] }
  0xd7   :  { %4996 = vst [vmem:[#allocation27_spill] sm:$0xff] %v3069_v39  ;;  %v5008_v14 = vld [vmem:[#allocation17_spill] sm:$0xff] }
  0xd8   :  { %v315_v52 = vpop.f32.mrf.mxu2  ;;  %756 = vmatpush.msrb.mxu0 %v4948_v15  ;;  %796 = vmatpush.msrb.mxu2 %v4949_v38  ;;  %v3077_v38 = vld [vmem:[#allocation5 + $0x3a0] sm:$0xff] }
  0xd9   :  { %v316_v46 = vadd.f32 %v315_v52, %v3011_v47  ;;  %4998 = vst [vmem:[#allocation31_spill] sm:$0xff] %v3077_v38  ;;  %v5009_v15 = vld [vmem:[#allocation18_spill] sm:$0xff]  ;;  %v5020_v52 = vld [vmem:[#allocation23_spill] sm:$0xff] }
  0xda   :  { %757 = vmatpush.msrb.mxu0 %v4952_v51  ;;  %797 = vmatpush.msrb.mxu2 %v4954_v31  ;;  %v3085_v31 = vld [vmem:[#allocation5 + $0x380] sm:$0xff]  ;;  %v5013_v51 = vld [vmem:[#allocation20_spill] sm:$0xff] }
  0xdb   :  { %5000 = vst [vmem:[#allocation35_spill] sm:$0xff] %v3085_v31 }
  0xdc   :  { %758 = vmatpush.msrb.mxu0 %v4956_v42  ;;  %798 = vmatpush.msrb.mxu2 %v2696_v61  ;;  %v3091_v42 = vld [vmem:[#allocation5 + $0x360] sm:$0xff]  ;;  %v3094_v61 = vld [vmem:[#allocation5 + $0x368] sm:$0xff] }
  0xdd   :  { %5002 = vst [vmem:[#allocation39_spill] sm:$0xff] %v3091_v42 }
  0xde   :  { %v295_v49 = vpop.f32.mrf.mxu1  ;;  %759 = vmatpush.msrb.mxu0 %v4959_v26  ;;  %799 = vmatpush.msrb.mxu2 %v4961_v45  ;;  %5003 = vst [vmem:[#allocation40_spill] sm:$0xff] %v3094_v61  ;;  %v5004_v26 = vld [vmem:[#allocation60_spill] sm:$0xff]  ;;  %v5012_v45 = vld [vmem:[#allocation19_spill] sm:$0xff] }
  0xdf   :  { %v296_v53 = vadd.f32 %v295_v49, %v276_v50  ;;  %v5019_v50 = vld [vmem:[#allocation77_spill] sm:$0xff]  ;;  %v5021_v49 = vld [vmem:[#allocation24_spill] sm:$0xff] }
  0xe0   :  { %760 = vmatpush.msrb.mxu0 %v5004_v26  ;;  %800 = vmatpush.msrb.mxu2 %v4963_v9  ;;  %v5014_v9 = vld [vmem:[#allocation71_spill] sm:$0xff] }
  0xe1   :  { %v418_v23 = vmul.f32 0.5, %v296_v53  ;;  %v5023_v53 = vld [vmem:[#allocation81_spill] sm:$0xff]  ;;  %v5053_v26 = vld [vmem:[#allocation63_spill] sm:$0xff] }
  0xe2   :  { %761 = vmatpush.msrb.mxu0 %v2729_v62  ;;  %801 = vmatpush.msrb.mxu2 %v5007_v13  ;;  %v5017_v62 = vld [vmem:[#allocation22_spill] sm:$0xff]  ;;  %v5056_v13 = vld [vmem:[#allocation68_spill] sm:$0xff] }
  0xe3   :  { %1970 = vtanh.f32 %v418_v23  ;;  %v5025_v23 = vld [vmem:[#allocation26_spill] sm:$0xff] }
  0xe4   :  { %v335_v30 = vpop.f32.mrf.mxu3  ;;  %762 = vmatpush.msrb.mxu0 %v5010_v18  ;;  %802 = vmatpush.msrb.mxu2 %v5011_v19  ;;  %v5059_v18 = vld [vmem:[#allocation74_spill] sm:$0xff]  ;;  %v5060_v19 = vld [vmem:[#allocation76_spill] sm:$0xff] }
  0xe5   :  { %v336_v44 = vadd.f32 %v335_v30, %v316_v46  ;;  %v5022_v46 = vld [vmem:[#allocation79_spill] sm:$0xff]  ;;  %v5024_v30 = vld [vmem:[#allocation25_spill] sm:$0xff] }
  0xe6   :  { %763 = vmatpush.msrb.mxu0 %v5014_v9  ;;  %803 = vmatpush.msrb.mxu2 %v5015_v57  ;;  %v5063_v9 = vld [vmem:[#allocation82_spill] sm:$0xff]  ;;  %v5064_v57 = vld [vmem:[#allocation84_spill] sm:$0xff] }
  0xe7   :  { %v422_v54 = vmul.f32 0.5, %v336_v44  ;;  %v5026_v44 = vld [vmem:[#allocation83_spill] sm:$0xff] }
  0xe8   :  { %764 = vmatpush.msrb.mxu0 %v5018_v35  ;;  %804 = vmatpush.msrb.mxu2 %v5019_v50  ;;  %v5067_v35 = vld [vmem:[#allocation90_spill] sm:$0xff]  ;;  %v5068_v50 = vld [vmem:[#allocation91_spill] sm:$0xff] }
  0xe9   :  { %1972 = vtanh.f32 %v422_v54  ;;  %v1971_v8 = vpop.eup %1970  ;;  %v5027_v54 = vld [vmem:[#allocation29_spill] sm:$0xff] }
  0xea   :  { %v420_v11 = vadd.f32 1.0, %v1971_v8  ;;  %765 = vmatpush.msrb.mxu0 %v5022_v46  ;;  %805 = vmatpush.msrb.mxu2 %v5023_v53  ;;  %v5032_v8 = vld [vmem:[#allocation92_spill] sm:$0xff]  ;;  %v5071_v46 = vld [vmem:[#allocation98_spill] sm:$0xff] }
  0xeb   :  { %v355_v0 = vpop.f32.mrf.mxu0  ;;  %v5072_v53 = vld [vmem:[#allocation100_spill] sm:$0xff] }
  0xec   :  { %v356_v1 = vadd.f32 %v355_v0, %v3022_v56  ;;  %v421_v22 = vmul.f32 0.5, %v420_v11  ;;  %766 = vmatpush.msrb.mxu0 %v5026_v44  ;;  %806 = vmatpush.msrb.mxu2 %v4983_v34  ;;  %v5028_v0 = vld [vmem:[#allocation30_spill] sm:$0xff]  ;;  %v5033_v11 = vld [vmem:[#allocation93_spill] sm:$0xff]  ;;  %v5036_v34 = vld [vmem:[#allocation95_spill] sm:$0xff] }
  0xed   :  { %v5075_v44 = vld [vmem:[#allocation106_spill] sm:$0xff] }
  0xee   :  { %807 = vmatpush.msrb.mxu2 %v4987_v55  ;;  %v5040_v55 = vld [vmem:[#allocation99_spill] sm:$0xff] }
  0xef   :  { %v1973_v12 = vpop.eup %1972 }
  0xf0   :  { %v375_v2 = vpop.f32.mrf.mxu1  ;;  %v424_v16 = vadd.f32 1.0, %v1973_v12  ;;  %808 = vmatpush.msrb.mxu2 %v5033_v11  ;;  %v5034_v12 = vld [vmem:[#allocation37_spill] sm:$0xff] }
  0xf1   :  { %v376_v4 = vadd.f32 %v375_v2, %v356_v1  ;;  %v5029_v1 = vld [vmem:[#allocation87_spill] sm:$0xff]  ;;  %v5030_v2 = vld [vmem:[#allocation33_spill] sm:$0xff] }
  0xf2   :  { %v395_v60 = vpop.f32.mrf.mxu2  ;;  %v425_v59 = vmul.f32 0.5, %v424_v16  ;;  %767 = vmatpush.msrb.mxu0 %v5029_v1  ;;  %v5037_v16 = vld [vmem:[#allocation97_spill] sm:$0xff] }
  0xf3   :  { %1974 = vtanh.f32 %v376_v4  ;;  %v396_v17 = vadd.f32 %v395_v60, %v3031_v6  ;;  %v5031_v4 = vld [vmem:[#allocation34_spill] sm:$0xff]  ;;  %809 = vmatpush.msrb.mxu2 %v5037_v16  ;;  %v645_v11 = vld [vmem:[#allocation2 + $0x2] sm:$0x1] }
  0xf4   :  { %v431_v27 = vmul.f32 0.0, %v425_v59  ;;  %768 = vmatpush.msrb.mxu0 %v5032_v8  ;;  %v5035_v60 = vld [vmem:[#allocation38_spill] sm:$0xff]  ;;  %v5042_v59 = vld [vmem:[#allocation47_spill] sm:$0xff] }
  0xf5   :  { %v415_v20 = vpop.f32.mrf.mxu3 }
  0xf6   :  { %v416_v21 = vadd.f32 %v415_v20, %v396_v17  ;;  %769 = vmatpush.msrb.mxu0 %v5036_v34  ;;  %v5038_v17 = vld [vmem:[#allocation41_spill] sm:$0xff] }
  0xf7   :  { %v5041_v20 = vld [vmem:[#allocation101_spill] sm:$0xff] }
  0xf8   :  { %v427_v25 = vmul.f32 0.5, %v416_v21  ;;  %770 = vmatpush.msrb.mxu0 %v5040_v55  ;;  %810 = vmatpush.msrb.mxu2 %v5041_v20  ;;  %v5043_v21 = vld [vmem:[#allocation48_spill] sm:$0xff]  ;;  %v649_v34 = vld [vmem:[#allocation2 + $0x22] sm:$0x1] }
  0xf9   :  { %v1975_v24 = vpop.eup %1974  ;;  %v667_v20 = vrot.slane %v649_v34, 4 }
  0xfa   :  { %v432_v58 = vmul.f32 %v1975_v24, %v421_v22  ;;  %1976 = vtanh.f32 %v427_v25  ;;  %v5039_v22 = vld [vmem:[#allocation42_spill] sm:$0xff]  ;;  %v5046_v25 = vld [vmem:[#allocation103_spill] sm:$0xff] }
  0xfb   :  { %v5044_v24 = vld [vmem:[#allocation50_spill] sm:$0xff]  ;;  %771 = vmatpush.msrb.mxu0 %v5046_v25 }
  0xfc   :  { %v3046_v28 = vadd.f32 %v432_v58, %v431_v27  ;;  %v5045_v27 = vld [vmem:[#allocation52_spill] sm:$0xff]  ;;  %v5047_v58 = vld [vmem:[#allocation105_spill] sm:$0xff] }
  0xfd   :  { %811 = vmatpush.msrb.mxu2 %v5047_v58  ;;  %v652_v58 = vld [vmem:[#allocation2 + $0x3a] sm:$0x1] }
  0xfe   :  { %1978 = vtanh.f32 %v3046_v28 }
 0x100   :  { %v1977_v29 = vpop.eup %1976 }
 0x101   :  { %v429_v32 = vadd.f32 1.0, %v1977_v29  ;;  %v5048_v29 = vld [vmem:[#allocation54_spill] sm:$0xff] }
 0x103   :  { %v430_v36 = vmul.f32 0.5, %v429_v32  ;;  %v5049_v32 = vld [vmem:[#allocation55_spill] sm:$0xff] }
 0x104   :  { %v1979_v33 = vpop.eup %1978 }
 0x105   :  { %v435_v37 = vmul.f32 %v1979_v33, %v430_v36  ;;  %v5050_v33 = vld [vmem:[#allocation57_spill] sm:$0xff]  ;;  %v5051_v36 = vld [vmem:[#allocation59_spill] sm:$0xff] }
 0x107   :  { %503 = vmatmul.f32.vlgmr.msra.gmra.mxu1 %v435_v37  ;;  %543 = vmatmul.f32.vlgmr.msra.gmra.mxu3 %v435_v37 }
 0x108   :  { %696 = vmatpush.msra.mxu1 %v3061_v40  ;;  %736 = vmatpush.msra.mxu3 %v3064_v41 }
 0x10a   :  { %697 = vmatpush.msra.mxu1 %v3069_v39  ;;  %737 = vmatpush.msra.mxu3 %v3072_v43 }
 0x10c   :  { %698 = vmatpush.msra.mxu1 %v3077_v38  ;;  %738 = vmatpush.msra.mxu3 %v3080_v3 }
 0x10e   :  { %699 = vmatpush.msra.mxu1 %v3085_v31  ;;  %739 = vmatpush.msra.mxu3 %v3088_v5 }
 0x10f   :  { %583 = vmatmul.f32.vlgmr.msrb.gmra.mxu1 %v435_v37  ;;  %623 = vmatmul.f32.vlgmr.msrb.gmra.mxu3 %v435_v37  ;;  %v5052_v37 = vld [vmem:[#allocation61_spill] sm:$0xff] }
 0x110   :  { %700 = vmatpush.msra.mxu1 %v3091_v42  ;;  %740 = vmatpush.msra.mxu3 %v3094_v61 }
 0x112   :  { %701 = vmatpush.msra.mxu1 %v5005_v7  ;;  %741 = vmatpush.msra.mxu3 %v5006_v10  ;;  %v5054_v7 = vld [vmem:[#allocation64_spill] sm:$0xff]  ;;  %v5055_v10 = vld [vmem:[#allocation66_spill] sm:$0xff] }
 0x114   :  { %702 = vmatpush.msra.mxu1 %v5008_v14  ;;  %742 = vmatpush.msra.mxu3 %v5009_v15  ;;  %v5057_v14 = vld [vmem:[#allocation70_spill] sm:$0xff]  ;;  %v5058_v15 = vld [vmem:[#allocation72_spill] sm:$0xff] }
 0x116   :  { %703 = vmatpush.msra.mxu1 %v5012_v45  ;;  %743 = vmatpush.msra.mxu3 %v5013_v51  ;;  %v5061_v45 = vld [vmem:[#allocation78_spill] sm:$0xff]  ;;  %v5062_v51 = vld [vmem:[#allocation80_spill] sm:$0xff] }
 0x118   :  { %704 = vmatpush.msra.mxu1 %v5016_v63  ;;  %744 = vmatpush.msra.mxu3 %v5017_v62  ;;  %v5065_v63 = vld [vmem:[#allocation86_spill] sm:$0xff]  ;;  %v5066_v62 = vld [vmem:[#allocation88_spill] sm:$0xff] }
 0x11a   :  { %705 = vmatpush.msra.mxu1 %v5020_v52  ;;  %745 = vmatpush.msra.mxu3 %v5021_v49  ;;  %v5069_v52 = vld [vmem:[#allocation94_spill] sm:$0xff]  ;;  %v5070_v49 = vld [vmem:[#allocation96_spill] sm:$0xff] }
 0x11c   :  { %706 = vmatpush.msra.mxu1 %v5024_v30  ;;  %746 = vmatpush.msra.mxu3 %v5025_v23  ;;  %v5073_v30 = vld [vmem:[#allocation102_spill] sm:$0xff]  ;;  %v5074_v23 = vld [vmem:[#allocation104_spill] sm:$0xff] }
 0x11e   :  { %707 = vmatpush.msra.mxu1 %v5027_v54  ;;  %747 = vmatpush.msra.mxu3 %v5028_v0  ;;  %v5076_v54 = vld [vmem:[#allocation107_spill] sm:$0xff]  ;;  %v5077_v0 = vld [vmem:[#allocation108_spill] sm:$0xff] }
 0x120   :  { %708 = vmatpush.msra.mxu1 %v5030_v2  ;;  %748 = vmatpush.msra.mxu3 %v5031_v4  ;;  %v646_v2 = vld [vmem:[#allocation2 + $0xa] sm:$0x1]  ;;  %v647_v4 = vld [vmem:[#allocation2 + $0x12] sm:$0x1] }
 0x121   :  { %v661_v8 = vrot.slane %v646_v2, 7  ;;  %v3219_v2 = vld [vmem:[#allocation5 + $0x148] sm:$0xff] }
 0x122   :  { %709 = vmatpush.msra.mxu1 %v5034_v12  ;;  %749 = vmatpush.msra.mxu3 %v5035_v60  ;;  %v648_v12 = vld [vmem:[#allocation2 + $0x1a] sm:$0x1]  ;;  %v663_v60 = vrot.slane %v647_v4, 6 }
 0x123   :  { %v662_v16 = vsel %vm99_vm0, %v661_v8, %v645_v11  ;;  %v3222_v11 = vld [vmem:[#allocation5 + $0x120] sm:$0xff] }
 0x124   :  { %710 = vmatpush.msra.mxu1 %v5038_v17  ;;  %750 = vmatpush.msra.mxu3 %v5039_v22  ;;  %v665_v17 = vrot.slane %v648_v12, 5  ;;  %v650_v22 = vld [vmem:[#allocation2 + $0x2a] sm:$0x1]  ;;  %v664_v55 = vsel %vm102_vm1, %v663_v60, %v662_v16 }
 0x125   :  { %v3225_v12 = vld [vmem:[#allocation5 + $0x128] sm:$0xff] }
 0x126   :  { %711 = vmatpush.msra.mxu1 %v5042_v59  ;;  %751 = vmatpush.msra.mxu3 %v5043_v21  ;;  %v651_v21 = vld [vmem:[#allocation2 + $0x32] sm:$0x1] }
 0x128   :  { %776 = vmatpush.msrb.mxu1 %v5044_v24  ;;  %816 = vmatpush.msrb.mxu3 %v5045_v27  ;;  %v666_v24 = vsel %vm105_vm2, %v665_v17, %v664_v55  ;;  %v669_v27 = vrot.slane %v650_v22, 3  ;;  %v3228_v17 = vld [vmem:[#allocation5 + $0x100] sm:$0xff]  ;;  %v3231_v22 = vld [vmem:[#allocation5 + $0x108] sm:$0xff] }
 0x12a   :  { %777 = vmatpush.msrb.mxu1 %v5048_v29  ;;  %817 = vmatpush.msrb.mxu3 %v5049_v32  ;;  %v668_v29 = vsel %vm108_vm3, %v667_v20, %v666_v24  ;;  %v671_v32 = vrot.slane %v651_v21, 2  ;;  %v3237_v21 = vld [vmem:[#allocation5 + $0xe8] sm:$0xff] }
 0x12c   :  { %778 = vmatpush.msrb.mxu1 %v5050_v33  ;;  %818 = vmatpush.msrb.mxu3 %v5051_v36  ;;  %v670_v33 = vsel %vm111_vm4, %v669_v27, %v668_v29  ;;  %v673_v36 = vrot.slane %v652_v58, 1  ;;  %v3243_v58 = vld [vmem:[#allocation5 + $0xc8] sm:$0xff] }
 0x12e   :  { %779 = vmatpush.msrb.mxu1 %v5052_v37  ;;  %819 = vmatpush.msrb.mxu3 %v5053_v26  ;;  %v672_v26 = vsel %vm114_vm5, %v671_v32, %v670_v33  ;;  %v3247_v33 = vld [vmem:[#allocation5 + $0xa0] sm:$0xff] }
 0x130   :  { %780 = vmatpush.msrb.mxu1 %v5054_v7  ;;  %820 = vmatpush.msrb.mxu3 %v5055_v10  ;;  %v674_v10 = vsel %vm117_vm6, %v673_v36, %v672_v26  ;;  %v3250_v36 = vld [vmem:[#allocation5 + $0xa8] sm:$0xff] }
 0x131   :  { %692 = vmatmul.f32.vlgmr.msra.gmra.mxu0 %v674_v10  ;;  %732 = vmatmul.f32.vlgmr.msra.gmra.mxu2 %v674_v10 }
 0x132   :  { %781 = vmatpush.msrb.mxu1 %v5056_v13  ;;  %821 = vmatpush.msrb.mxu3 %v5057_v14 }
 0x134   :  { %782 = vmatpush.msrb.mxu1 %v5058_v15  ;;  %822 = vmatpush.msrb.mxu3 %v5059_v18  ;;  %v484_v1 = vpop.f32.mrf.mxu0  ;;  %v3184_v18 = vld [vmem:[#allocation5 + $0x1e0] sm:$0xff] }
 0x135   :  { %v485_v59 = vadd.f32 %v484_v1, %v3008_v48  ;;  %885 = vmatpush.msra.mxu0 %v3184_v18  ;;  %v3216_v1 = vld [vmem:[#allocation5 + $0x140] sm:$0xff] }
 0x136   :  { %783 = vmatpush.msrb.mxu1 %v5060_v19  ;;  %823 = vmatpush.msrb.mxu3 %v5061_v45  ;;  %v3187_v19 = vld [vmem:[#allocation5 + $0x1e8] sm:$0xff] }
 0x137   :  { %925 = vmatpush.msra.mxu2 %v3187_v19 }
 0x138   :  { %784 = vmatpush.msrb.mxu1 %v5062_v51  ;;  %824 = vmatpush.msrb.mxu3 %v5063_v9  ;;  %v3191_v51 = vld [vmem:[#allocation5 + $0x1c0] sm:$0xff]  ;;  %v3194_v9 = vld [vmem:[#allocation5 + $0x1c8] sm:$0xff] }
 0x139   :  { %886 = vmatpush.msra.mxu0 %v3191_v51  ;;  %926 = vmatpush.msra.mxu2 %v3194_v9 }
 0x13a   :  { %785 = vmatpush.msrb.mxu1 %v5064_v57  ;;  %825 = vmatpush.msrb.mxu3 %v5065_v63  ;;  %v524_v25 = vpop.f32.mrf.mxu2 }
 0x13b   :  { %v525_v15 = vadd.f32 %v524_v25, %v3011_v47  ;;  %772 = vmatmul.f32.vlgmr.msrb.gmra.mxu0 %v674_v10  ;;  %812 = vmatmul.f32.vlgmr.msrb.gmra.mxu2 %v674_v10  ;;  %v3240_v25 = vld [vmem:[#allocation5 + $0xc0] sm:$0xff]  ;;  %v3258_v10 = vld [vmem:[#allocation5 + $0x88] sm:$0xff] }
 0x13c   :  { %786 = vmatpush.msrb.mxu1 %v5066_v62  ;;  %826 = vmatpush.msrb.mxu3 %v5067_v35  ;;  %v564_v13 = vpop.f32.mrf.mxu0  ;;  %v3197_v62 = vld [vmem:[#allocation5 + $0x1a0] sm:$0xff]  ;;  %v3200_v35 = vld [vmem:[#allocation5 + $0x1a8] sm:$0xff] }
 0x13d   :  { %v565_v45 = vadd.f32 %v564_v13, %v3022_v56  ;;  %887 = vmatpush.msra.mxu0 %v3197_v62  ;;  %927 = vmatpush.msra.mxu2 %v3200_v35  ;;  %v3262_v13 = vld [vmem:[#allocation5 + $0x60] sm:$0xff] }
 0x13e   :  { %787 = vmatpush.msrb.mxu1 %v5068_v50  ;;  %827 = vmatpush.msrb.mxu3 %v5069_v52 }
 0x140   :  { %788 = vmatpush.msrb.mxu1 %v5070_v49  ;;  %828 = vmatpush.msrb.mxu3 %v5071_v46 }
 0x142   :  { %789 = vmatpush.msrb.mxu1 %v5072_v53  ;;  %829 = vmatpush.msrb.mxu3 %v5073_v30  ;;  %v604_v52 = vpop.f32.mrf.mxu2  ;;  %v3203_v53 = vld [vmem:[#allocation5 + $0x180] sm:$0xff]  ;;  %v3206_v30 = vld [vmem:[#allocation5 + $0x188] sm:$0xff] }
 0x143   :  { %888 = vmatpush.msra.mxu0 %v3203_v53  ;;  %928 = vmatpush.msra.mxu2 %v3206_v30 }
 0x144   :  { %790 = vmatpush.msrb.mxu1 %v5074_v23  ;;  %830 = vmatpush.msrb.mxu3 %v5075_v44  ;;  %v605_v23 = vadd.f32 %v604_v52, %v3031_v6  ;;  %v3210_v44 = vld [vmem:[#allocation5 + $0x160] sm:$0xff] }
 0x145   :  { %889 = vmatpush.msra.mxu0 %v3210_v44 }
 0x146   :  { %791 = vmatpush.msrb.mxu1 %v5076_v54  ;;  %831 = vmatpush.msrb.mxu3 %v5077_v0  ;;  %v3213_v54 = vld [vmem:[#allocation5 + $0x168] sm:$0xff] }
 0x147   :  { %929 = vmatpush.msra.mxu2 %v3213_v54  ;;  %890 = vmatpush.msra.mxu0 %v3216_v1 }
 0x149   :  { %930 = vmatpush.msra.mxu2 %v3219_v2  ;;  %891 = vmatpush.msra.mxu0 %v3222_v11 }
 0x14b   :  { %931 = vmatpush.msra.mxu2 %v3225_v12  ;;  %892 = vmatpush.msra.mxu0 %v3228_v17 }
 0x14d   :  { %932 = vmatpush.msra.mxu2 %v3231_v22 }
 0x14f   :  { %933 = vmatpush.msra.mxu2 %v3237_v21 }
 0x151   :  { %934 = vmatpush.msra.mxu2 %v3243_v58 }
 0x153   :  { %935 = vmatpush.msra.mxu2 %v3250_v36 }
 0x155   :  { %936 = vmatpush.msra.mxu2 %v3258_v10 }
 0x184   :  { %v504_v37 = vpop.f32.mrf.mxu1 }
 0x185   :  { %v505_v7 = vadd.f32 %v504_v37, %v485_v59  ;;  %v3234_v59 = vld [vmem:[#allocation5 + $0xe0] sm:$0xff] }
 0x186   :  { %893 = vmatpush.msra.mxu0 %v3234_v59 }
 0x187   :  { %v627_v14 = vmul.f32 0.5, %v505_v7  ;;  %v3255_v7 = vld [vmem:[#allocation5 + $0x80] sm:$0xff] }
 0x188   :  { %894 = vmatpush.msra.mxu0 %v3240_v25 }
 0x189   :  { %1980 = vtanh.f32 %v627_v14  ;;  %v3265_v14 = vld [vmem:[#allocation5 + $0x68] sm:$0xff] }
 0x18a   :  { %v544_v57 = vpop.f32.mrf.mxu3  ;;  %895 = vmatpush.msra.mxu0 %v3247_v33  ;;  %937 = vmatpush.msra.mxu2 %v3265_v14 }
 0x18b   :  { %v545_v63 = vadd.f32 %v544_v57, %v525_v15  ;;  %v3268_v15 = vld [vmem:[#allocation5 + $0x40] sm:$0xff] }
 0x18c   :  { %v584_v50 = vpop.f32.mrf.mxu1  ;;  %896 = vmatpush.msra.mxu0 %v3255_v7 }
 0x18d   :  { %v631_v49 = vmul.f32 0.5, %v545_v63  ;;  %v585_v46 = vadd.f32 %v584_v50, %v565_v45  ;;  %v3271_v45 = vld [vmem:[#allocation5 + $0x48] sm:$0xff]  ;;  %v3274_v63 = vld [vmem:[#allocation5 + $0x20] sm:$0xff] }
 0x18e   :  { %897 = vmatpush.msra.mxu0 %v3262_v13  ;;  %938 = vmatpush.msra.mxu2 %v3271_v45  ;;  %v3277_v50 = vld [vmem:[#allocation5 + $0x28] sm:$0xff] }
 0x18f   :  { %1982 = vtanh.f32 %v631_v49  ;;  %v1981_v0 = vpop.eup %1980 }
 0x190   :  { %1984 = vtanh.f32 %v585_v46  ;;  %v629_v60 = vadd.f32 1.0, %v1981_v0  ;;  %898 = vmatpush.msra.mxu0 %v3268_v15  ;;  %939 = vmatpush.msra.mxu2 %v3277_v50  ;;  %v3280_v46 = vld [vmem:[#allocation5] sm:$0xff]  ;;  %v3286_v0 = vld [vmem:[#allocation5 + $0x1f0] sm:$0xff] }
 0x192   :  { %v624_v4 = vpop.f32.mrf.mxu3  ;;  %v630_v24 = vmul.f32 0.5, %v629_v60  ;;  %899 = vmatpush.msra.mxu0 %v3274_v63  ;;  %v3297_v60 = vld [vmem:[#allocation5 + $0x1d8] sm:$0xff] }
 0x193   :  { %v625_v8 = vadd.f32 %v624_v4, %v605_v23  ;;  %v3283_v23 = vld [vmem:[#allocation5 + $0x8] sm:$0xff]  ;;  %v3289_v4 = vld [vmem:[#allocation5 + $0x1f8] sm:$0xff] }
 0x194   :  { %900 = vmatpush.msra.mxu0 %v3280_v46  ;;  %940 = vmatpush.msra.mxu2 %v3283_v23 }
 0x195   :  { %v1983_v34 = vpop.eup %1982  ;;  %v636_v16 = vmul.f32 0.5, %v625_v8  ;;  %v3294_v8 = vld [vmem:[#allocation5 + $0x1d0] sm:$0xff] }
 0x196   :  { %v633_v55 = vadd.f32 1.0, %v1983_v34  ;;  %v1985_v20 = vpop.eup %1984  ;;  %965 = vmatpush.msrb.mxu0 %v3286_v0  ;;  %1005 = vmatpush.msrb.mxu2 %v3289_v4  ;;  %v3302_v34 = vld [vmem:[#allocation5 + $0x1b0] sm:$0xff] }
 0x197   :  { %1986 = vtanh.f32 %v636_v16  ;;  %v641_v32 = vmul.f32 %v1985_v20, %v630_v24  ;;  %5078 = vst [vmem:[#allocation43_spill] sm:$0xff] %v3302_v34  ;;  %v3305_v16 = vld [vmem:[#allocation5 + $0x1b8] sm:$0xff]  ;;  %v3320_v24 = vld [vmem:[#allocation5 + $0x170] sm:$0xff] }
 0x198   :  { %v634_v27 = vmul.f32 0.5, %v633_v55  ;;  %966 = vmatpush.msrb.mxu0 %v3294_v8  ;;  %1006 = vmatpush.msrb.mxu2 %v3297_v60  ;;  %5079 = vst [vmem:[#allocation44_spill] sm:$0xff] %v3305_v16  ;;  %v3310_v55 = vld [vmem:[#allocation5 + $0x190] sm:$0xff]  ;;  %v3313_v20 = vld [vmem:[#allocation5 + $0x198] sm:$0xff] }
 0x199   :  { %5080 = vst [vmem:[#allocation45_spill] sm:$0xff] %v3310_v55 }
 0x19a   :  { %v640_v29 = vmul.f32 %v634_v27, %v3046_v28  ;;  %967 = vmatpush.msrb.mxu0 %v3302_v34  ;;  %1007 = vmatpush.msrb.mxu2 %v3305_v16  ;;  %5081 = vst [vmem:[#allocation46_spill] sm:$0xff] %v3313_v20  ;;  %v3323_v27 = vld [vmem:[#allocation5 + $0x178] sm:$0xff] }
 0x19b   :  { %5082 = vst [vmem:[#allocation49_spill] sm:$0xff] %v3320_v24  ;;  %v861_v34 = vld [vmem:[#allocation2 + $0x3b] sm:$0x1] }
 0x19c   :  { %v3253_v37 = vadd.f32 %v641_v32, %v640_v29  ;;  %968 = vmatpush.msrb.mxu0 %v3310_v55  ;;  %1008 = vmatpush.msrb.mxu2 %v3313_v20  ;;  %5083 = vst [vmem:[#allocation51_spill] sm:$0xff] %v3323_v27  ;;  %v3326_v29 = vld [vmem:[#allocation5 + $0x340] sm:$0xff]  ;;  %v3329_v32 = vld [vmem:[#allocation5 + $0x348] sm:$0xff] }
 0x19d   :  { %v1987_v26 = vpop.eup %1986  ;;  %5084 = vst [vmem:[#allocation53_spill] sm:$0xff] %v3326_v29 }
 0x19e   :  { %1988 = vtanh.f32 %v3253_v37  ;;  %v638_v28 = vadd.f32 1.0, %v1987_v26  ;;  %969 = vmatpush.msrb.mxu0 %v3320_v24  ;;  %1009 = vmatpush.msrb.mxu2 %v3323_v27  ;;  %5085 = vst [vmem:[#allocation56_spill] sm:$0xff] %v3329_v32  ;;  %v3332_v26 = vld [vmem:[#allocation5 + $0x150] sm:$0xff]  ;;  %v854_v24 = vld [vmem:[#allocation2 + $0x3] sm:$0x1] }
 0x19f   :  { %5086 = vst [vmem:[#allocation58_spill] sm:$0xff] %v3332_v26  ;;  %v856_v27 = vld [vmem:[#allocation2 + $0x13] sm:$0x1] }
 0x1a0   :  { %v639_v57 = vmul.f32 0.5, %v638_v28  ;;  %970 = vmatpush.msrb.mxu0 %v3332_v26  ;;  %v3335_v28 = vld [vmem:[#allocation5 + $0x158] sm:$0xff]  ;;  %v3350_v26 = vld [vmem:[#allocation5 + $0x300] sm:$0xff] }
 0x1a1   :  { %5087 = vst [vmem:[#allocation62_spill] sm:$0xff] %v3335_v28  ;;  %1010 = vmatpush.msrb.mxu2 %v3335_v28  ;;  %v3353_v28 = vld [vmem:[#allocation5 + $0x308] sm:$0xff] }
 0x1a2   :  { %5092 = vst [vmem:[#allocation16_spill] sm:$0xff] %v3350_v26 }
 0x1a3   :  { %5093 = vst [vmem:[#allocation65_spill] sm:$0xff] %v3353_v28 }
 0x1a4   :  { %v1989_v52 = vpop.eup %1988 }
 0x1a5   :  { %v644_v49 = vmul.f32 %v1989_v52, %v639_v57  ;;  %v3338_v57 = vld [vmem:[#allocation5 + $0x320] sm:$0xff]  ;;  %v3341_v52 = vld [vmem:[#allocation5 + $0x328] sm:$0xff] }
 0x1a6   :  { %5088 = vst [vmem:[#allocation85_spill] sm:$0xff] %v3338_v57 }
 0x1a7   :  { %712 = vmatmul.f32.vlgmr.msra.gmra.mxu1 %v644_v49  ;;  %752 = vmatmul.f32.vlgmr.msra.gmra.mxu3 %v644_v49  ;;  %5089 = vst [vmem:[#allocation89_spill] sm:$0xff] %v3341_v52 }
 0x1a8   :  { %905 = vmatpush.msra.mxu1 %v3061_v40  ;;  %945 = vmatpush.msra.mxu3 %v3064_v41 }
 0x1aa   :  { %906 = vmatpush.msra.mxu1 %v3069_v39  ;;  %946 = vmatpush.msra.mxu3 %v3072_v43  ;;  %v882_v39 = vrot.slane %v861_v34, 1 }
 0x1ac   :  { %907 = vmatpush.msra.mxu1 %v3077_v38  ;;  %947 = vmatpush.msra.mxu3 %v3080_v3  ;;  %v860_v3 = vld [vmem:[#allocation2 + $0x33] sm:$0x1] }
 0x1ad   :  { %v880_v43 = vrot.slane %v860_v3, 2 }
 0x1ae   :  { %908 = vmatpush.msra.mxu1 %v3085_v31  ;;  %948 = vmatpush.msra.mxu3 %v3088_v5 }
 0x1af   :  { %792 = vmatmul.f32.vlgmr.msrb.gmra.mxu1 %v644_v49  ;;  %832 = vmatmul.f32.vlgmr.msrb.gmra.mxu3 %v644_v49  ;;  %v3344_v49 = vld [vmem:[#allocation5 + $0x130] sm:$0xff] }
 0x1b0   :  { %909 = vmatpush.msra.mxu1 %v3091_v42  ;;  %949 = vmatpush.msra.mxu3 %v3094_v61  ;;  %5090 = vst [vmem:[#allocation60_spill] sm:$0xff] %v3344_v49  ;;  %v857_v61 = vld [vmem:[#allocation2 + $0x1b] sm:$0x1]  ;;  %v872_v42 = vrot.slane %v856_v27, 6 }
 0x1b1   :  { %971 = vmatpush.msrb.mxu0 %v3344_v49  ;;  %v3362_v49 = vld [vmem:[#allocation5 + $0x2e0] sm:$0xff]  ;;  %v874_v31 = vrot.slane %v857_v61, 5 }
 0x1b2   :  { %910 = vmatpush.msra.mxu1 %v3326_v29  ;;  %950 = vmatpush.msra.mxu3 %v3329_v32  ;;  %v3347_v32 = vld [vmem:[#allocation5 + $0x138] sm:$0xff]  ;;  %5096 = vst [vmem:[#allocation67_spill] sm:$0xff] %v3362_v49  ;;  %v855_v29 = vld [vmem:[#allocation2 + $0xb] sm:$0x1] }
 0x1b3   :  { %5091 = vst [vmem:[#allocation15_spill] sm:$0xff] %v3347_v32  ;;  %1011 = vmatpush.msrb.mxu2 %v3347_v32  ;;  %v3365_v32 = vld [vmem:[#allocation5 + $0x2e8] sm:$0xff] }
 0x1b4   :  { %911 = vmatpush.msra.mxu1 %v3338_v57  ;;  %951 = vmatpush.msra.mxu3 %v3341_v52  ;;  %v3356_v57 = vld [vmem:[#allocation5 + $0x110] sm:$0xff]  ;;  %v3359_v52 = vld [vmem:[#allocation5 + $0x118] sm:$0xff]  ;;  %5097 = vst [vmem:[#allocation69_spill] sm:$0xff] %v3365_v32  ;;  %v733_v16 = vpop.f32.mrf.mxu2 }
 0x1b5   :  { %5094 = vst [vmem:[#allocation17_spill] sm:$0xff] %v3356_v57  ;;  %972 = vmatpush.msrb.mxu0 %v3356_v57  ;;  %1012 = vmatpush.msrb.mxu2 %v3359_v52  ;;  %v3374_v57 = vld [vmem:[#allocation5 + $0x2c0] sm:$0xff] }
 0x1b6   :  { %912 = vmatpush.msra.mxu1 %v3350_v26  ;;  %952 = vmatpush.msra.mxu3 %v3353_v28  ;;  %5095 = vst [vmem:[#allocation18_spill] sm:$0xff] %v3359_v52  ;;  %v3368_v26 = vld [vmem:[#allocation5 + $0xf0] sm:$0xff]  ;;  %v3371_v28 = vld [vmem:[#allocation5 + $0xf8] sm:$0xff]  ;;  %v3377_v52 = vld [vmem:[#allocation5 + $0x2c8] sm:$0xff] }
 0x1b7   :  { %5098 = vst [vmem:[#allocation19_spill] sm:$0xff] %v3368_v26  ;;  %973 = vmatpush.msrb.mxu0 %v3368_v26  ;;  %1013 = vmatpush.msrb.mxu2 %v3371_v28  ;;  %v3386_v26 = vld [vmem:[#allocation5 + $0x2a0] sm:$0xff] }
 0x1b8   :  { %913 = vmatpush.msra.mxu1 %v3362_v49  ;;  %953 = vmatpush.msra.mxu3 %v3365_v32  ;;  %5099 = vst [vmem:[#allocation20_spill] sm:$0xff] %v3371_v28  ;;  %v3380_v49 = vld [vmem:[#allocation5 + $0xd0] sm:$0xff]  ;;  %v3383_v32 = vld [vmem:[#allocation5 + $0xd8] sm:$0xff]  ;;  %v3389_v28 = vld [vmem:[#allocation5 + $0x2a8] sm:$0xff] }
 0x1b9   :  { %5100 = vst [vmem:[#allocation71_spill] sm:$0xff] %v3374_v57  ;;  %974 = vmatpush.msrb.mxu0 %v3380_v49  ;;  %1014 = vmatpush.msrb.mxu2 %v3383_v32 }
 0x1ba   :  { %914 = vmatpush.msra.mxu1 %v3374_v57  ;;  %5101 = vst [vmem:[#allocation73_spill] sm:$0xff] %v3377_v52  ;;  %954 = vmatpush.msra.mxu3 %v3377_v52  ;;  %v3392_v57 = vld [vmem:[#allocation5 + $0xb0] sm:$0xff]  ;;  %v3395_v52 = vld [vmem:[#allocation5 + $0xb8] sm:$0xff] }
 0x1bb   :  { %5102 = vst [vmem:[#allocation21_spill] sm:$0xff] %v3380_v49  ;;  %975 = vmatpush.msrb.mxu0 %v3392_v57  ;;  %1015 = vmatpush.msrb.mxu2 %v3395_v52  ;;  %v3398_v49 = vld [vmem:[#allocation5 + $0x280] sm:$0xff] }
 0x1bc   :  { %5103 = vst [vmem:[#allocation22_spill] sm:$0xff] %v3383_v32  ;;  %915 = vmatpush.msra.mxu1 %v3386_v26  ;;  %955 = vmatpush.msra.mxu3 %v3389_v28  ;;  %v3401_v32 = vld [vmem:[#allocation5 + $0x288] sm:$0xff] }
 0x1bd   :  { %5104 = vst [vmem:[#allocation75_spill] sm:$0xff] %v3386_v26  ;;  %v3404_v26 = vld [vmem:[#allocation5 + $0x90] sm:$0xff] }
 0x1be   :  { %5105 = vst [vmem:[#allocation77_spill] sm:$0xff] %v3389_v28  ;;  %916 = vmatpush.msra.mxu1 %v3398_v49  ;;  %956 = vmatpush.msra.mxu3 %v3401_v32  ;;  %v3407_v28 = vld [vmem:[#allocation5 + $0x98] sm:$0xff]  ;;  %v813_v34 = vpop.f32.mrf.mxu2 }
 0x1bf   :  { %5106 = vst [vmem:[#allocation23_spill] sm:$0xff] %v3392_v57  ;;  %976 = vmatpush.msrb.mxu0 %v3404_v26  ;;  %1016 = vmatpush.msrb.mxu2 %v3407_v28  ;;  %v3410_v57 = vld [vmem:[#allocation5 + $0x260] sm:$0xff] }
 0x1c0   :  { %5107 = vst [vmem:[#allocation24_spill] sm:$0xff] %v3395_v52  ;;  %917 = vmatpush.msra.mxu1 %v3410_v57  ;;  %v3413_v52 = vld [vmem:[#allocation5 + $0x268] sm:$0xff] }
 0x1c1   :  { %5108 = vst [vmem:[#allocation79_spill] sm:$0xff] %v3398_v49  ;;  %957 = vmatpush.msra.mxu3 %v3413_v52  ;;  %v3416_v49 = vld [vmem:[#allocation5 + $0x70] sm:$0xff] }
 0x1c2   :  { %5109 = vst [vmem:[#allocation81_spill] sm:$0xff] %v3401_v32  ;;  %977 = vmatpush.msrb.mxu0 %v3416_v49  ;;  %v3419_v32 = vld [vmem:[#allocation5 + $0x78] sm:$0xff] }
 0x1c3   :  { %5110 = vst [vmem:[#allocation25_spill] sm:$0xff] %v3404_v26  ;;  %1017 = vmatpush.msrb.mxu2 %v3419_v32  ;;  %v3422_v26 = vld [vmem:[#allocation5 + $0x240] sm:$0xff] }
 0x1c4   :  { %5111 = vst [vmem:[#allocation26_spill] sm:$0xff] %v3407_v28  ;;  %918 = vmatpush.msra.mxu1 %v3422_v26  ;;  %v3425_v28 = vld [vmem:[#allocation5 + $0x248] sm:$0xff] }
 0x1c5   :  { %5112 = vst [vmem:[#allocation83_spill] sm:$0xff] %v3410_v57  ;;  %958 = vmatpush.msra.mxu3 %v3425_v28  ;;  %v3428_v57 = vld [vmem:[#allocation5 + $0x50] sm:$0xff] }
 0x1c6   :  { %5113 = vst [vmem:[#allocation29_spill] sm:$0xff] %v3413_v52  ;;  %978 = vmatpush.msrb.mxu0 %v3428_v57  ;;  %v3431_v52 = vld [vmem:[#allocation5 + $0x58] sm:$0xff] }
 0x1c7   :  { %5114 = vst [vmem:[#allocation30_spill] sm:$0xff] %v3416_v49  ;;  %1018 = vmatpush.msrb.mxu2 %v3431_v52  ;;  %v3434_v49 = vld [vmem:[#allocation5 + $0x220] sm:$0xff] }
 0x1c8   :  { %5115 = vst [vmem:[#allocation87_spill] sm:$0xff] %v3419_v32  ;;  %919 = vmatpush.msra.mxu1 %v3434_v49  ;;  %v3437_v32 = vld [vmem:[#allocation5 + $0x228] sm:$0xff] }
 0x1c9   :  { %5116 = vst [vmem:[#allocation33_spill] sm:$0xff] %v3422_v26  ;;  %959 = vmatpush.msra.mxu3 %v3437_v32  ;;  %v3440_v26 = vld [vmem:[#allocation5 + $0x30] sm:$0xff] }
 0x1ca   :  { %5117 = vst [vmem:[#allocation34_spill] sm:$0xff] %v3425_v28  ;;  %979 = vmatpush.msrb.mxu0 %v3440_v26  ;;  %v3443_v28 = vld [vmem:[#allocation5 + $0x38] sm:$0xff] }
 0x1cb   :  { %5118 = vst [vmem:[#allocation92_spill] sm:$0xff] %v3428_v57  ;;  %1019 = vmatpush.msrb.mxu2 %v3443_v28  ;;  %v3446_v57 = vld [vmem:[#allocation5 + $0x200] sm:$0xff] }
 0x1cc   :  { %5119 = vst [vmem:[#allocation93_spill] sm:$0xff] %v3431_v52  ;;  %920 = vmatpush.msra.mxu1 %v3446_v57  ;;  %v3449_v52 = vld [vmem:[#allocation5 + $0x208] sm:$0xff] }
 0x1cd   :  { %5120 = vst [vmem:[#allocation37_spill] sm:$0xff] %v3434_v49  ;;  %960 = vmatpush.msra.mxu3 %v3449_v52  ;;  %v3452_v49 = vld [vmem:[#allocation5 + $0x3f0] sm:$0xff] }
 0x1ce   :  { %5121 = vst [vmem:[#allocation38_spill] sm:$0xff] %v3437_v32  ;;  %985 = vmatpush.msrb.mxu1 %v3452_v49  ;;  %v3455_v32 = vld [vmem:[#allocation5 + $0x3f8] sm:$0xff] }
 0x1cf   :  { %5122 = vst [vmem:[#allocation95_spill] sm:$0xff] %v3440_v26  ;;  %1025 = vmatpush.msrb.mxu3 %v3455_v32  ;;  %v3458_v26 = vld [vmem:[#allocation5 + $0x10] sm:$0xff] }
 0x1d0   :  { %5123 = vst [vmem:[#allocation97_spill] sm:$0xff] %v3443_v28  ;;  %980 = vmatpush.msrb.mxu0 %v3458_v26  ;;  %v3461_v28 = vld [vmem:[#allocation5 + $0x18] sm:$0xff] }
 0x1d1   :  { %5124 = vst [vmem:[#allocation41_spill] sm:$0xff] %v3446_v57  ;;  %1020 = vmatpush.msrb.mxu2 %v3461_v28  ;;  %v3464_v57 = vld [vmem:[#allocation5 + $0x3d0] sm:$0xff] }
 0x1d2   :  { %5125 = vst [vmem:[#allocation42_spill] sm:$0xff] %v3449_v52  ;;  %986 = vmatpush.msrb.mxu1 %v3464_v57  ;;  %v3467_v52 = vld [vmem:[#allocation5 + $0x3d8] sm:$0xff] }
 0x1d3   :  { %5126 = vst [vmem:[#allocation99_spill] sm:$0xff] %v3452_v49  ;;  %1026 = vmatpush.msrb.mxu3 %v3467_v52  ;;  %v3470_v49 = vld [vmem:[#allocation5 + $0x3b0] sm:$0xff] }
 0x1d4   :  { %5127 = vst [vmem:[#allocation101_spill] sm:$0xff] %v3455_v32  ;;  %987 = vmatpush.msrb.mxu1 %v3470_v49  ;;  %v3473_v32 = vld [vmem:[#allocation5 + $0x3b8] sm:$0xff] }
 0x1d5   :  { %5128 = vst [vmem:[#allocation47_spill] sm:$0xff] %v3458_v26  ;;  %1027 = vmatpush.msrb.mxu3 %v3473_v32  ;;  %v3476_v26 = vld [vmem:[#allocation5 + $0x390] sm:$0xff] }
 0x1d6   :  { %5129 = vst [vmem:[#allocation48_spill] sm:$0xff] %v3461_v28  ;;  %988 = vmatpush.msrb.mxu1 %v3476_v26  ;;  %v3479_v28 = vld [vmem:[#allocation5 + $0x398] sm:$0xff] }
 0x1d7   :  { %5130 = vst [vmem:[#allocation50_spill] sm:$0xff] %v3464_v57  ;;  %1028 = vmatpush.msrb.mxu3 %v3479_v28  ;;  %v3482_v57 = vld [vmem:[#allocation5 + $0x370] sm:$0xff] }
 0x1d8   :  { %5131 = vst [vmem:[#allocation52_spill] sm:$0xff] %v3467_v52  ;;  %989 = vmatpush.msrb.mxu1 %v3482_v57  ;;  %v3485_v52 = vld [vmem:[#allocation5 + $0x378] sm:$0xff] }
 0x1d9   :  { %5132 = vst [vmem:[#allocation103_spill] sm:$0xff] %v3470_v49  ;;  %1029 = vmatpush.msrb.mxu3 %v3485_v52  ;;  %v3488_v49 = vld [vmem:[#allocation5 + $0x350] sm:$0xff] }
 0x1da   :  { %5133 = vst [vmem:[#allocation105_spill] sm:$0xff] %v3473_v32  ;;  %990 = vmatpush.msrb.mxu1 %v3488_v49  ;;  %v3491_v32 = vld [vmem:[#allocation5 + $0x358] sm:$0xff] }
 0x1db   :  { %5134 = vst [vmem:[#allocation54_spill] sm:$0xff] %v3476_v26  ;;  %1030 = vmatpush.msrb.mxu3 %v3491_v32  ;;  %v3494_v26 = vld [vmem:[#allocation5 + $0x330] sm:$0xff] }
 0x1dc   :  { %5135 = vst [vmem:[#allocation55_spill] sm:$0xff] %v3479_v28  ;;  %991 = vmatpush.msrb.mxu1 %v3494_v26  ;;  %v3497_v28 = vld [vmem:[#allocation5 + $0x338] sm:$0xff] }
 0x1dd   :  { %5136 = vst [vmem:[#allocation57_spill] sm:$0xff] %v3482_v57  ;;  %1031 = vmatpush.msrb.mxu3 %v3497_v28  ;;  %v3500_v57 = vld [vmem:[#allocation5 + $0x310] sm:$0xff] }
 0x1de   :  { %5137 = vst [vmem:[#allocation59_spill] sm:$0xff] %v3485_v52  ;;  %992 = vmatpush.msrb.mxu1 %v3500_v57  ;;  %v3503_v52 = vld [vmem:[#allocation5 + $0x318] sm:$0xff] }
 0x1df   :  { %5138 = vst [vmem:[#allocation61_spill] sm:$0xff] %v3488_v49  ;;  %1032 = vmatpush.msrb.mxu3 %v3503_v52  ;;  %v3506_v49 = vld [vmem:[#allocation5 + $0x2f0] sm:$0xff] }
 0x1e0   :  { %5139 = vst [vmem:[#allocation63_spill] sm:$0xff] %v3491_v32  ;;  %993 = vmatpush.msrb.mxu1 %v3506_v49  ;;  %v3509_v32 = vld [vmem:[#allocation5 + $0x2f8] sm:$0xff] }
 0x1e1   :  { %5140 = vst [vmem:[#allocation64_spill] sm:$0xff] %v3494_v26  ;;  %1033 = vmatpush.msrb.mxu3 %v3509_v32  ;;  %v3512_v26 = vld [vmem:[#allocation5 + $0x2d0] sm:$0xff] }
 0x1e2   :  { %5141 = vst [vmem:[#allocation66_spill] sm:$0xff] %v3497_v28  ;;  %994 = vmatpush.msrb.mxu1 %v3512_v26  ;;  %v3515_v28 = vld [vmem:[#allocation5 + $0x2d8] sm:$0xff] }
 0x1e3   :  { %5142 = vst [vmem:[#allocation68_spill] sm:$0xff] %v3500_v57  ;;  %1034 = vmatpush.msrb.mxu3 %v3515_v28  ;;  %v3518_v57 = vld [vmem:[#allocation5 + $0x2b0] sm:$0xff] }
 0x1e4   :  { %5143 = vst [vmem:[#allocation70_spill] sm:$0xff] %v3503_v52  ;;  %995 = vmatpush.msrb.mxu1 %v3518_v57  ;;  %v3521_v52 = vld [vmem:[#allocation5 + $0x2b8] sm:$0xff] }
 0x1e5   :  { %5144 = vst [vmem:[#allocation72_spill] sm:$0xff] %v3506_v49  ;;  %1035 = vmatpush.msrb.mxu3 %v3521_v52  ;;  %v3524_v49 = vld [vmem:[#allocation5 + $0x290] sm:$0xff] }
 0x1e6   :  { %5145 = vst [vmem:[#allocation74_spill] sm:$0xff] %v3509_v32  ;;  %996 = vmatpush.msrb.mxu1 %v3524_v49  ;;  %v3527_v32 = vld [vmem:[#allocation5 + $0x298] sm:$0xff] }
 0x1e7   :  { %5146 = vst [vmem:[#allocation76_spill] sm:$0xff] %v3512_v26  ;;  %1036 = vmatpush.msrb.mxu3 %v3527_v32  ;;  %v3530_v26 = vld [vmem:[#allocation5 + $0x270] sm:$0xff] }
 0x1e8   :  { %5147 = vst [vmem:[#allocation78_spill] sm:$0xff] %v3515_v28  ;;  %997 = vmatpush.msrb.mxu1 %v3530_v26  ;;  %v3533_v28 = vld [vmem:[#allocation5 + $0x278] sm:$0xff] }
 0x1e9   :  { %5148 = vst [vmem:[#allocation80_spill] sm:$0xff] %v3518_v57  ;;  %1037 = vmatpush.msrb.mxu3 %v3533_v28  ;;  %v3536_v57 = vld [vmem:[#allocation5 + $0x250] sm:$0xff] }
 0x1ea   :  { %5149 = vst [vmem:[#allocation82_spill] sm:$0xff] %v3521_v52  ;;  %998 = vmatpush.msrb.mxu1 %v3536_v57  ;;  %v3539_v52 = vld [vmem:[#allocation5 + $0x258] sm:$0xff] }
 0x1eb   :  { %5150 = vst [vmem:[#allocation84_spill] sm:$0xff] %v3524_v49  ;;  %1038 = vmatpush.msrb.mxu3 %v3539_v52  ;;  %v3542_v49 = vld [vmem:[#allocation5 + $0x230] sm:$0xff] }
 0x1ec   :  { %5151 = vst [vmem:[#allocation86_spill] sm:$0xff] %v3527_v32  ;;  %999 = vmatpush.msrb.mxu1 %v3542_v49  ;;  %v3545_v32 = vld [vmem:[#allocation5 + $0x238] sm:$0xff] }
 0x1ed   :  { %5152 = vst [vmem:[#allocation88_spill] sm:$0xff] %v3530_v26  ;;  %1039 = vmatpush.msrb.mxu3 %v3545_v32  ;;  %v3548_v26 = vld [vmem:[#allocation5 + $0x210] sm:$0xff] }
 0x1ee   :  { %5153 = vst [vmem:[#allocation90_spill] sm:$0xff] %v3533_v28  ;;  %1000 = vmatpush.msrb.mxu1 %v3548_v26  ;;  %v3551_v28 = vld [vmem:[#allocation5 + $0x218] sm:$0xff] }
 0x1ef   :  { %5154 = vst [vmem:[#allocation91_spill] sm:$0xff] %v3536_v57  ;;  %1040 = vmatpush.msrb.mxu3 %v3551_v28  ;;  %v693_v57 = vpop.f32.mrf.mxu0 }
 0x1f0   :  { %5155 = vst [vmem:[#allocation94_spill] sm:$0xff] %v3539_v52  ;;  %v870_v52 = vrot.slane %v855_v29, 7 }
 0x1f1   :  { %5156 = vst [vmem:[#allocation96_spill] sm:$0xff] %v3542_v49  ;;  %v858_v49 = vld [vmem:[#allocation2 + $0x23] sm:$0x1] }
 0x1f2   :  { %5157 = vst [vmem:[#allocation98_spill] sm:$0xff] %v3545_v32  ;;  %v871_v5 = vsel %vm99_vm0, %v870_v52, %v854_v24  ;;  %v859_v32 = vld [vmem:[#allocation2 + $0x2b] sm:$0x1]  ;;  %v876_v55 = vrot.slane %v858_v49, 4 }
 0x1f3   :  { %5158 = vst [vmem:[#allocation100_spill] sm:$0xff] %v3548_v26  ;;  %v873_v20 = vsel %vm102_vm1, %v872_v42, %v871_v5  ;;  %v694_v26 = vadd.f32 %v693_v57, %v3008_v48  ;;  %v878_v38 = vrot.slane %v859_v32, 3 }
 0x1f4   :  { %5159 = vst [vmem:[#allocation102_spill] sm:$0xff] %v3551_v28  ;;  %v875_v28 = vsel %vm105_vm2, %v874_v31, %v873_v20  ;;  %v734_v31 = vadd.f32 %v733_v16, %v3011_v47  ;;  %v814_v20 = vadd.f32 %v813_v34, %v3031_v6  ;;  %v5160_v34 = vld [vmem:[#allocation27_spill] sm:$0xff] }
 0x1f5   :  { %v877_v29 = vsel %vm108_vm3, %v876_v55, %v875_v28 }
 0x1f6   :  { %v879_v27 = vsel %vm111_vm4, %v878_v38, %v877_v29 }
 0x1f7   :  { %v881_v61 = vsel %vm114_vm5, %v880_v43, %v879_v27  ;;  %v773_v42 = vpop.f32.mrf.mxu0 }
 0x1f8   :  { %v883_v5 = vsel %vm117_vm6, %v882_v39, %v881_v61  ;;  %v774_v3 = vadd.f32 %v773_v42, %v3022_v56 }
 0x1f9   :  { %901 = vmatmul.f32.vlgmr.msra.gmra.mxu0 %v883_v5  ;;  %941 = vmatmul.f32.vlgmr.msra.gmra.mxu2 %v883_v5 }
 0x1fa   :  { %1094 = vmatpush.msra.mxu0 %v3184_v18  ;;  %1134 = vmatpush.msra.mxu2 %v3187_v19 }
 0x1fc   :  { %1095 = vmatpush.msra.mxu0 %v3191_v51  ;;  %1135 = vmatpush.msra.mxu2 %v3194_v9 }
 0x1fe   :  { %1096 = vmatpush.msra.mxu0 %v3197_v62  ;;  %1136 = vmatpush.msra.mxu2 %v3200_v35 }
 0x200   :  { %1097 = vmatpush.msra.mxu0 %v3203_v53  ;;  %1137 = vmatpush.msra.mxu2 %v3206_v30 }
 0x201   :  { %981 = vmatmul.f32.vlgmr.msrb.gmra.mxu0 %v883_v5  ;;  %1021 = vmatmul.f32.vlgmr.msrb.gmra.mxu2 %v883_v5 }
 0x202   :  { %1098 = vmatpush.msra.mxu0 %v3210_v44  ;;  %1138 = vmatpush.msra.mxu2 %v3213_v54 }
 0x204   :  { %1099 = vmatpush.msra.mxu0 %v3216_v1  ;;  %1139 = vmatpush.msra.mxu2 %v3219_v2 }
 0x206   :  { %1100 = vmatpush.msra.mxu0 %v3222_v11  ;;  %1140 = vmatpush.msra.mxu2 %v3225_v12 }
 0x208   :  { %1101 = vmatpush.msra.mxu0 %v3228_v17  ;;  %1141 = vmatpush.msra.mxu2 %v3231_v22 }
 0x20a   :  { %1102 = vmatpush.msra.mxu0 %v3234_v59  ;;  %1142 = vmatpush.msra.mxu2 %v3237_v21 }
 0x20c   :  { %1103 = vmatpush.msra.mxu0 %v3240_v25  ;;  %1143 = vmatpush.msra.mxu2 %v3243_v58 }
 0x20e   :  { %1104 = vmatpush.msra.mxu0 %v3247_v33  ;;  %1144 = vmatpush.msra.mxu2 %v3250_v36 }
 0x210   :  { %1105 = vmatpush.msra.mxu0 %v3255_v7  ;;  %1145 = vmatpush.msra.mxu2 %v3258_v10 }
 0x212   :  { %1106 = vmatpush.msra.mxu0 %v3262_v13  ;;  %1146 = vmatpush.msra.mxu2 %v3265_v14 }
 0x214   :  { %1107 = vmatpush.msra.mxu0 %v3268_v15  ;;  %1147 = vmatpush.msra.mxu2 %v3271_v45 }
 0x216   :  { %1108 = vmatpush.msra.mxu0 %v3274_v63  ;;  %1148 = vmatpush.msra.mxu2 %v3277_v50 }
 0x218   :  { %1109 = vmatpush.msra.mxu0 %v3280_v46  ;;  %1149 = vmatpush.msra.mxu2 %v3283_v23 }
 0x21a   :  { %1174 = vmatpush.msrb.mxu0 %v3286_v0  ;;  %1214 = vmatpush.msrb.mxu2 %v3289_v4 }
 0x21c   :  { %1175 = vmatpush.msrb.mxu0 %v3294_v8  ;;  %1215 = vmatpush.msrb.mxu2 %v3297_v60 }
 0x224   :  { %v713_v24 = vpop.f32.mrf.mxu1 }
 0x225   :  { %v714_v52 = vadd.f32 %v713_v24, %v694_v26 }
 0x227   :  { %v836_v57 = vmul.f32 0.5, %v714_v52 }
 0x229   :  { %1990 = vtanh.f32 %v836_v57 }
 0x22a   :  { %v753_v43 = vpop.f32.mrf.mxu3 }
 0x22b   :  { %v754_v38 = vadd.f32 %v753_v43, %v734_v31 }
 0x22c   :  { %v793_v39 = vpop.f32.mrf.mxu1 }
 0x22d   :  { %v840_v16 = vmul.f32 0.5, %v754_v38  ;;  %v794_v55 = vadd.f32 %v793_v39, %v774_v3 }
 0x22f   :  { %1992 = vtanh.f32 %v840_v16  ;;  %v1991_v32 = vpop.eup %1990  ;;  %v5161_v16 = vld [vmem:[#allocation28_spill] sm:$0xff] }
 0x230   :  { %1994 = vtanh.f32 %v794_v55  ;;  %v838_v49 = vadd.f32 1.0, %v1991_v32  ;;  %v5162_v55 = vld [vmem:[#allocation43_spill] sm:$0xff] }
 0x231   :  { %1176 = vmatpush.msrb.mxu0 %v5162_v55  ;;  %v5164_v32 = vld [vmem:[#allocation31_spill] sm:$0xff] }
 0x232   :  { %v833_v26 = vpop.f32.mrf.mxu3  ;;  %v839_v52 = vmul.f32 0.5, %v838_v49  ;;  %v5169_v49 = vld [vmem:[#allocation36_spill] sm:$0xff] }
 0x233   :  { %v834_v28 = vadd.f32 %v833_v26, %v814_v20  ;;  %v5163_v20 = vld [vmem:[#allocation44_spill] sm:$0xff] }
 0x234   :  { %1216 = vmatpush.msrb.mxu2 %v5163_v20  ;;  %v5165_v26 = vld [vmem:[#allocation32_spill] sm:$0xff] }
 0x235   :  { %v1993_v29 = vpop.eup %1992  ;;  %v845_v27 = vmul.f32 0.5, %v834_v28  ;;  %v5166_v28 = vld [vmem:[#allocation45_spill] sm:$0xff] }
 0x236   :  { %v842_v24 = vadd.f32 1.0, %v1993_v29  ;;  %v1995_v61 = vpop.eup %1994  ;;  %1177 = vmatpush.msrb.mxu0 %v5166_v28  ;;  %v5170_v29 = vld [vmem:[#allocation39_spill] sm:$0xff] }
 0x237   :  { %1996 = vtanh.f32 %v845_v27  ;;  %v850_v57 = vmul.f32 %v1995_v61, %v839_v52  ;;  %v5171_v27 = vld [vmem:[#allocation40_spill] sm:$0xff]  ;;  %v5173_v61 = vld [vmem:[#allocation51_spill] sm:$0xff]  ;;  %v5174_v52 = vld [vmem:[#allocation53_spill] sm:$0xff] }
 0x238   :  { %v843_v5 = vmul.f32 0.5, %v842_v24  ;;  %v5172_v24 = vld [vmem:[#allocation49_spill] sm:$0xff] }
 0x239   :  { %1178 = vmatpush.msrb.mxu0 %v5172_v24  ;;  %v1070_v24 = vld [vmem:[#allocation2 + $0x3c] sm:$0x1] }
 0x23a   :  { %v849_v42 = vmul.f32 %v843_v5, %v3253_v37  ;;  %v5175_v5 = vld [vmem:[#allocation56_spill] sm:$0xff]  ;;  %v1091_v28 = vrot.slane %v1070_v24, 1 }
 0x23c   :  { %v3588_v31 = vadd.f32 %v850_v57, %v849_v42  ;;  %v5176_v42 = vld [vmem:[#allocation58_spill] sm:$0xff] }
 0x23d   :  { %v1997_v3 = vpop.eup %1996  ;;  %1179 = vmatpush.msrb.mxu0 %v5176_v42  ;;  %v5177_v57 = vld [vmem:[#allocation62_spill] sm:$0xff] }
 0x23e   :  { %1998 = vtanh.f32 %v3588_v31  ;;  %v847_v43 = vadd.f32 1.0, %v1997_v3  ;;  %v5178_v3 = vld [vmem:[#allocation85_spill] sm:$0xff] }
 0x240   :  { %v848_v37 = vmul.f32 0.5, %v847_v43  ;;  %v5179_v43 = vld [vmem:[#allocation89_spill] sm:$0xff] }
 0x244   :  { %v1999_v38 = vpop.eup %1998 }
 0x245   :  { %v853_v39 = vmul.f32 %v1999_v38, %v848_v37  ;;  %v5180_v37 = vld [vmem:[#allocation60_spill] sm:$0xff]  ;;  %v5181_v38 = vld [vmem:[#allocation15_spill] sm:$0xff] }
 0x246   :  { %1180 = vmatpush.msrb.mxu0 %v5180_v37  ;;  %v5191_v37 = vld [vmem:[#allocation73_spill] sm:$0xff] }
 0x247   :  { %921 = vmatmul.f32.vlgmr.msra.gmra.mxu1 %v853_v39  ;;  %961 = vmatmul.f32.vlgmr.msra.gmra.mxu3 %v853_v39 }
 0x248   :  { %1114 = vmatpush.msra.mxu1 %v3061_v40  ;;  %1154 = vmatpush.msra.mxu3 %v3064_v41  ;;  %v5167_v40 = vld [vmem:[#allocation46_spill] sm:$0xff]  ;;  %v5168_v41 = vld [vmem:[#allocation35_spill] sm:$0xff] }
 0x249   :  { %1217 = vmatpush.msrb.mxu2 %v5167_v40 }
 0x24a   :  { %1115 = vmatpush.msra.mxu1 %v5160_v34  ;;  %1155 = vmatpush.msra.mxu3 %v5161_v16  ;;  %v5183_v34 = vld [vmem:[#allocation65_spill] sm:$0xff] }
 0x24b   :  { %1218 = vmatpush.msrb.mxu2 %v5173_v61  ;;  %v5184_v16 = vld [vmem:[#allocation17_spill] sm:$0xff] }
 0x24c   :  { %1116 = vmatpush.msra.mxu1 %v5164_v32  ;;  %1156 = vmatpush.msra.mxu3 %v5165_v26  ;;  %v5185_v32 = vld [vmem:[#allocation18_spill] sm:$0xff]  ;;  %v5186_v26 = vld [vmem:[#allocation67_spill] sm:$0xff] }
 0x24d   :  { %1219 = vmatpush.msrb.mxu2 %v5177_v57  ;;  %1181 = vmatpush.msrb.mxu0 %v5184_v16  ;;  %v5195_v16 = vld [vmem:[#allocation77_spill] sm:$0xff] }
 0x24e   :  { %1117 = vmatpush.msra.mxu1 %v5168_v41  ;;  %1157 = vmatpush.msra.mxu3 %v5169_v49  ;;  %v5187_v41 = vld [vmem:[#allocation69_spill] sm:$0xff]  ;;  %v5188_v49 = vld [vmem:[#allocation19_spill] sm:$0xff] }
 0x24f   :  { %1001 = vmatmul.f32.vlgmr.msrb.gmra.mxu1 %v853_v39  ;;  %1041 = vmatmul.f32.vlgmr.msrb.gmra.mxu3 %v853_v39  ;;  %v5182_v39 = vld [vmem:[#allocation16_spill] sm:$0xff] }
 0x250   :  { %1118 = vmatpush.msra.mxu1 %v5170_v29  ;;  %1158 = vmatpush.msra.mxu3 %v5171_v27  ;;  %v5189_v29 = vld [vmem:[#allocation20_spill] sm:$0xff]  ;;  %v5190_v27 = vld [vmem:[#allocation71_spill] sm:$0xff] }
 0x251   :  { %1220 = vmatpush.msrb.mxu2 %v5181_v38  ;;  %1182 = vmatpush.msrb.mxu0 %v5188_v49  ;;  %v5192_v38 = vld [vmem:[#allocation21_spill] sm:$0xff] }
 0x252   :  { %1119 = vmatpush.msra.mxu1 %v5174_v52  ;;  %1159 = vmatpush.msra.mxu3 %v5175_v5  ;;  %v5199_v49 = vld [vmem:[#allocation81_spill] sm:$0xff] }
 0x253   :  { %1221 = vmatpush.msrb.mxu2 %v5185_v32  ;;  %1183 = vmatpush.msrb.mxu0 %v5192_v38  ;;  %v5196_v32 = vld [vmem:[#allocation23_spill] sm:$0xff]  ;;  %v5203_v38 = vld [vmem:[#allocation29_spill] sm:$0xff] }
 0x254   :  { %1120 = vmatpush.msra.mxu1 %v5178_v3  ;;  %1160 = vmatpush.msra.mxu3 %v5179_v43  ;;  %v1065_v43 = vld [vmem:[#allocation2 + $0x14] sm:$0x1]  ;;  %v1063_v3 = vld [vmem:[#allocation2 + $0x4] sm:$0x1] }
 0x255   :  { %1222 = vmatpush.msrb.mxu2 %v5189_v29  ;;  %1184 = vmatpush.msrb.mxu0 %v5196_v32  ;;  %v5200_v29 = vld [vmem:[#allocation25_spill] sm:$0xff]  ;;  %v5207_v32 = vld [vmem:[#allocation34_spill] sm:$0xff]  ;;  %v1081_v57 = vrot.slane %v1065_v43, 6 }
 0x256   :  { %1121 = vmatpush.msra.mxu1 %v5182_v39  ;;  %1161 = vmatpush.msra.mxu3 %v5183_v34  ;;  %v5193_v39 = vld [vmem:[#allocation22_spill] sm:$0xff]  ;;  %v5194_v34 = vld [vmem:[#allocation75_spill] sm:$0xff] }
 0x257   :  { %1223 = vmatpush.msrb.mxu2 %v5193_v39  ;;  %1185 = vmatpush.msrb.mxu0 %v5200_v29  ;;  %v5204_v39 = vld [vmem:[#allocation30_spill] sm:$0xff] }
 0x258   :  { %1122 = vmatpush.msra.mxu1 %v5186_v26  ;;  %1162 = vmatpush.msra.mxu3 %v5187_v41  ;;  %v5197_v26 = vld [vmem:[#allocation24_spill] sm:$0xff]  ;;  %v5198_v41 = vld [vmem:[#allocation79_spill] sm:$0xff]  ;;  %v5211_v29 = vld [vmem:[#allocation38_spill] sm:$0xff] }
 0x259   :  { %1224 = vmatpush.msrb.mxu2 %v5197_v26  ;;  %1186 = vmatpush.msrb.mxu0 %v5204_v39  ;;  %v5208_v26 = vld [vmem:[#allocation92_spill] sm:$0xff]  ;;  %v5215_v39 = vld [vmem:[#allocation42_spill] sm:$0xff] }
 0x25a   :  { %1123 = vmatpush.msra.mxu1 %v5190_v27  ;;  %1163 = vmatpush.msra.mxu3 %v5191_v37  ;;  %v5201_v27 = vld [vmem:[#allocation26_spill] sm:$0xff]  ;;  %v5202_v37 = vld [vmem:[#allocation83_spill] sm:$0xff] }
 0x25b   :  { %1225 = vmatpush.msrb.mxu2 %v5201_v27  ;;  %1187 = vmatpush.msrb.mxu0 %v5208_v26  ;;  %v5212_v27 = vld [vmem:[#allocation95_spill] sm:$0xff]  ;;  %v5219_v26 = vld [vmem:[#allocation48_spill] sm:$0xff] }
 0x25c   :  { %1124 = vmatpush.msra.mxu1 %v5194_v34  ;;  %1164 = vmatpush.msra.mxu3 %v5195_v16  ;;  %v5205_v34 = vld [vmem:[#allocation87_spill] sm:$0xff]  ;;  %v5206_v16 = vld [vmem:[#allocation33_spill] sm:$0xff] }
 0x25d   :  { %1226 = vmatpush.msrb.mxu2 %v5205_v34  ;;  %1188 = vmatpush.msrb.mxu0 %v5212_v27  ;;  %v5216_v34 = vld [vmem:[#allocation99_spill] sm:$0xff]  ;;  %v5223_v27 = vld [vmem:[#allocation105_spill] sm:$0xff] }
 0x25e   :  { %1125 = vmatpush.msra.mxu1 %v5198_v41  ;;  %1165 = vmatpush.msra.mxu3 %v5199_v49  ;;  %v5209_v41 = vld [vmem:[#allocation93_spill] sm:$0xff] }
 0x25f   :  { %1227 = vmatpush.msrb.mxu2 %v5209_v41  ;;  %v5210_v49 = vld [vmem:[#allocation37_spill] sm:$0xff]  ;;  %v5220_v41 = vld [vmem:[#allocation50_spill] sm:$0xff] }
 0x260   :  { %1126 = vmatpush.msra.mxu1 %v5202_v37  ;;  %1166 = vmatpush.msra.mxu3 %v5203_v38  ;;  %v5213_v37 = vld [vmem:[#allocation97_spill] sm:$0xff] }
 0x261   :  { %1228 = vmatpush.msrb.mxu2 %v5213_v37  ;;  %v5214_v38 = vld [vmem:[#allocation41_spill] sm:$0xff]  ;;  %v5224_v37 = vld [vmem:[#allocation54_spill] sm:$0xff] }
 0x262   :  { %1127 = vmatpush.msra.mxu1 %v5206_v16  ;;  %1167 = vmatpush.msra.mxu3 %v5207_v32  ;;  %v5217_v16 = vld [vmem:[#allocation101_spill] sm:$0xff]  ;;  %v5218_v32 = vld [vmem:[#allocation47_spill] sm:$0xff] }
 0x263   :  { %1189 = vmatpush.msrb.mxu0 %v5218_v32  ;;  %1229 = vmatpush.msrb.mxu2 %v5219_v26  ;;  %v5229_v32 = vld [vmem:[#allocation63_spill] sm:$0xff]  ;;  %v5230_v26 = vld [vmem:[#allocation64_spill] sm:$0xff] }
 0x264   :  { %1128 = vmatpush.msra.mxu1 %v5210_v49  ;;  %1168 = vmatpush.msra.mxu3 %v5211_v29  ;;  %v5221_v49 = vld [vmem:[#allocation52_spill] sm:$0xff]  ;;  %v5222_v29 = vld [vmem:[#allocation103_spill] sm:$0xff] }
 0x266   :  { %1129 = vmatpush.msra.mxu1 %v5214_v38  ;;  %1169 = vmatpush.msra.mxu3 %v5215_v39  ;;  %v5225_v38 = vld [vmem:[#allocation55_spill] sm:$0xff]  ;;  %v5226_v39 = vld [vmem:[#allocation57_spill] sm:$0xff] }
 0x268   :  { %1194 = vmatpush.msrb.mxu1 %v5216_v34  ;;  %1234 = vmatpush.msrb.mxu3 %v5217_v16  ;;  %v5227_v34 = vld [vmem:[#allocation59_spill] sm:$0xff]  ;;  %v5228_v16 = vld [vmem:[#allocation61_spill] sm:$0xff] }
 0x26a   :  { %1195 = vmatpush.msrb.mxu1 %v5220_v41  ;;  %1235 = vmatpush.msrb.mxu3 %v5221_v49  ;;  %v5231_v41 = vld [vmem:[#allocation66_spill] sm:$0xff]  ;;  %v5232_v49 = vld [vmem:[#allocation68_spill] sm:$0xff] }
 0x26c   :  { %1196 = vmatpush.msrb.mxu1 %v5222_v29  ;;  %1236 = vmatpush.msrb.mxu3 %v5223_v27  ;;  %v5233_v29 = vld [vmem:[#allocation70_spill] sm:$0xff]  ;;  %v5234_v27 = vld [vmem:[#allocation72_spill] sm:$0xff] }
 0x26e   :  { %1197 = vmatpush.msrb.mxu1 %v5224_v37  ;;  %1237 = vmatpush.msrb.mxu3 %v5225_v38  ;;  %v5235_v37 = vld [vmem:[#allocation74_spill] sm:$0xff]  ;;  %v5236_v38 = vld [vmem:[#allocation76_spill] sm:$0xff] }
 0x270   :  { %1198 = vmatpush.msrb.mxu1 %v5226_v39  ;;  %1238 = vmatpush.msrb.mxu3 %v5227_v34  ;;  %v5237_v39 = vld [vmem:[#allocation78_spill] sm:$0xff]  ;;  %v5238_v34 = vld [vmem:[#allocation80_spill] sm:$0xff] }
 0x272   :  { %1199 = vmatpush.msrb.mxu1 %v5228_v16  ;;  %1239 = vmatpush.msrb.mxu3 %v5229_v32  ;;  %v5239_v16 = vld [vmem:[#allocation82_spill] sm:$0xff]  ;;  %v5240_v32 = vld [vmem:[#allocation84_spill] sm:$0xff] }
 0x274   :  { %1200 = vmatpush.msrb.mxu1 %v5230_v26  ;;  %1240 = vmatpush.msrb.mxu3 %v5231_v41  ;;  %v5241_v26 = vld [vmem:[#allocation86_spill] sm:$0xff]  ;;  %v5242_v41 = vld [vmem:[#allocation88_spill] sm:$0xff] }
 0x276   :  { %1201 = vmatpush.msrb.mxu1 %v5232_v49  ;;  %1241 = vmatpush.msrb.mxu3 %v5233_v29  ;;  %v5243_v49 = vld [vmem:[#allocation90_spill] sm:$0xff]  ;;  %v5244_v29 = vld [vmem:[#allocation91_spill] sm:$0xff] }
 0x278   :  { %1202 = vmatpush.msrb.mxu1 %v5234_v27  ;;  %1242 = vmatpush.msrb.mxu3 %v5235_v37  ;;  %v5245_v27 = vld [vmem:[#allocation94_spill] sm:$0xff]  ;;  %v5246_v37 = vld [vmem:[#allocation96_spill] sm:$0xff] }
 0x27a   :  { %1203 = vmatpush.msrb.mxu1 %v5236_v38  ;;  %1243 = vmatpush.msrb.mxu3 %v5237_v39  ;;  %v5247_v38 = vld [vmem:[#allocation98_spill] sm:$0xff]  ;;  %v5248_v39 = vld [vmem:[#allocation100_spill] sm:$0xff] }
 0x27c   :  { %1204 = vmatpush.msrb.mxu1 %v5238_v34  ;;  %1244 = vmatpush.msrb.mxu3 %v5239_v16  ;;  %v5249_v34 = vld [vmem:[#allocation102_spill] sm:$0xff]  ;;  %v902_v16 = vpop.f32.mrf.mxu0  ;;  %v942_v61 = vpop.f32.mrf.mxu2 }
 0x27e   :  { %1205 = vmatpush.msrb.mxu1 %v5240_v32  ;;  %1245 = vmatpush.msrb.mxu3 %v5241_v26  ;;  %v1064_v32 = vld [vmem:[#allocation2 + $0xc] sm:$0x1] }
 0x27f   :  { %v1079_v26 = vrot.slane %v1064_v32, 7 }
 0x280   :  { %1206 = vmatpush.msrb.mxu1 %v5242_v41  ;;  %1246 = vmatpush.msrb.mxu3 %v5243_v49  ;;  %v1066_v41 = vld [vmem:[#allocation2 + $0x1c] sm:$0x1]  ;;  %v1067_v49 = vld [vmem:[#allocation2 + $0x24] sm:$0x1] }
 0x281   :  { %v1083_v42 = vrot.slane %v1066_v41, 5  ;;  %v1085_v5 = vrot.slane %v1067_v49, 4 }
 0x282   :  { %1207 = vmatpush.msrb.mxu1 %v5244_v29  ;;  %1247 = vmatpush.msrb.mxu3 %v5245_v27  ;;  %v1080_v29 = vsel %vm99_vm0, %v1079_v26, %v1063_v3  ;;  %v1068_v27 = vld [vmem:[#allocation2 + $0x2c] sm:$0x1] }
 0x283   :  { %v1087_v52 = vrot.slane %v1068_v27, 3  ;;  %v5272_v27 = vld [vmem:[#allocation17_spill] sm:$0xff] }
 0x284   :  { %1208 = vmatpush.msrb.mxu1 %v5246_v37  ;;  %1248 = vmatpush.msrb.mxu3 %v5247_v38  ;;  %v1082_v37 = vsel %vm102_vm1, %v1081_v57, %v1080_v29  ;;  %v903_v38 = vadd.f32 %v902_v16, %v3008_v48  ;;  %v982_v49 = vpop.f32.mrf.mxu0  ;;  %v5271_v29 = vld [vmem:[#allocation65_spill] sm:$0xff] }
 0x286   :  { %1209 = vmatpush.msrb.mxu1 %v5248_v39  ;;  %1249 = vmatpush.msrb.mxu3 %v5249_v34  ;;  %v1069_v39 = vld [vmem:[#allocation2 + $0x34] sm:$0x1]  ;;  %v1084_v34 = vsel %vm105_vm2, %v1083_v42, %v1082_v37  ;;  %v943_v42 = vadd.f32 %v942_v61, %v3011_v47 }
 0x287   :  { %v1086_v32 = vsel %vm108_vm3, %v1085_v5, %v1084_v34  ;;  %v1089_v40 = vrot.slane %v1069_v39, 2  ;;  %v983_v5 = vadd.f32 %v982_v49, %v3022_v56  ;;  %v5269_v39 = vld [vmem:[#allocation15_spill] sm:$0xff]  ;;  %v5270_v34 = vld [vmem:[#allocation16_spill] sm:$0xff]  ;;  %v5279_v49 = vld [vmem:[#allocation73_spill] sm:$0xff] }
 0x288   :  { %v1088_v43 = vsel %vm111_vm4, %v1087_v52, %v1086_v32  ;;  %v1022_v52 = vpop.f32.mrf.mxu2  ;;  %v5273_v32 = vld [vmem:[#allocation18_spill] sm:$0xff] }
 0x289   :  { %v1090_v26 = vsel %vm114_vm5, %v1089_v40, %v1088_v43  ;;  %v5274_v43 = vld [vmem:[#allocation67_spill] sm:$0xff] }
 0x28a   :  { %v1092_v57 = vsel %vm117_vm6, %v1091_v28, %v1090_v26  ;;  %v5276_v26 = vld [vmem:[#allocation19_spill] sm:$0xff] }
 0x28b   :  { %1110 = vmatmul.f32.vlgmr.msra.gmra.mxu0 %v1092_v57  ;;  %1150 = vmatmul.f32.vlgmr.msra.gmra.mxu2 %v1092_v57 }
 0x28c   :  { %1303 = vmatpush.msra.mxu0 %v3184_v18  ;;  %1343 = vmatpush.msra.mxu2 %v3187_v19  ;;  %v1023_v18 = vadd.f32 %v1022_v52, %v3031_v6  ;;  %v5286_v52 = vld [vmem:[#allocation79_spill] sm:$0xff] }
 0x28e   :  { %1304 = vmatpush.msra.mxu0 %v3191_v51  ;;  %1344 = vmatpush.msra.mxu2 %v3194_v9 }
 0x290   :  { %1305 = vmatpush.msra.mxu0 %v3197_v62  ;;  %1345 = vmatpush.msra.mxu2 %v3200_v35 }
 0x292   :  { %1306 = vmatpush.msra.mxu0 %v3203_v53  ;;  %1346 = vmatpush.msra.mxu2 %v3206_v30 }
 0x293   :  { %1190 = vmatmul.f32.vlgmr.msrb.gmra.mxu0 %v1092_v57  ;;  %1230 = vmatmul.f32.vlgmr.msrb.gmra.mxu2 %v1092_v57  ;;  %v5278_v57 = vld [vmem:[#allocation71_spill] sm:$0xff] }
 0x294   :  { %1307 = vmatpush.msra.mxu0 %v3210_v44  ;;  %1347 = vmatpush.msra.mxu2 %v3213_v54 }
 0x296   :  { %1308 = vmatpush.msra.mxu0 %v3216_v1  ;;  %1348 = vmatpush.msra.mxu2 %v3219_v2 }
 0x298   :  { %1309 = vmatpush.msra.mxu0 %v3222_v11  ;;  %1349 = vmatpush.msra.mxu2 %v3225_v12 }
 0x29a   :  { %1310 = vmatpush.msra.mxu0 %v3228_v17  ;;  %1350 = vmatpush.msra.mxu2 %v3231_v22 }
 0x29c   :  { %1311 = vmatpush.msra.mxu0 %v3234_v59  ;;  %1351 = vmatpush.msra.mxu2 %v3237_v21 }
 0x29e   :  { %1312 = vmatpush.msra.mxu0 %v3240_v25  ;;  %1352 = vmatpush.msra.mxu2 %v3243_v58  ;;  %v3746_v58 = vld [vmem:[#allocation5 + $0x3e0] sm:$0xff] }
 0x2a0   :  { %1313 = vmatpush.msra.mxu0 %v3247_v33  ;;  %1353 = vmatpush.msra.mxu2 %v3250_v36  ;;  %v3749_v33 = vld [vmem:[#allocation5 + $0x3e8] sm:$0xff]  ;;  %v3754_v36 = vld [vmem:[#allocation5 + $0x3c0] sm:$0xff] }
 0x2a1   :  { %5250 = vst [vmem:[#allocation104_spill] sm:$0xff] %v3754_v36 }
 0x2a2   :  { %1314 = vmatpush.msra.mxu0 %v3255_v7  ;;  %1354 = vmatpush.msra.mxu2 %v3258_v10  ;;  %v3757_v7 = vld [vmem:[#allocation5 + $0x3c8] sm:$0xff]  ;;  %v3762_v10 = vld [vmem:[#allocation5 + $0x3a0] sm:$0xff] }
 0x2a3   :  { %5251 = vst [vmem:[#allocation106_spill] sm:$0xff] %v3757_v7 }
 0x2a4   :  { %1315 = vmatpush.msra.mxu0 %v3262_v13  ;;  %1355 = vmatpush.msra.mxu2 %v3265_v14  ;;  %5252 = vst [vmem:[#allocation107_spill] sm:$0xff] %v3762_v10  ;;  %v3765_v13 = vld [vmem:[#allocation5 + $0x3a8] sm:$0xff]  ;;  %v5254_v14 = vld [vmem:[#allocation45_spill] sm:$0xff] }
 0x2a5   :  { %5253 = vst [vmem:[#allocation108_spill] sm:$0xff] %v3765_v13 }
 0x2a6   :  { %1316 = vmatpush.msra.mxu0 %v3268_v15  ;;  %1356 = vmatpush.msra.mxu2 %v3271_v45  ;;  %v5255_v15 = vld [vmem:[#allocation46_spill] sm:$0xff] }
 0x2a7   :  { %v3770_v45 = vld [vmem:[#allocation5 + $0x380] sm:$0xff] }
 0x2a8   :  { %1317 = vmatpush.msra.mxu0 %v3274_v63  ;;  %1357 = vmatpush.msra.mxu2 %v3277_v50  ;;  %5256 = vst [vmem:[#allocation27_spill] sm:$0xff] %v3770_v45  ;;  %v3773_v63 = vld [vmem:[#allocation5 + $0x388] sm:$0xff]  ;;  %v3776_v50 = vld [vmem:[#allocation5 + $0x360] sm:$0xff] }
 0x2a9   :  { %5257 = vst [vmem:[#allocation28_spill] sm:$0xff] %v3773_v63 }
 0x2aa   :  { %1318 = vmatpush.msra.mxu0 %v3280_v46  ;;  %1358 = vmatpush.msra.mxu2 %v3283_v23  ;;  %5258 = vst [vmem:[#allocation43_spill] sm:$0xff] %v3776_v50  ;;  %v3779_v46 = vld [vmem:[#allocation5 + $0x368] sm:$0xff]  ;;  %v5260_v23 = vld [vmem:[#allocation49_spill] sm:$0xff] }
 0x2ab   :  { %5259 = vst [vmem:[#allocation44_spill] sm:$0xff] %v3779_v46 }
 0x2ac   :  { %1383 = vmatpush.msrb.mxu0 %v3286_v0  ;;  %1423 = vmatpush.msrb.mxu2 %v3289_v4  ;;  %v5261_v0 = vld [vmem:[#allocation51_spill] sm:$0xff]  ;;  %v5262_v4 = vld [vmem:[#allocation53_spill] sm:$0xff] }
 0x2ae   :  { %1384 = vmatpush.msrb.mxu0 %v3294_v8  ;;  %1424 = vmatpush.msrb.mxu2 %v3297_v60  ;;  %v5263_v8 = vld [vmem:[#allocation56_spill] sm:$0xff]  ;;  %v5264_v60 = vld [vmem:[#allocation58_spill] sm:$0xff] }
 0x2b0   :  { %1385 = vmatpush.msrb.mxu0 %v5162_v55  ;;  %1425 = vmatpush.msrb.mxu2 %v5163_v20  ;;  %v5266_v55 = vld [vmem:[#allocation85_spill] sm:$0xff] }
 0x2b1   :  { %v5267_v20 = vld [vmem:[#allocation89_spill] sm:$0xff] }
 0x2b2   :  { %1386 = vmatpush.msrb.mxu0 %v5254_v14  ;;  %1426 = vmatpush.msrb.mxu2 %v5255_v15  ;;  %v5307_v14 = vld [vmem:[#allocation48_spill] sm:$0xff]  ;;  %v5308_v15 = vld [vmem:[#allocation50_spill] sm:$0xff] }
 0x2b4   :  { %1387 = vmatpush.msrb.mxu0 %v5260_v23  ;;  %1427 = vmatpush.msrb.mxu2 %v5261_v0  ;;  %v5309_v23 = vld [vmem:[#allocation52_spill] sm:$0xff]  ;;  %v5310_v0 = vld [vmem:[#allocation103_spill] sm:$0xff] }
 0x2b6   :  { %1388 = vmatpush.msrb.mxu0 %v5264_v60  ;;  %v5313_v60 = vld [vmem:[#allocation55_spill] sm:$0xff] }
 0x2c4   :  { %v922_v3 = vpop.f32.mrf.mxu1 }
 0x2c5   :  { %v923_v41 = vadd.f32 %v922_v3, %v903_v38  ;;  %v5268_v38 = vld [vmem:[#allocation60_spill] sm:$0xff]  ;;  %v5275_v3 = vld [vmem:[#allocation69_spill] sm:$0xff] }
 0x2c6   :  { %1389 = vmatpush.msrb.mxu0 %v5268_v38  ;;  %v5317_v38 = vld [vmem:[#allocation63_spill] sm:$0xff] }
 0x2c7   :  { %v1045_v16 = vmul.f32 0.5, %v923_v41  ;;  %v5277_v41 = vld [vmem:[#allocation20_spill] sm:$0xff] }
 0x2c8   :  { %1390 = vmatpush.msrb.mxu0 %v5272_v27  ;;  %v5321_v27 = vld [vmem:[#allocation70_spill] sm:$0xff] }
 0x2c9   :  { %2000 = vtanh.f32 %v1045_v16  ;;  %v5280_v16 = vld [vmem:[#allocation21_spill] sm:$0xff] }
 0x2ca   :  { %v962_v40 = vpop.f32.mrf.mxu3  ;;  %1391 = vmatpush.msrb.mxu0 %v5276_v26  ;;  %v5325_v26 = vld [vmem:[#allocation78_spill] sm:$0xff] }
 0x2cb   :  { %v963_v24 = vadd.f32 %v962_v40, %v943_v42  ;;  %v5281_v42 = vld [vmem:[#allocation22_spill] sm:$0xff]  ;;  %v5283_v40 = vld [vmem:[#allocation77_spill] sm:$0xff] }
 0x2cc   :  { %v1002_v28 = vpop.f32.mrf.mxu1  ;;  %1392 = vmatpush.msrb.mxu0 %v5280_v16  ;;  %v5329_v16 = vld [vmem:[#allocation86_spill] sm:$0xff] }
 0x2cd   :  { %v1049_v61 = vmul.f32 0.5, %v963_v24  ;;  %v1003_v37 = vadd.f32 %v1002_v28, %v983_v5  ;;  %v5282_v5 = vld [vmem:[#allocation75_spill] sm:$0xff]  ;;  %v5285_v28 = vld [vmem:[#allocation24_spill] sm:$0xff] }
 0x2ce   :  { %v5284_v24 = vld [vmem:[#allocation23_spill] sm:$0xff] }
 0x2cf   :  { %2002 = vtanh.f32 %v1049_v61  ;;  %v2001_v19 = vpop.eup %2000  ;;  %1393 = vmatpush.msrb.mxu0 %v5284_v24  ;;  %v5287_v61 = vld [vmem:[#allocation81_spill] sm:$0xff]  ;;  %v5333_v24 = vld [vmem:[#allocation94_spill] sm:$0xff] }
 0x2d0   :  { %2004 = vtanh.f32 %v1003_v37  ;;  %v1047_v62 = vadd.f32 1.0, %v2001_v19  ;;  %v5288_v37 = vld [vmem:[#allocation25_spill] sm:$0xff]  ;;  %v5290_v19 = vld [vmem:[#allocation83_spill] sm:$0xff] }
 0x2d1   :  { %1394 = vmatpush.msrb.mxu0 %v5288_v37  ;;  %v5337_v37 = vld [vmem:[#allocation102_spill] sm:$0xff] }
 0x2d2   :  { %v1042_v51 = vpop.f32.mrf.mxu3  ;;  %v1048_v54 = vmul.f32 0.5, %v1047_v62  ;;  %v5293_v62 = vld [vmem:[#allocation87_spill] sm:$0xff] }
 0x2d3   :  { %v1043_v9 = vadd.f32 %v1042_v51, %v1023_v18  ;;  %v5289_v18 = vld [vmem:[#allocation26_spill] sm:$0xff]  ;;  %v5291_v51 = vld [vmem:[#allocation29_spill] sm:$0xff] }
 0x2d5   :  { %v2003_v35 = vpop.eup %2002  ;;  %v1054_v53 = vmul.f32 0.5, %v1043_v9  ;;  %v5292_v9 = vld [vmem:[#allocation30_spill] sm:$0xff] }
 0x2d6   :  { %v1051_v30 = vadd.f32 1.0, %v2003_v35  ;;  %v2005_v44 = vpop.eup %2004  ;;  %1395 = vmatpush.msrb.mxu0 %v5292_v9  ;;  %v5294_v35 = vld [vmem:[#allocation33_spill] sm:$0xff] }
 0x2d7   :  { %2006 = vtanh.f32 %v1054_v53  ;;  %v1059_v11 = vmul.f32 %v2005_v44, %v1048_v54  ;;  %v5295_v53 = vld [vmem:[#allocation34_spill] sm:$0xff]  ;;  %v5297_v44 = vld [vmem:[#allocation93_spill] sm:$0xff] }
 0x2d8   :  { %v1052_v1 = vmul.f32 0.5, %v1051_v30  ;;  %v5296_v30 = vld [vmem:[#allocation92_spill] sm:$0xff]  ;;  %v5298_v54 = vld [vmem:[#allocation37_spill] sm:$0xff] }
 0x2d9   :  { %1396 = vmatpush.msrb.mxu0 %v5296_v30  ;;  %v1276_v30 = vld [vmem:[#allocation2 + $0x25] sm:$0x1] }
 0x2da   :  { %v1058_v2 = vmul.f32 %v1052_v1, %v3588_v31  ;;  %v5265_v31 = vld [vmem:[#allocation62_spill] sm:$0xff] }
 0x2db   :  { %1428 = vmatpush.msrb.mxu2 %v5265_v31  ;;  %v5299_v1 = vld [vmem:[#allocation38_spill] sm:$0xff]  ;;  %v5314_v31 = vld [vmem:[#allocation57_spill] sm:$0xff] }
 0x2dc   :  { %v3731_v12 = vadd.f32 %v1059_v11, %v1058_v2  ;;  %v5300_v2 = vld [vmem:[#allocation95_spill] sm:$0xff]  ;;  %v5301_v11 = vld [vmem:[#allocation97_spill] sm:$0xff] }
 0x2dd   :  { %v2007_v17 = vpop.eup %2006  ;;  %1429 = vmatpush.msrb.mxu2 %v5269_v39  ;;  %1397 = vmatpush.msrb.mxu0 %v5300_v2  ;;  %v5318_v39 = vld [vmem:[#allocation64_spill] sm:$0xff] }
 0x2de   :  { %2008 = vtanh.f32 %v3731_v12  ;;  %v1056_v22 = vadd.f32 1.0, %v2007_v17  ;;  %v5302_v17 = vld [vmem:[#allocation41_spill] sm:$0xff] }
 0x2df   :  { %1430 = vmatpush.msrb.mxu2 %v5273_v32  ;;  %v5322_v32 = vld [vmem:[#allocation72_spill] sm:$0xff] }
 0x2e0   :  { %v1057_v59 = vmul.f32 0.5, %v1056_v22  ;;  %v5303_v22 = vld [vmem:[#allocation42_spill] sm:$0xff] }
 0x2e1   :  { %1431 = vmatpush.msrb.mxu2 %v5277_v41  ;;  %v5326_v41 = vld [vmem:[#allocation80_spill] sm:$0xff] }
 0x2e3   :  { %1432 = vmatpush.msrb.mxu2 %v5281_v42  ;;  %v5330_v42 = vld [vmem:[#allocation88_spill] sm:$0xff] }
 0x2e4   :  { %v2009_v21 = vpop.eup %2008 }
 0x2e5   :  { %v1062_v25 = vmul.f32 %v2009_v21, %v1057_v59  ;;  %1433 = vmatpush.msrb.mxu2 %v5285_v28  ;;  %v5304_v59 = vld [vmem:[#allocation99_spill] sm:$0xff]  ;;  %v5305_v21 = vld [vmem:[#allocation101_spill] sm:$0xff]  ;;  %v5334_v28 = vld [vmem:[#allocation96_spill] sm:$0xff] }
 0x2e7   :  { %1130 = vmatmul.f32.vlgmr.msra.gmra.mxu1 %v1062_v25  ;;  %1170 = vmatmul.f32.vlgmr.msra.gmra.mxu3 %v1062_v25 }
 0x2e8   :  { %1323 = vmatpush.msra.mxu1 %v3746_v58  ;;  %1363 = vmatpush.msra.mxu3 %v3749_v33 }
 0x2e9   :  { %1434 = vmatpush.msrb.mxu2 %v5289_v18 }
 0x2ea   :  { %1324 = vmatpush.msra.mxu1 %v3754_v36  ;;  %1364 = vmatpush.msra.mxu3 %v3757_v7 }
 0x2eb   :  { %1435 = vmatpush.msrb.mxu2 %v5293_v62  ;;  %v1272_v62 = vld [vmem:[#allocation2 + $0x5] sm:$0x1] }
 0x2ec   :  { %1325 = vmatpush.msra.mxu1 %v3762_v10  ;;  %1365 = vmatpush.msra.mxu3 %v3765_v13 }
 0x2ed   :  { %1436 = vmatpush.msrb.mxu2 %v5297_v44 }
 0x2ee   :  { %1326 = vmatpush.msra.mxu1 %v3770_v45  ;;  %1366 = vmatpush.msra.mxu3 %v3773_v63 }
 0x2ef   :  { %1210 = vmatmul.f32.vlgmr.msrb.gmra.mxu1 %v1062_v25  ;;  %1250 = vmatmul.f32.vlgmr.msrb.gmra.mxu3 %v1062_v25  ;;  %v5306_v25 = vld [vmem:[#allocation47_spill] sm:$0xff] }
 0x2f0   :  { %1327 = vmatpush.msra.mxu1 %v3776_v50  ;;  %1367 = vmatpush.msra.mxu3 %v3779_v46 }
 0x2f1   :  { %1437 = vmatpush.msrb.mxu2 %v5301_v11  ;;  %1398 = vmatpush.msrb.mxu0 %v5306_v25  ;;  %v1294_v11 = vrot.slane %v1276_v30, 4 }
 0x2f2   :  { %1328 = vmatpush.msra.mxu1 %v5262_v4  ;;  %1368 = vmatpush.msra.mxu3 %v5263_v8  ;;  %v5311_v4 = vld [vmem:[#allocation105_spill] sm:$0xff]  ;;  %v5312_v8 = vld [vmem:[#allocation54_spill] sm:$0xff] }
 0x2f3   :  { %1438 = vmatpush.msrb.mxu2 %v5307_v14  ;;  %v1279_v14 = vld [vmem:[#allocation2 + $0x3d] sm:$0x1] }
 0x2f4   :  { %1329 = vmatpush.msra.mxu1 %v5266_v55  ;;  %1369 = vmatpush.msra.mxu3 %v5267_v20  ;;  %v5315_v55 = vld [vmem:[#allocation59_spill] sm:$0xff]  ;;  %v5316_v20 = vld [vmem:[#allocation61_spill] sm:$0xff] }
 0x2f6   :  { %1330 = vmatpush.msra.mxu1 %v5270_v34  ;;  %1370 = vmatpush.msra.mxu3 %v5271_v29  ;;  %v5319_v34 = vld [vmem:[#allocation66_spill] sm:$0xff]  ;;  %v5320_v29 = vld [vmem:[#allocation68_spill] sm:$0xff] }
 0x2f8   :  { %1331 = vmatpush.msra.mxu1 %v5274_v43  ;;  %1371 = vmatpush.msra.mxu3 %v5275_v3  ;;  %v5323_v43 = vld [vmem:[#allocation74_spill] sm:$0xff]  ;;  %v5324_v3 = vld [vmem:[#allocation76_spill] sm:$0xff] }
 0x2fa   :  { %1332 = vmatpush.msra.mxu1 %v5278_v57  ;;  %1372 = vmatpush.msra.mxu3 %v5279_v49  ;;  %v5327_v57 = vld [vmem:[#allocation82_spill] sm:$0xff]  ;;  %v5328_v49 = vld [vmem:[#allocation84_spill] sm:$0xff] }
 0x2fc   :  { %1333 = vmatpush.msra.mxu1 %v5282_v5  ;;  %1373 = vmatpush.msra.mxu3 %v5283_v40  ;;  %v5331_v5 = vld [vmem:[#allocation90_spill] sm:$0xff]  ;;  %v5332_v40 = vld [vmem:[#allocation91_spill] sm:$0xff] }
 0x2fe   :  { %1334 = vmatpush.msra.mxu1 %v5286_v52  ;;  %1374 = vmatpush.msra.mxu3 %v5287_v61  ;;  %v5335_v52 = vld [vmem:[#allocation98_spill] sm:$0xff]  ;;  %v5336_v61 = vld [vmem:[#allocation100_spill] sm:$0xff] }
 0x300   :  { %1335 = vmatpush.msra.mxu1 %v5290_v19  ;;  %1375 = vmatpush.msra.mxu3 %v5291_v51  ;;  %v1273_v19 = vld [vmem:[#allocation2 + $0xd] sm:$0x1]  ;;  %v1274_v51 = vld [vmem:[#allocation2 + $0x15] sm:$0x1] }
 0x301   :  { %v1288_v9 = vrot.slane %v1273_v19, 7  ;;  %v3904_v19 = vld [vmem:[#allocation5 + $0x148] sm:$0xff] }
 0x302   :  { %1336 = vmatpush.msra.mxu1 %v5294_v35  ;;  %1376 = vmatpush.msra.mxu3 %v5295_v53  ;;  %v1275_v35 = vld [vmem:[#allocation2 + $0x1d] sm:$0x1]  ;;  %v1290_v53 = vrot.slane %v1274_v51, 6 }
 0x303   :  { %v1289_v44 = vsel %vm99_vm0, %v1288_v9, %v1272_v62  ;;  %v3907_v62 = vld [vmem:[#allocation5 + $0x120] sm:$0xff] }
 0x304   :  { %1337 = vmatpush.msra.mxu1 %v5298_v54  ;;  %1377 = vmatpush.msra.mxu3 %v5299_v1  ;;  %v1292_v54 = vrot.slane %v1275_v35, 5  ;;  %v1277_v1 = vld [vmem:[#allocation2 + $0x2d] sm:$0x1]  ;;  %v1291_v2 = vsel %vm102_vm1, %v1290_v53, %v1289_v44 }
 0x305   :  { %v3910_v35 = vld [vmem:[#allocation5 + $0x128] sm:$0xff] }
 0x306   :  { %1338 = vmatpush.msra.mxu1 %v5302_v17  ;;  %1378 = vmatpush.msra.mxu3 %v5303_v22  ;;  %v1278_v22 = vld [vmem:[#allocation2 + $0x35] sm:$0x1] }
 0x308   :  { %1403 = vmatpush.msrb.mxu1 %v5304_v59  ;;  %1443 = vmatpush.msrb.mxu3 %v5305_v21  ;;  %v1111_v18 = vpop.f32.mrf.mxu0  ;;  %v1293_v59 = vsel %vm105_vm2, %v1292_v54, %v1291_v2  ;;  %v1296_v21 = vrot.slane %v1277_v1, 3  ;;  %v3913_v54 = vld [vmem:[#allocation5 + $0x100] sm:$0xff]  ;;  %v3916_v1 = vld [vmem:[#allocation5 + $0x108] sm:$0xff] }
 0x309   :  { %v1112_v17 = vadd.f32 %v1111_v18, %v3008_v48  ;;  %v3901_v18 = vld [vmem:[#allocation5 + $0x140] sm:$0xff] }
 0x30a   :  { %1404 = vmatpush.msrb.mxu1 %v5308_v15  ;;  %1444 = vmatpush.msrb.mxu3 %v5309_v23  ;;  %v1295_v15 = vsel %vm108_vm3, %v1294_v11, %v1293_v59  ;;  %v1298_v23 = vrot.slane %v1278_v22, 2  ;;  %v3922_v22 = vld [vmem:[#allocation5 + $0xe8] sm:$0xff] }
 0x30c   :  { %1405 = vmatpush.msrb.mxu1 %v5310_v0  ;;  %1445 = vmatpush.msrb.mxu3 %v5311_v4  ;;  %v1297_v0 = vsel %vm111_vm4, %v1296_v21, %v1295_v15  ;;  %v1300_v4 = vrot.slane %v1279_v14, 1  ;;  %v3928_v14 = vld [vmem:[#allocation5 + $0xc8] sm:$0xff] }
 0x30e   :  { %1406 = vmatpush.msrb.mxu1 %v5312_v8  ;;  %1446 = vmatpush.msrb.mxu3 %v5313_v60  ;;  %v1151_v25 = vpop.f32.mrf.mxu2  ;;  %v1299_v60 = vsel %vm114_vm5, %v1298_v23, %v1297_v0  ;;  %v3932_v0 = vld [vmem:[#allocation5 + $0xa0] sm:$0xff] }
 0x310   :  { %1407 = vmatpush.msrb.mxu1 %v5314_v31  ;;  %1447 = vmatpush.msrb.mxu3 %v5315_v55  ;;  %v1301_v55 = vsel %vm117_vm6, %v1300_v4, %v1299_v60  ;;  %v3935_v4 = vld [vmem:[#allocation5 + $0xa8] sm:$0xff] }
 0x311   :  { %1319 = vmatmul.f32.vlgmr.msra.gmra.mxu0 %v1301_v55  ;;  %1359 = vmatmul.f32.vlgmr.msra.gmra.mxu2 %v1301_v55 }
 0x312   :  { %1408 = vmatpush.msrb.mxu1 %v5316_v20  ;;  %1448 = vmatpush.msrb.mxu3 %v5317_v38  ;;  %v1191_v20 = vpop.f32.mrf.mxu0 }
 0x314   :  { %1409 = vmatpush.msrb.mxu1 %v5318_v39  ;;  %1449 = vmatpush.msrb.mxu3 %v5319_v34  ;;  %v1152_v39 = vadd.f32 %v1151_v25, %v3011_v47  ;;  %v3869_v34 = vld [vmem:[#allocation5 + $0x1e0] sm:$0xff] }
 0x315   :  { %1512 = vmatpush.msra.mxu0 %v3869_v34  ;;  %v3925_v25 = vld [vmem:[#allocation5 + $0xc0] sm:$0xff] }
 0x316   :  { %1410 = vmatpush.msrb.mxu1 %v5320_v29  ;;  %1450 = vmatpush.msrb.mxu3 %v5321_v27  ;;  %v3872_v29 = vld [vmem:[#allocation5 + $0x1e8] sm:$0xff]  ;;  %v1192_v27 = vadd.f32 %v1191_v20, %v3022_v56  ;;  %v3947_v20 = vld [vmem:[#allocation5 + $0x60] sm:$0xff] }
 0x317   :  { %1552 = vmatpush.msra.mxu2 %v3872_v29 }
 0x318   :  { %1411 = vmatpush.msrb.mxu1 %v5322_v32  ;;  %1451 = vmatpush.msrb.mxu3 %v5323_v43  ;;  %v3876_v32 = vld [vmem:[#allocation5 + $0x1c0] sm:$0xff]  ;;  %v3879_v43 = vld [vmem:[#allocation5 + $0x1c8] sm:$0xff] }
 0x319   :  { %1513 = vmatpush.msra.mxu0 %v3876_v32  ;;  %1553 = vmatpush.msra.mxu2 %v3879_v43 }
 0x31a   :  { %1412 = vmatpush.msrb.mxu1 %v5324_v3  ;;  %1452 = vmatpush.msrb.mxu3 %v5325_v26 }
 0x31b   :  { %1399 = vmatmul.f32.vlgmr.msrb.gmra.mxu0 %v1301_v55  ;;  %1439 = vmatmul.f32.vlgmr.msrb.gmra.mxu2 %v1301_v55  ;;  %v3943_v55 = vld [vmem:[#allocation5 + $0x88] sm:$0xff] }
 0x31c   :  { %1413 = vmatpush.msrb.mxu1 %v5326_v41  ;;  %1453 = vmatpush.msrb.mxu3 %v5327_v57  ;;  %v3882_v41 = vld [vmem:[#allocation5 + $0x1a0] sm:$0xff]  ;;  %v3885_v57 = vld [vmem:[#allocation5 + $0x1a8] sm:$0xff] }
 0x31d   :  { %1514 = vmatpush.msra.mxu0 %v3882_v41  ;;  %1554 = vmatpush.msra.mxu2 %v3885_v57 }
 0x31e   :  { %1414 = vmatpush.msrb.mxu1 %v5328_v49  ;;  %1454 = vmatpush.msrb.mxu3 %v5329_v16  ;;  %v1231_v16 = vpop.f32.mrf.mxu2 }
 0x320   :  { %1415 = vmatpush.msrb.mxu1 %v5330_v42  ;;  %1455 = vmatpush.msrb.mxu3 %v5331_v5 }
 0x322   :  { %1416 = vmatpush.msrb.mxu1 %v5332_v40  ;;  %1456 = vmatpush.msrb.mxu3 %v5333_v24  ;;  %v3888_v40 = vld [vmem:[#allocation5 + $0x180] sm:$0xff]  ;;  %v3891_v24 = vld [vmem:[#allocation5 + $0x188] sm:$0xff] }
 0x323   :  { %1515 = vmatpush.msra.mxu0 %v3888_v40  ;;  %1555 = vmatpush.msra.mxu2 %v3891_v24 }
 0x324   :  { %1417 = vmatpush.msrb.mxu1 %v5334_v28  ;;  %1457 = vmatpush.msrb.mxu3 %v5335_v52  ;;  %v1232_v28 = vadd.f32 %v1231_v16, %v3031_v6  ;;  %v3895_v52 = vld [vmem:[#allocation5 + $0x160] sm:$0xff] }
 0x325   :  { %1516 = vmatpush.msra.mxu0 %v3895_v52 }
 0x326   :  { %1418 = vmatpush.msrb.mxu1 %v5336_v61  ;;  %1458 = vmatpush.msrb.mxu3 %v5337_v37  ;;  %v3898_v61 = vld [vmem:[#allocation5 + $0x168] sm:$0xff] }
 0x327   :  { %1556 = vmatpush.msra.mxu2 %v3898_v61  ;;  %1517 = vmatpush.msra.mxu0 %v3901_v18 }
 0x329   :  { %1557 = vmatpush.msra.mxu2 %v3904_v19  ;;  %1518 = vmatpush.msra.mxu0 %v3907_v62 }
 0x32b   :  { %1558 = vmatpush.msra.mxu2 %v3910_v35  ;;  %1519 = vmatpush.msra.mxu0 %v3913_v54 }
 0x32d   :  { %1559 = vmatpush.msra.mxu2 %v3916_v1 }
 0x32f   :  { %1560 = vmatpush.msra.mxu2 %v3922_v22 }
 0x331   :  { %1561 = vmatpush.msra.mxu2 %v3928_v14 }
 0x333   :  { %1562 = vmatpush.msra.mxu2 %v3935_v4 }
 0x335   :  { %1563 = vmatpush.msra.mxu2 %v3943_v55 }
 0x364   :  { %v1131_v8 = vpop.f32.mrf.mxu1 }
 0x365   :  { %v1132_v31 = vadd.f32 %v1131_v8, %v1112_v17  ;;  %v3919_v17 = vld [vmem:[#allocation5 + $0xe0] sm:$0xff] }
 0x366   :  { %1520 = vmatpush.msra.mxu0 %v3919_v17 }
 0x367   :  { %v1254_v38 = vmul.f32 0.5, %v1132_v31  ;;  %v3940_v31 = vld [vmem:[#allocation5 + $0x80] sm:$0xff] }
 0x368   :  { %1521 = vmatpush.msra.mxu0 %v3925_v25 }
 0x369   :  { %2010 = vtanh.f32 %v1254_v38  ;;  %v3950_v38 = vld [vmem:[#allocation5 + $0x68] sm:$0xff] }
 0x36a   :  { %v1171_v3 = vpop.f32.mrf.mxu3  ;;  %1522 = vmatpush.msra.mxu0 %v3932_v0  ;;  %1564 = vmatpush.msra.mxu2 %v3950_v38 }
 0x36b   :  { %v1172_v26 = vadd.f32 %v1171_v3, %v1152_v39  ;;  %v3953_v39 = vld [vmem:[#allocation5 + $0x40] sm:$0xff] }
 0x36c   :  { %v1211_v49 = vpop.f32.mrf.mxu1  ;;  %1523 = vmatpush.msra.mxu0 %v3940_v31 }
 0x36d   :  { %v1258_v42 = vmul.f32 0.5, %v1172_v26  ;;  %v1212_v5 = vadd.f32 %v1211_v49, %v1192_v27  ;;  %v3956_v27 = vld [vmem:[#allocation5 + $0x48] sm:$0xff]  ;;  %v3959_v26 = vld [vmem:[#allocation5 + $0x20] sm:$0xff] }
 0x36e   :  { %1524 = vmatpush.msra.mxu0 %v3947_v20  ;;  %1565 = vmatpush.msra.mxu2 %v3956_v27  ;;  %v3962_v49 = vld [vmem:[#allocation5 + $0x28] sm:$0xff] }
 0x36f   :  { %2012 = vtanh.f32 %v1258_v42  ;;  %v2011_v37 = vpop.eup %2010 }
 0x370   :  { %2014 = vtanh.f32 %v1212_v5  ;;  %v1256_v53 = vadd.f32 1.0, %v2011_v37  ;;  %1525 = vmatpush.msra.mxu0 %v3953_v39  ;;  %1566 = vmatpush.msra.mxu2 %v3962_v49  ;;  %v3965_v5 = vld [vmem:[#allocation5] sm:$0xff]  ;;  %v3971_v37 = vld [vmem:[#allocation5 + $0x1f0] sm:$0xff] }
 0x372   :  { %v1251_v51 = vpop.f32.mrf.mxu3  ;;  %v1257_v59 = vmul.f32 0.5, %v1256_v53  ;;  %1526 = vmatpush.msra.mxu0 %v3959_v26  ;;  %v3982_v53 = vld [vmem:[#allocation5 + $0x1d8] sm:$0xff] }
 0x373   :  { %v1252_v9 = vadd.f32 %v1251_v51, %v1232_v28  ;;  %v3968_v28 = vld [vmem:[#allocation5 + $0x8] sm:$0xff]  ;;  %v3974_v51 = vld [vmem:[#allocation5 + $0x1f8] sm:$0xff] }
 0x374   :  { %1527 = vmatpush.msra.mxu0 %v3965_v5  ;;  %1567 = vmatpush.msra.mxu2 %v3968_v28 }
 0x375   :  { %v2013_v30 = vpop.eup %2012  ;;  %v1263_v44 = vmul.f32 0.5, %v1252_v9  ;;  %v3979_v9 = vld [vmem:[#allocation5 + $0x1d0] sm:$0xff] }
 0x376   :  { %v1260_v2 = vadd.f32 1.0, %v2013_v30  ;;  %v2015_v11 = vpop.eup %2014  ;;  %1592 = vmatpush.msrb.mxu0 %v3971_v37  ;;  %1632 = vmatpush.msrb.mxu2 %v3974_v51  ;;  %v3987_v30 = vld [vmem:[#allocation5 + $0x1b0] sm:$0xff] }
 0x377   :  { %2016 = vtanh.f32 %v1263_v44  ;;  %v1268_v23 = vmul.f32 %v2015_v11, %v1257_v59  ;;  %5338 = vst [vmem:[#allocation31_spill] sm:$0xff] %v3987_v30  ;;  %v3990_v44 = vld [vmem:[#allocation5 + $0x1b8] sm:$0xff]  ;;  %v4005_v59 = vld [vmem:[#allocation5 + $0x170] sm:$0xff] }
 0x378   :  { %v1261_v21 = vmul.f32 0.5, %v1260_v2  ;;  %1593 = vmatpush.msrb.mxu0 %v3979_v9  ;;  %1633 = vmatpush.msrb.mxu2 %v3982_v53  ;;  %5339 = vst [vmem:[#allocation32_spill] sm:$0xff] %v3990_v44  ;;  %v3995_v2 = vld [vmem:[#allocation5 + $0x190] sm:$0xff]  ;;  %v3998_v11 = vld [vmem:[#allocation5 + $0x198] sm:$0xff] }
 0x379   :  { %5340 = vst [vmem:[#allocation35_spill] sm:$0xff] %v3995_v2 }
 0x37a   :  { %v1267_v15 = vmul.f32 %v1261_v21, %v3731_v12  ;;  %1594 = vmatpush.msrb.mxu0 %v3987_v30  ;;  %1634 = vmatpush.msrb.mxu2 %v3990_v44  ;;  %5341 = vst [vmem:[#allocation36_spill] sm:$0xff] %v3998_v11  ;;  %v4008_v21 = vld [vmem:[#allocation5 + $0x178] sm:$0xff] }
 0x37b   :  { %5342 = vst [vmem:[#allocation39_spill] sm:$0xff] %v4005_v59  ;;  %v1488_v30 = vld [vmem:[#allocation2 + $0x3e] sm:$0x1] }
 0x37c   :  { %v3938_v8 = vadd.f32 %v1268_v23, %v1267_v15  ;;  %1595 = vmatpush.msrb.mxu0 %v3995_v2  ;;  %1635 = vmatpush.msrb.mxu2 %v3998_v11  ;;  %5343 = vst [vmem:[#allocation40_spill] sm:$0xff] %v4008_v21  ;;  %v4011_v15 = vld [vmem:[#allocation5 + $0x340] sm:$0xff]  ;;  %v4014_v23 = vld [vmem:[#allocation5 + $0x348] sm:$0xff] }
 0x37d   :  { %v2017_v60 = vpop.eup %2016  ;;  %5344 = vst [vmem:[#allocation45_spill] sm:$0xff] %v4011_v15 }
 0x37e   :  { %2018 = vtanh.f32 %v3938_v8  ;;  %v1265_v12 = vadd.f32 1.0, %v2017_v60  ;;  %1596 = vmatpush.msrb.mxu0 %v4005_v59  ;;  %1636 = vmatpush.msrb.mxu2 %v4008_v21  ;;  %5345 = vst [vmem:[#allocation46_spill] sm:$0xff] %v4014_v23  ;;  %v4017_v60 = vld [vmem:[#allocation5 + $0x150] sm:$0xff]  ;;  %v1481_v59 = vld [vmem:[#allocation2 + $0x6] sm:$0x1] }
 0x37f   :  { %5346 = vst [vmem:[#allocation49_spill] sm:$0xff] %v4017_v60  ;;  %v1483_v21 = vld [vmem:[#allocation2 + $0x16] sm:$0x1] }
 0x380   :  { %v1266_v3 = vmul.f32 0.5, %v1265_v12  ;;  %1597 = vmatpush.msrb.mxu0 %v4017_v60  ;;  %v4020_v12 = vld [vmem:[#allocation5 + $0x158] sm:$0xff]  ;;  %v4035_v60 = vld [vmem:[#allocation5 + $0x300] sm:$0xff] }
 0x381   :  { %5347 = vst [vmem:[#allocation51_spill] sm:$0xff] %v4020_v12  ;;  %1637 = vmatpush.msrb.mxu2 %v4020_v12  ;;  %v4038_v12 = vld [vmem:[#allocation5 + $0x308] sm:$0xff] }
 0x382   :  { %5352 = vst [vmem:[#allocation85_spill] sm:$0xff] %v4035_v60 }
 0x383   :  { %5353 = vst [vmem:[#allocation89_spill] sm:$0xff] %v4038_v12 }
 0x384   :  { %v2019_v16 = vpop.eup %2018 }
 0x385   :  { %v1271_v42 = vmul.f32 %v2019_v16, %v1266_v3  ;;  %v4023_v3 = vld [vmem:[#allocation5 + $0x320] sm:$0xff]  ;;  %v4026_v16 = vld [vmem:[#allocation5 + $0x328] sm:$0xff] }
 0x386   :  { %5348 = vst [vmem:[#allocation53_spill] sm:$0xff] %v4023_v3 }
 0x387   :  { %1339 = vmatmul.f32.vlgmr.msra.gmra.mxu1 %v1271_v42  ;;  %1379 = vmatmul.f32.vlgmr.msra.gmra.mxu3 %v1271_v42  ;;  %5349 = vst [vmem:[#allocation56_spill] sm:$0xff] %v4026_v16 }
 0x388   :  { %1532 = vmatpush.msra.mxu1 %v3746_v58  ;;  %1572 = vmatpush.msra.mxu3 %v3749_v33 }
 0x38a   :  { %1533 = vmatpush.msra.mxu1 %v3754_v36  ;;  %1573 = vmatpush.msra.mxu3 %v3757_v7  ;;  %v1509_v36 = vrot.slane %v1488_v30, 1 }
 0x38c   :  { %1534 = vmatpush.msra.mxu1 %v3762_v10  ;;  %1574 = vmatpush.msra.mxu3 %v3765_v13  ;;  %v1487_v13 = vld [vmem:[#allocation2 + $0x36] sm:$0x1] }
 0x38d   :  { %v1507_v7 = vrot.slane %v1487_v13, 2 }
 0x38e   :  { %1535 = vmatpush.msra.mxu1 %v3770_v45  ;;  %1575 = vmatpush.msra.mxu3 %v3773_v63 }
 0x38f   :  { %1419 = vmatmul.f32.vlgmr.msrb.gmra.mxu1 %v1271_v42  ;;  %1459 = vmatmul.f32.vlgmr.msrb.gmra.mxu3 %v1271_v42  ;;  %v4029_v42 = vld [vmem:[#allocation5 + $0x130] sm:$0xff] }
 0x390   :  { %1536 = vmatpush.msra.mxu1 %v3776_v50  ;;  %1576 = vmatpush.msra.mxu3 %v3779_v46  ;;  %5350 = vst [vmem:[#allocation58_spill] sm:$0xff] %v4029_v42  ;;  %v1484_v46 = vld [vmem:[#allocation2 + $0x1e] sm:$0x1]  ;;  %v1499_v50 = vrot.slane %v1483_v21, 6 }
 0x391   :  { %1598 = vmatpush.msrb.mxu0 %v4029_v42  ;;  %v4047_v42 = vld [vmem:[#allocation5 + $0x2e0] sm:$0xff]  ;;  %v1501_v45 = vrot.slane %v1484_v46, 5 }
 0x392   :  { %1537 = vmatpush.msra.mxu1 %v4011_v15  ;;  %1577 = vmatpush.msra.mxu3 %v4014_v23  ;;  %v4032_v23 = vld [vmem:[#allocation5 + $0x138] sm:$0xff]  ;;  %5356 = vst [vmem:[#allocation16_spill] sm:$0xff] %v4047_v42  ;;  %v1482_v15 = vld [vmem:[#allocation2 + $0xe] sm:$0x1] }
 0x393   :  { %5351 = vst [vmem:[#allocation62_spill] sm:$0xff] %v4032_v23  ;;  %1638 = vmatpush.msrb.mxu2 %v4032_v23  ;;  %v4050_v23 = vld [vmem:[#allocation5 + $0x2e8] sm:$0xff] }
 0x394   :  { %1538 = vmatpush.msra.mxu1 %v4023_v3  ;;  %1578 = vmatpush.msra.mxu3 %v4026_v16  ;;  %v4041_v3 = vld [vmem:[#allocation5 + $0x110] sm:$0xff]  ;;  %v4044_v16 = vld [vmem:[#allocation5 + $0x118] sm:$0xff]  ;;  %5357 = vst [vmem:[#allocation65_spill] sm:$0xff] %v4050_v23  ;;  %v1360_v44 = vpop.f32.mrf.mxu2 }
 0x395   :  { %5354 = vst [vmem:[#allocation60_spill] sm:$0xff] %v4041_v3  ;;  %1599 = vmatpush.msrb.mxu0 %v4041_v3  ;;  %1639 = vmatpush.msrb.mxu2 %v4044_v16  ;;  %v4059_v3 = vld [vmem:[#allocation5 + $0x2c0] sm:$0xff] }
 0x396   :  { %1539 = vmatpush.msra.mxu1 %v4035_v60  ;;  %1579 = vmatpush.msra.mxu3 %v4038_v12  ;;  %5355 = vst [vmem:[#allocation15_spill] sm:$0xff] %v4044_v16  ;;  %v4053_v60 = vld [vmem:[#allocation5 + $0xf0] sm:$0xff]  ;;  %v4056_v12 = vld [vmem:[#allocation5 + $0xf8] sm:$0xff]  ;;  %v4062_v16 = vld [vmem:[#allocation5 + $0x2c8] sm:$0xff] }
 0x397   :  { %5358 = vst [vmem:[#allocation17_spill] sm:$0xff] %v4053_v60  ;;  %1600 = vmatpush.msrb.mxu0 %v4053_v60  ;;  %1640 = vmatpush.msrb.mxu2 %v4056_v12  ;;  %v4071_v60 = vld [vmem:[#allocation5 + $0x2a0] sm:$0xff] }
 0x398   :  { %1540 = vmatpush.msra.mxu1 %v4047_v42  ;;  %1580 = vmatpush.msra.mxu3 %v4050_v23  ;;  %5359 = vst [vmem:[#allocation18_spill] sm:$0xff] %v4056_v12  ;;  %v4065_v42 = vld [vmem:[#allocation5 + $0xd0] sm:$0xff]  ;;  %v4068_v23 = vld [vmem:[#allocation5 + $0xd8] sm:$0xff]  ;;  %v4074_v12 = vld [vmem:[#allocation5 + $0x2a8] sm:$0xff] }
 0x399   :  { %5360 = vst [vmem:[#allocation67_spill] sm:$0xff] %v4059_v3  ;;  %1601 = vmatpush.msrb.mxu0 %v4065_v42  ;;  %1641 = vmatpush.msrb.mxu2 %v4068_v23 }
 0x39a   :  { %1541 = vmatpush.msra.mxu1 %v4059_v3  ;;  %5361 = vst [vmem:[#allocation69_spill] sm:$0xff] %v4062_v16  ;;  %1581 = vmatpush.msra.mxu3 %v4062_v16  ;;  %v4077_v3 = vld [vmem:[#allocation5 + $0xb0] sm:$0xff]  ;;  %v4080_v16 = vld [vmem:[#allocation5 + $0xb8] sm:$0xff] }
 0x39b   :  { %5362 = vst [vmem:[#allocation19_spill] sm:$0xff] %v4065_v42  ;;  %1602 = vmatpush.msrb.mxu0 %v4077_v3  ;;  %1642 = vmatpush.msrb.mxu2 %v4080_v16  ;;  %v4083_v42 = vld [vmem:[#allocation5 + $0x280] sm:$0xff] }
 0x39c   :  { %5363 = vst [vmem:[#allocation20_spill] sm:$0xff] %v4068_v23  ;;  %1542 = vmatpush.msra.mxu1 %v4071_v60  ;;  %1582 = vmatpush.msra.mxu3 %v4074_v12  ;;  %v4086_v23 = vld [vmem:[#allocation5 + $0x288] sm:$0xff] }
 0x39d   :  { %5364 = vst [vmem:[#allocation71_spill] sm:$0xff] %v4071_v60  ;;  %v4089_v60 = vld [vmem:[#allocation5 + $0x90] sm:$0xff] }
 0x39e   :  { %5365 = vst [vmem:[#allocation73_spill] sm:$0xff] %v4074_v12  ;;  %1543 = vmatpush.msra.mxu1 %v4083_v42  ;;  %1583 = vmatpush.msra.mxu3 %v4086_v23  ;;  %v4092_v12 = vld [vmem:[#allocation5 + $0x98] sm:$0xff]  ;;  %v1440_v30 = vpop.f32.mrf.mxu2 }
 0x39f   :  { %5366 = vst [vmem:[#allocation21_spill] sm:$0xff] %v4077_v3  ;;  %1603 = vmatpush.msrb.mxu0 %v4089_v60  ;;  %1643 = vmatpush.msrb.mxu2 %v4092_v12  ;;  %v4095_v3 = vld [vmem:[#allocation5 + $0x260] sm:$0xff] }
 0x3a0   :  { %5367 = vst [vmem:[#allocation22_spill] sm:$0xff] %v4080_v16  ;;  %1544 = vmatpush.msra.mxu1 %v4095_v3  ;;  %v4098_v16 = vld [vmem:[#allocation5 + $0x268] sm:$0xff] }
 0x3a1   :  { %5368 = vst [vmem:[#allocation75_spill] sm:$0xff] %v4083_v42  ;;  %1584 = vmatpush.msra.mxu3 %v4098_v16  ;;  %v4101_v42 = vld [vmem:[#allocation5 + $0x70] sm:$0xff] }
 0x3a2   :  { %5369 = vst [vmem:[#allocation77_spill] sm:$0xff] %v4086_v23  ;;  %1604 = vmatpush.msrb.mxu0 %v4101_v42  ;;  %v4104_v23 = vld [vmem:[#allocation5 + $0x78] sm:$0xff] }
 0x3a3   :  { %5370 = vst [vmem:[#allocation23_spill] sm:$0xff] %v4089_v60  ;;  %1644 = vmatpush.msrb.mxu2 %v4104_v23  ;;  %v4107_v60 = vld [vmem:[#allocation5 + $0x240] sm:$0xff] }
 0x3a4   :  { %5371 = vst [vmem:[#allocation24_spill] sm:$0xff] %v4092_v12  ;;  %1545 = vmatpush.msra.mxu1 %v4107_v60  ;;  %v4110_v12 = vld [vmem:[#allocation5 + $0x248] sm:$0xff] }
 0x3a5   :  { %5372 = vst [vmem:[#allocation79_spill] sm:$0xff] %v4095_v3  ;;  %1585 = vmatpush.msra.mxu3 %v4110_v12  ;;  %v4113_v3 = vld [vmem:[#allocation5 + $0x50] sm:$0xff] }
 0x3a6   :  { %5373 = vst [vmem:[#allocation81_spill] sm:$0xff] %v4098_v16  ;;  %1605 = vmatpush.msrb.mxu0 %v4113_v3  ;;  %v4116_v16 = vld [vmem:[#allocation5 + $0x58] sm:$0xff] }
 0x3a7   :  { %5374 = vst [vmem:[#allocation25_spill] sm:$0xff] %v4101_v42  ;;  %1645 = vmatpush.msrb.mxu2 %v4116_v16  ;;  %v4119_v42 = vld [vmem:[#allocation5 + $0x220] sm:$0xff] }
 0x3a8   :  { %5375 = vst [vmem:[#allocation26_spill] sm:$0xff] %v4104_v23  ;;  %1546 = vmatpush.msra.mxu1 %v4119_v42  ;;  %v4122_v23 = vld [vmem:[#allocation5 + $0x228] sm:$0xff] }
 0x3a9   :  { %5376 = vst [vmem:[#allocation83_spill] sm:$0xff] %v4107_v60  ;;  %1586 = vmatpush.msra.mxu3 %v4122_v23  ;;  %v4125_v60 = vld [vmem:[#allocation5 + $0x30] sm:$0xff] }
 0x3aa   :  { %5377 = vst [vmem:[#allocation29_spill] sm:$0xff] %v4110_v12  ;;  %1606 = vmatpush.msrb.mxu0 %v4125_v60  ;;  %v4128_v12 = vld [vmem:[#allocation5 + $0x38] sm:$0xff] }
 0x3ab   :  { %5378 = vst [vmem:[#allocation30_spill] sm:$0xff] %v4113_v3  ;;  %1646 = vmatpush.msrb.mxu2 %v4128_v12  ;;  %v4131_v3 = vld [vmem:[#allocation5 + $0x200] sm:$0xff] }
 0x3ac   :  { %5379 = vst [vmem:[#allocation87_spill] sm:$0xff] %v4116_v16  ;;  %1547 = vmatpush.msra.mxu1 %v4131_v3  ;;  %v4134_v16 = vld [vmem:[#allocation5 + $0x208] sm:$0xff] }
 0x3ad   :  { %5380 = vst [vmem:[#allocation33_spill] sm:$0xff] %v4119_v42  ;;  %1587 = vmatpush.msra.mxu3 %v4134_v16  ;;  %v4137_v42 = vld [vmem:[#allocation5 + $0x3f0] sm:$0xff] }
 0x3ae   :  { %5381 = vst [vmem:[#allocation34_spill] sm:$0xff] %v4122_v23  ;;  %1612 = vmatpush.msrb.mxu1 %v4137_v42  ;;  %v4140_v23 = vld [vmem:[#allocation5 + $0x3f8] sm:$0xff] }
 0x3af   :  { %5382 = vst [vmem:[#allocation92_spill] sm:$0xff] %v4125_v60  ;;  %1652 = vmatpush.msrb.mxu3 %v4140_v23  ;;  %v4143_v60 = vld [vmem:[#allocation5 + $0x10] sm:$0xff] }
 0x3b0   :  { %5383 = vst [vmem:[#allocation93_spill] sm:$0xff] %v4128_v12  ;;  %1607 = vmatpush.msrb.mxu0 %v4143_v60  ;;  %v4146_v12 = vld [vmem:[#allocation5 + $0x18] sm:$0xff] }
 0x3b1   :  { %5384 = vst [vmem:[#allocation37_spill] sm:$0xff] %v4131_v3  ;;  %1647 = vmatpush.msrb.mxu2 %v4146_v12  ;;  %v4149_v3 = vld [vmem:[#allocation5 + $0x3d0] sm:$0xff] }
 0x3b2   :  { %5385 = vst [vmem:[#allocation38_spill] sm:$0xff] %v4134_v16  ;;  %1613 = vmatpush.msrb.mxu1 %v4149_v3  ;;  %v4152_v16 = vld [vmem:[#allocation5 + $0x3d8] sm:$0xff] }
 0x3b3   :  { %5386 = vst [vmem:[#allocation95_spill] sm:$0xff] %v4137_v42  ;;  %1653 = vmatpush.msrb.mxu3 %v4152_v16  ;;  %v4155_v42 = vld [vmem:[#allocation5 + $0x3b0] sm:$0xff] }
 0x3b4   :  { %5387 = vst [vmem:[#allocation97_spill] sm:$0xff] %v4140_v23  ;;  %1614 = vmatpush.msrb.mxu1 %v4155_v42  ;;  %v4158_v23 = vld [vmem:[#allocation5 + $0x3b8] sm:$0xff] }
 0x3b5   :  { %5388 = vst [vmem:[#allocation41_spill] sm:$0xff] %v4143_v60  ;;  %1654 = vmatpush.msrb.mxu3 %v4158_v23  ;;  %v4161_v60 = vld [vmem:[#allocation5 + $0x390] sm:$0xff] }
 0x3b6   :  { %5389 = vst [vmem:[#allocation42_spill] sm:$0xff] %v4146_v12  ;;  %1615 = vmatpush.msrb.mxu1 %v4161_v60  ;;  %v4164_v12 = vld [vmem:[#allocation5 + $0x398] sm:$0xff] }
 0x3b7   :  { %5390 = vst [vmem:[#allocation99_spill] sm:$0xff] %v4149_v3  ;;  %1655 = vmatpush.msrb.mxu3 %v4164_v12  ;;  %v4167_v3 = vld [vmem:[#allocation5 + $0x370] sm:$0xff] }
 0x3b8   :  { %5391 = vst [vmem:[#allocation101_spill] sm:$0xff] %v4152_v16  ;;  %1616 = vmatpush.msrb.mxu1 %v4167_v3  ;;  %v4170_v16 = vld [vmem:[#allocation5 + $0x378] sm:$0xff] }
 0x3b9   :  { %5392 = vst [vmem:[#allocation47_spill] sm:$0xff] %v4155_v42  ;;  %1656 = vmatpush.msrb.mxu3 %v4170_v16  ;;  %v4173_v42 = vld [vmem:[#allocation5 + $0x350] sm:$0xff] }
 0x3ba   :  { %5393 = vst [vmem:[#allocation48_spill] sm:$0xff] %v4158_v23  ;;  %1617 = vmatpush.msrb.mxu1 %v4173_v42  ;;  %v4176_v23 = vld [vmem:[#allocation5 + $0x358] sm:$0xff] }
 0x3bb   :  { %5394 = vst [vmem:[#allocation50_spill] sm:$0xff] %v4161_v60  ;;  %1657 = vmatpush.msrb.mxu3 %v4176_v23  ;;  %v4179_v60 = vld [vmem:[#allocation5 + $0x330] sm:$0xff] }
 0x3bc   :  { %5395 = vst [vmem:[#allocation52_spill] sm:$0xff] %v4164_v12  ;;  %1618 = vmatpush.msrb.mxu1 %v4179_v60  ;;  %v4182_v12 = vld [vmem:[#allocation5 + $0x338] sm:$0xff] }
 0x3bd   :  { %5396 = vst [vmem:[#allocation103_spill] sm:$0xff] %v4167_v3  ;;  %1658 = vmatpush.msrb.mxu3 %v4182_v12  ;;  %v4185_v3 = vld [vmem:[#allocation5 + $0x310] sm:$0xff] }
 0x3be   :  { %5397 = vst [vmem:[#allocation105_spill] sm:$0xff] %v4170_v16  ;;  %1619 = vmatpush.msrb.mxu1 %v4185_v3  ;;  %v4188_v16 = vld [vmem:[#allocation5 + $0x318] sm:$0xff] }
 0x3bf   :  { %5398 = vst [vmem:[#allocation54_spill] sm:$0xff] %v4173_v42  ;;  %1659 = vmatpush.msrb.mxu3 %v4188_v16  ;;  %v4191_v42 = vld [vmem:[#allocation5 + $0x2f0] sm:$0xff] }
 0x3c0   :  { %5399 = vst [vmem:[#allocation55_spill] sm:$0xff] %v4176_v23  ;;  %1620 = vmatpush.msrb.mxu1 %v4191_v42  ;;  %v4194_v23 = vld [vmem:[#allocation5 + $0x2f8] sm:$0xff] }
 0x3c1   :  { %5400 = vst [vmem:[#allocation57_spill] sm:$0xff] %v4179_v60  ;;  %1660 = vmatpush.msrb.mxu3 %v4194_v23  ;;  %v4197_v60 = vld [vmem:[#allocation5 + $0x2d0] sm:$0xff] }
 0x3c2   :  { %5401 = vst [vmem:[#allocation59_spill] sm:$0xff] %v4182_v12  ;;  %1621 = vmatpush.msrb.mxu1 %v4197_v60  ;;  %v4200_v12 = vld [vmem:[#allocation5 + $0x2d8] sm:$0xff] }
 0x3c3   :  { %5402 = vst [vmem:[#allocation61_spill] sm:$0xff] %v4185_v3  ;;  %1661 = vmatpush.msrb.mxu3 %v4200_v12  ;;  %v4203_v3 = vld [vmem:[#allocation5 + $0x2b0] sm:$0xff] }
 0x3c4   :  { %5403 = vst [vmem:[#allocation63_spill] sm:$0xff] %v4188_v16  ;;  %1622 = vmatpush.msrb.mxu1 %v4203_v3  ;;  %v4206_v16 = vld [vmem:[#allocation5 + $0x2b8] sm:$0xff] }
 0x3c5   :  { %5404 = vst [vmem:[#allocation64_spill] sm:$0xff] %v4191_v42  ;;  %1662 = vmatpush.msrb.mxu3 %v4206_v16  ;;  %v4209_v42 = vld [vmem:[#allocation5 + $0x290] sm:$0xff] }
 0x3c6   :  { %5405 = vst [vmem:[#allocation66_spill] sm:$0xff] %v4194_v23  ;;  %1623 = vmatpush.msrb.mxu1 %v4209_v42  ;;  %v4212_v23 = vld [vmem:[#allocation5 + $0x298] sm:$0xff] }
 0x3c7   :  { %5406 = vst [vmem:[#allocation68_spill] sm:$0xff] %v4197_v60  ;;  %1663 = vmatpush.msrb.mxu3 %v4212_v23  ;;  %v4215_v60 = vld [vmem:[#allocation5 + $0x270] sm:$0xff] }
 0x3c8   :  { %5407 = vst [vmem:[#allocation70_spill] sm:$0xff] %v4200_v12  ;;  %1624 = vmatpush.msrb.mxu1 %v4215_v60  ;;  %v4218_v12 = vld [vmem:[#allocation5 + $0x278] sm:$0xff] }
 0x3c9   :  { %5408 = vst [vmem:[#allocation72_spill] sm:$0xff] %v4203_v3  ;;  %1664 = vmatpush.msrb.mxu3 %v4218_v12  ;;  %v4221_v3 = vld [vmem:[#allocation5 + $0x250] sm:$0xff] }
 0x3ca   :  { %5409 = vst [vmem:[#allocation74_spill] sm:$0xff] %v4206_v16  ;;  %1625 = vmatpush.msrb.mxu1 %v4221_v3  ;;  %v4224_v16 = vld [vmem:[#allocation5 + $0x258] sm:$0xff] }
 0x3cb   :  { %5410 = vst [vmem:[#allocation76_spill] sm:$0xff] %v4209_v42  ;;  %1665 = vmatpush.msrb.mxu3 %v4224_v16  ;;  %v4227_v42 = vld [vmem:[#allocation5 + $0x230] sm:$0xff] }
 0x3cc   :  { %5411 = vst [vmem:[#allocation78_spill] sm:$0xff] %v4212_v23  ;;  %1626 = vmatpush.msrb.mxu1 %v4227_v42  ;;  %v4230_v23 = vld [vmem:[#allocation5 + $0x238] sm:$0xff] }
 0x3cd   :  { %5412 = vst [vmem:[#allocation80_spill] sm:$0xff] %v4215_v60  ;;  %1666 = vmatpush.msrb.mxu3 %v4230_v23  ;;  %v4233_v60 = vld [vmem:[#allocation5 + $0x210] sm:$0xff] }
 0x3ce   :  { %5413 = vst [vmem:[#allocation82_spill] sm:$0xff] %v4218_v12  ;;  %1627 = vmatpush.msrb.mxu1 %v4233_v60  ;;  %v4236_v12 = vld [vmem:[#allocation5 + $0x218] sm:$0xff] }
 0x3cf   :  { %5414 = vst [vmem:[#allocation84_spill] sm:$0xff] %v4221_v3  ;;  %1667 = vmatpush.msrb.mxu3 %v4236_v12  ;;  %v1320_v3 = vpop.f32.mrf.mxu0 }
 0x3d0   :  { %5415 = vst [vmem:[#allocation86_spill] sm:$0xff] %v4224_v16  ;;  %v1497_v16 = vrot.slane %v1482_v15, 7 }
 0x3d1   :  { %5416 = vst [vmem:[#allocation88_spill] sm:$0xff] %v4227_v42  ;;  %v1485_v42 = vld [vmem:[#allocation2 + $0x26] sm:$0x1] }
 0x3d2   :  { %5417 = vst [vmem:[#allocation90_spill] sm:$0xff] %v4230_v23  ;;  %v1498_v63 = vsel %vm99_vm0, %v1497_v16, %v1481_v59  ;;  %v1486_v23 = vld [vmem:[#allocation2 + $0x2e] sm:$0x1]  ;;  %v1503_v2 = vrot.slane %v1485_v42, 4  ;;  %v5444_v42 = vld [vmem:[#allocation60_spill] sm:$0xff] }
 0x3d3   :  { %5418 = vst [vmem:[#allocation91_spill] sm:$0xff] %v4233_v60  ;;  %v1500_v11 = vsel %vm102_vm1, %v1499_v50, %v1498_v63  ;;  %v1321_v60 = vadd.f32 %v1320_v3, %v3008_v48  ;;  %v1505_v10 = vrot.slane %v1486_v23, 3  ;;  %v5441_v23 = vld [vmem:[#allocation62_spill] sm:$0xff] }
 0x3d4   :  { %5419 = vst [vmem:[#allocation94_spill] sm:$0xff] %v4236_v12  ;;  %v1502_v12 = vsel %vm105_vm2, %v1501_v45, %v1500_v11  ;;  %v1361_v45 = vadd.f32 %v1360_v44, %v3011_v47  ;;  %v5440_v11 = vld [vmem:[#allocation58_spill] sm:$0xff] }
 0x3d5   :  { %v1504_v15 = vsel %vm108_vm3, %v1503_v2, %v1502_v12  ;;  %v5443_v12 = vld [vmem:[#allocation89_spill] sm:$0xff] }
 0x3d6   :  { %v1506_v21 = vsel %vm111_vm4, %v1505_v10, %v1504_v15  ;;  %v5445_v15 = vld [vmem:[#allocation15_spill] sm:$0xff] }
 0x3d7   :  { %v1508_v46 = vsel %vm114_vm5, %v1507_v7, %v1506_v21  ;;  %v1400_v50 = vpop.f32.mrf.mxu0  ;;  %v5446_v21 = vld [vmem:[#allocation16_spill] sm:$0xff] }
 0x3d8   :  { %v1510_v63 = vsel %vm117_vm6, %v1509_v36, %v1508_v46  ;;  %v1401_v13 = vadd.f32 %v1400_v50, %v3022_v56  ;;  %v5448_v46 = vld [vmem:[#allocation17_spill] sm:$0xff] }
 0x3d9   :  { %1528 = vmatmul.f32.vlgmr.msra.gmra.mxu0 %v1510_v63  ;;  %1568 = vmatmul.f32.vlgmr.msra.gmra.mxu2 %v1510_v63  ;;  %v5451_v50 = vld [vmem:[#allocation69_spill] sm:$0xff] }
 0x3da   :  { %1721 = vmatpush.msra.mxu0 %v3869_v34  ;;  %1761 = vmatpush.msra.mxu2 %v3872_v29  ;;  %v1441_v34 = vadd.f32 %v1440_v30, %v3031_v6  ;;  %v5458_v30 = vld [vmem:[#allocation75_spill] sm:$0xff] }
 0x3dc   :  { %1722 = vmatpush.msra.mxu0 %v3876_v32  ;;  %1762 = vmatpush.msra.mxu2 %v3879_v43 }
 0x3de   :  { %1723 = vmatpush.msra.mxu0 %v3882_v41  ;;  %1763 = vmatpush.msra.mxu2 %v3885_v57 }
 0x3e0   :  { %1724 = vmatpush.msra.mxu0 %v3888_v40  ;;  %1764 = vmatpush.msra.mxu2 %v3891_v24 }
 0x3e1   :  { %1608 = vmatmul.f32.vlgmr.msrb.gmra.mxu0 %v1510_v63  ;;  %1648 = vmatmul.f32.vlgmr.msrb.gmra.mxu2 %v1510_v63  ;;  %v5450_v63 = vld [vmem:[#allocation67_spill] sm:$0xff] }
 0x3e2   :  { %1725 = vmatpush.msra.mxu0 %v3895_v52  ;;  %1765 = vmatpush.msra.mxu2 %v3898_v61 }
 0x3e4   :  { %1726 = vmatpush.msra.mxu0 %v3901_v18  ;;  %1766 = vmatpush.msra.mxu2 %v3904_v19 }
 0x3e6   :  { %1727 = vmatpush.msra.mxu0 %v3907_v62  ;;  %1767 = vmatpush.msra.mxu2 %v3910_v35 }
 0x3e8   :  { %1728 = vmatpush.msra.mxu0 %v3913_v54  ;;  %1768 = vmatpush.msra.mxu2 %v3916_v1 }
 0x3ea   :  { %1729 = vmatpush.msra.mxu0 %v3919_v17  ;;  %1769 = vmatpush.msra.mxu2 %v3922_v22 }
 0x3ec   :  { %1730 = vmatpush.msra.mxu0 %v3925_v25  ;;  %1770 = vmatpush.msra.mxu2 %v3928_v14  ;;  %v5420_v14 = vld [vmem:[#allocation104_spill] sm:$0xff] }
 0x3ee   :  { %1731 = vmatpush.msra.mxu0 %v3932_v0  ;;  %1771 = vmatpush.msra.mxu2 %v3935_v4  ;;  %v5421_v0 = vld [vmem:[#allocation106_spill] sm:$0xff]  ;;  %v5422_v4 = vld [vmem:[#allocation31_spill] sm:$0xff] }
 0x3f0   :  { %1732 = vmatpush.msra.mxu0 %v3940_v31  ;;  %1772 = vmatpush.msra.mxu2 %v3943_v55  ;;  %v5424_v31 = vld [vmem:[#allocation107_spill] sm:$0xff]  ;;  %v5425_v55 = vld [vmem:[#allocation108_spill] sm:$0xff] }
 0x3f2   :  { %1733 = vmatpush.msra.mxu0 %v3947_v20  ;;  %1773 = vmatpush.msra.mxu2 %v3950_v38  ;;  %v5426_v20 = vld [vmem:[#allocation35_spill] sm:$0xff]  ;;  %v5429_v38 = vld [vmem:[#allocation28_spill] sm:$0xff] }
 0x3f4   :  { %1734 = vmatpush.msra.mxu0 %v3953_v39  ;;  %1774 = vmatpush.msra.mxu2 %v3956_v27  ;;  %v5430_v39 = vld [vmem:[#allocation43_spill] sm:$0xff]  ;;  %v5431_v27 = vld [vmem:[#allocation44_spill] sm:$0xff] }
 0x3f6   :  { %1735 = vmatpush.msra.mxu0 %v3959_v26  ;;  %1775 = vmatpush.msra.mxu2 %v3962_v49  ;;  %v5432_v26 = vld [vmem:[#allocation39_spill] sm:$0xff]  ;;  %v5433_v49 = vld [vmem:[#allocation40_spill] sm:$0xff] }
 0x3f8   :  { %1736 = vmatpush.msra.mxu0 %v3965_v5  ;;  %1776 = vmatpush.msra.mxu2 %v3968_v28  ;;  %v5434_v5 = vld [vmem:[#allocation45_spill] sm:$0xff]  ;;  %v5435_v28 = vld [vmem:[#allocation46_spill] sm:$0xff] }
 0x3fa   :  { %1801 = vmatpush.msrb.mxu0 %v3971_v37  ;;  %1841 = vmatpush.msrb.mxu2 %v3974_v51  ;;  %v5436_v37 = vld [vmem:[#allocation49_spill] sm:$0xff]  ;;  %v5437_v51 = vld [vmem:[#allocation51_spill] sm:$0xff] }
 0x3fc   :  { %1802 = vmatpush.msrb.mxu0 %v3979_v9  ;;  %1842 = vmatpush.msrb.mxu2 %v3982_v53  ;;  %v5438_v9 = vld [vmem:[#allocation53_spill] sm:$0xff]  ;;  %v5439_v53 = vld [vmem:[#allocation56_spill] sm:$0xff] }
 0x3fe   :  { %1803 = vmatpush.msrb.mxu0 %v5422_v4  ;;  %v5481_v4 = vld [vmem:[#allocation101_spill] sm:$0xff] }
 0x400   :  { %1804 = vmatpush.msrb.mxu0 %v5426_v20  ;;  %v5485_v20 = vld [vmem:[#allocation52_spill] sm:$0xff] }
 0x402   :  { %1805 = vmatpush.msrb.mxu0 %v5432_v26  ;;  %v5491_v26 = vld [vmem:[#allocation59_spill] sm:$0xff] }
 0x404   :  { %v1340_v59 = vpop.f32.mrf.mxu1  ;;  %1806 = vmatpush.msrb.mxu0 %v5436_v37  ;;  %v5495_v37 = vld [vmem:[#allocation66_spill] sm:$0xff] }
 0x405   :  { %v1341_v16 = vadd.f32 %v1340_v59, %v1321_v60  ;;  %v5442_v60 = vld [vmem:[#allocation85_spill] sm:$0xff] }
 0x406   :  { %1807 = vmatpush.msrb.mxu0 %v5440_v11  ;;  %v5447_v59 = vld [vmem:[#allocation65_spill] sm:$0xff]  ;;  %v5499_v11 = vld [vmem:[#allocation74_spill] sm:$0xff] }
 0x407   :  { %v1463_v3 = vmul.f32 0.5, %v1341_v16  ;;  %v5449_v16 = vld [vmem:[#allocation18_spill] sm:$0xff] }
 0x408   :  { %1808 = vmatpush.msrb.mxu0 %v5444_v42  ;;  %v5503_v42 = vld [vmem:[#allocation82_spill] sm:$0xff] }
 0x409   :  { %2020 = vtanh.f32 %v1463_v3  ;;  %v5452_v3 = vld [vmem:[#allocation19_spill] sm:$0xff] }
 0x40a   :  { %v1380_v7 = vpop.f32.mrf.mxu3  ;;  %1809 = vmatpush.msrb.mxu0 %v5448_v46  ;;  %v5507_v46 = vld [vmem:[#allocation90_spill] sm:$0xff] }
 0x40b   :  { %v1381_v10 = vadd.f32 %v1380_v7, %v1361_v45  ;;  %v5453_v45 = vld [vmem:[#allocation20_spill] sm:$0xff]  ;;  %v5455_v7 = vld [vmem:[#allocation73_spill] sm:$0xff] }
 0x40c   :  { %v1420_v36 = vpop.f32.mrf.mxu1  ;;  %1810 = vmatpush.msrb.mxu0 %v5452_v3  ;;  %v1691_v3 = vld [vmem:[#allocation2 + $0xf] sm:$0x1] }
 0x40d   :  { %v1467_v44 = vmul.f32 0.5, %v1381_v10  ;;  %v1421_v2 = vadd.f32 %v1420_v36, %v1401_v13  ;;  %v5454_v13 = vld [vmem:[#allocation71_spill] sm:$0xff]  ;;  %v5456_v10 = vld [vmem:[#allocation21_spill] sm:$0xff]  ;;  %v5457_v36 = vld [vmem:[#allocation22_spill] sm:$0xff] }
 0x40e   :  { %1811 = vmatpush.msrb.mxu0 %v5456_v10  ;;  %v1693_v10 = vld [vmem:[#allocation2 + $0x1f] sm:$0x1] }
 0x40f   :  { %2022 = vtanh.f32 %v1467_v44  ;;  %v2021_v29 = vpop.eup %2020  ;;  %v5459_v44 = vld [vmem:[#allocation77_spill] sm:$0xff] }
 0x410   :  { %2024 = vtanh.f32 %v1421_v2  ;;  %v1465_v41 = vadd.f32 1.0, %v2021_v29  ;;  %v5460_v2 = vld [vmem:[#allocation23_spill] sm:$0xff] }
 0x411   :  { %1812 = vmatpush.msrb.mxu0 %v5460_v2  ;;  %v5462_v29 = vld [vmem:[#allocation79_spill] sm:$0xff]  ;;  %v1710_v2 = vrot.slane %v1693_v10, 5  ;;  %v1905_v10 = vld [vmem:[#allocation8 + $0x30] sm:$0xff] }
 0x412   :  { %v1460_v32 = vpop.f32.mrf.mxu3  ;;  %v1466_v61 = vmul.f32 0.5, %v1465_v41  ;;  %v5465_v41 = vld [vmem:[#allocation26_spill] sm:$0xff] }
 0x413   :  { %v1461_v43 = vadd.f32 %v1460_v32, %v1441_v34  ;;  %v5461_v34 = vld [vmem:[#allocation24_spill] sm:$0xff]  ;;  %v5463_v32 = vld [vmem:[#allocation81_spill] sm:$0xff] }
 0x415   :  { %v2023_v57 = vpop.eup %2022  ;;  %v1472_v40 = vmul.f32 0.5, %v1461_v43  ;;  %v5464_v43 = vld [vmem:[#allocation25_spill] sm:$0xff] }
 0x416   :  { %v1469_v24 = vadd.f32 1.0, %v2023_v57  ;;  %v2025_v52 = vpop.eup %2024  ;;  %1813 = vmatpush.msrb.mxu0 %v5464_v43  ;;  %v5466_v57 = vld [vmem:[#allocation83_spill] sm:$0xff] }
 0x417   :  { %2026 = vtanh.f32 %v1472_v40  ;;  %v1477_v62 = vmul.f32 %v2025_v52, %v1466_v61  ;;  %v5467_v40 = vld [vmem:[#allocation29_spill] sm:$0xff]  ;;  %v5469_v52 = vld [vmem:[#allocation87_spill] sm:$0xff] }
 0x418   :  { %v1470_v18 = vmul.f32 0.5, %v1469_v24  ;;  %v5468_v24 = vld [vmem:[#allocation30_spill] sm:$0xff]  ;;  %v5470_v61 = vld [vmem:[#allocation33_spill] sm:$0xff] }
 0x419   :  { %1814 = vmatpush.msrb.mxu0 %v5468_v24 }
 0x41a   :  { %v1476_v19 = vmul.f32 %v1470_v18, %v3938_v8  ;;  %v5423_v8 = vld [vmem:[#allocation32_spill] sm:$0xff]  ;;  %v5471_v18 = vld [vmem:[#allocation34_spill] sm:$0xff] }
 0x41b   :  { %1843 = vmatpush.msrb.mxu2 %v5423_v8  ;;  %v5482_v8 = vld [vmem:[#allocation47_spill] sm:$0xff] }
 0x41c   :  { %v4273_v35 = vadd.f32 %v1477_v62, %v1476_v19  ;;  %v5472_v19 = vld [vmem:[#allocation92_spill] sm:$0xff]  ;;  %v5473_v62 = vld [vmem:[#allocation93_spill] sm:$0xff] }
 0x41d   :  { %v2027_v54 = vpop.eup %2026  ;;  %1815 = vmatpush.msrb.mxu0 %v5472_v19 }
 0x41e   :  { %2028 = vtanh.f32 %v4273_v35  ;;  %v1474_v1 = vadd.f32 1.0, %v2027_v54  ;;  %v5474_v54 = vld [vmem:[#allocation37_spill] sm:$0xff] }
 0x420   :  { %v1475_v17 = vmul.f32 0.5, %v1474_v1  ;;  %v5475_v1 = vld [vmem:[#allocation38_spill] sm:$0xff] }
 0x424   :  { %v2029_v22 = vpop.eup %2028 }
 0x425   :  { %v1480_v25 = vmul.f32 %v2029_v22, %v1475_v17  ;;  %v5476_v17 = vld [vmem:[#allocation95_spill] sm:$0xff]  ;;  %v5477_v22 = vld [vmem:[#allocation97_spill] sm:$0xff] }
 0x427   :  { %1548 = vmatmul.f32.vlgmr.msra.gmra.mxu1 %v1480_v25  ;;  %1588 = vmatmul.f32.vlgmr.msra.gmra.mxu3 %v1480_v25 }
 0x428   :  { %1741 = vmatpush.msra.mxu1 %v3746_v58  ;;  %1781 = vmatpush.msra.mxu3 %v3749_v33  ;;  %v5427_v58 = vld [vmem:[#allocation36_spill] sm:$0xff]  ;;  %v5428_v33 = vld [vmem:[#allocation27_spill] sm:$0xff] }
 0x429   :  { %1844 = vmatpush.msrb.mxu2 %v5427_v58  ;;  %v5486_v58 = vld [vmem:[#allocation103_spill] sm:$0xff] }
 0x42a   :  { %1742 = vmatpush.msra.mxu1 %v5420_v14  ;;  %1782 = vmatpush.msra.mxu3 %v5421_v0  ;;  %v5479_v14 = vld [vmem:[#allocation42_spill] sm:$0xff]  ;;  %v5480_v0 = vld [vmem:[#allocation99_spill] sm:$0xff] }
 0x42b   :  { %1845 = vmatpush.msrb.mxu2 %v5433_v49  ;;  %v5492_v49 = vld [vmem:[#allocation61_spill] sm:$0xff] }
 0x42c   :  { %1743 = vmatpush.msra.mxu1 %v5424_v31  ;;  %1783 = vmatpush.msra.mxu3 %v5425_v55  ;;  %v5483_v31 = vld [vmem:[#allocation48_spill] sm:$0xff]  ;;  %v5484_v55 = vld [vmem:[#allocation50_spill] sm:$0xff] }
 0x42d   :  { %1846 = vmatpush.msrb.mxu2 %v5437_v51  ;;  %v5496_v51 = vld [vmem:[#allocation68_spill] sm:$0xff] }
 0x42e   :  { %1744 = vmatpush.msra.mxu1 %v5428_v33  ;;  %1784 = vmatpush.msra.mxu3 %v5429_v38  ;;  %v5487_v33 = vld [vmem:[#allocation105_spill] sm:$0xff]  ;;  %v5488_v38 = vld [vmem:[#allocation54_spill] sm:$0xff] }
 0x42f   :  { %1628 = vmatmul.f32.vlgmr.msrb.gmra.mxu1 %v1480_v25  ;;  %1668 = vmatmul.f32.vlgmr.msrb.gmra.mxu3 %v1480_v25  ;;  %v5478_v25 = vld [vmem:[#allocation41_spill] sm:$0xff] }
 0x430   :  { %1745 = vmatpush.msra.mxu1 %v5430_v39  ;;  %1785 = vmatpush.msra.mxu3 %v5431_v27  ;;  %v5489_v39 = vld [vmem:[#allocation55_spill] sm:$0xff]  ;;  %v5490_v27 = vld [vmem:[#allocation57_spill] sm:$0xff] }
 0x431   :  { %1847 = vmatpush.msrb.mxu2 %v5441_v23  ;;  %1816 = vmatpush.msrb.mxu0 %v5478_v25  ;;  %v5500_v23 = vld [vmem:[#allocation76_spill] sm:$0xff] }
 0x432   :  { %1746 = vmatpush.msra.mxu1 %v5434_v5  ;;  %1786 = vmatpush.msra.mxu3 %v5435_v28  ;;  %v5493_v5 = vld [vmem:[#allocation63_spill] sm:$0xff]  ;;  %v5494_v28 = vld [vmem:[#allocation64_spill] sm:$0xff] }
 0x433   :  { %1848 = vmatpush.msrb.mxu2 %v5445_v15  ;;  %v5504_v15 = vld [vmem:[#allocation84_spill] sm:$0xff] }
 0x434   :  { %1747 = vmatpush.msra.mxu1 %v5438_v9  ;;  %1787 = vmatpush.msra.mxu3 %v5439_v53  ;;  %v5497_v9 = vld [vmem:[#allocation70_spill] sm:$0xff]  ;;  %v5498_v53 = vld [vmem:[#allocation72_spill] sm:$0xff] }
 0x435   :  { %1849 = vmatpush.msrb.mxu2 %v5449_v16  ;;  %v5508_v16 = vld [vmem:[#allocation91_spill] sm:$0xff] }
 0x436   :  { %1748 = vmatpush.msra.mxu1 %v5442_v60  ;;  %1788 = vmatpush.msra.mxu3 %v5443_v12  ;;  %v5501_v60 = vld [vmem:[#allocation78_spill] sm:$0xff]  ;;  %v5502_v12 = vld [vmem:[#allocation80_spill] sm:$0xff] }
 0x437   :  { %1850 = vmatpush.msrb.mxu2 %v5453_v45  ;;  %v1692_v45 = vld [vmem:[#allocation2 + $0x17] sm:$0x1] }
 0x438   :  { %1749 = vmatpush.msra.mxu1 %v5446_v21  ;;  %1789 = vmatpush.msra.mxu3 %v5447_v59  ;;  %v5505_v21 = vld [vmem:[#allocation86_spill] sm:$0xff]  ;;  %v5506_v59 = vld [vmem:[#allocation88_spill] sm:$0xff] }
 0x439   :  { %1851 = vmatpush.msrb.mxu2 %v5457_v36  ;;  %v1708_v36 = vrot.slane %v1692_v45, 6  ;;  %v1908_v45 = vld [vmem:[#allocation8 + $0x48] sm:$0xff] }
 0x43a   :  { %1750 = vmatpush.msra.mxu1 %v5450_v63  ;;  %1790 = vmatpush.msra.mxu3 %v5451_v50  ;;  %v5509_v63 = vld [vmem:[#allocation94_spill] sm:$0xff] }
 0x43b   :  { %1852 = vmatpush.msrb.mxu2 %v5461_v34  ;;  %v1695_v34 = vld [vmem:[#allocation2 + $0x2f] sm:$0x1] }
 0x43c   :  { %1751 = vmatpush.msra.mxu1 %v5454_v13  ;;  %1791 = vmatpush.msra.mxu3 %v5455_v7  ;;  %v1706_v13 = vrot.slane %v1691_v3, 7  ;;  %v1690_v7 = vld [vmem:[#allocation2 + $0x7] sm:$0x1]  ;;  %v1909_v3 = vld [vmem:[#allocation8 + $0x50] sm:$0xff] }
 0x43d   :  { %1853 = vmatpush.msrb.mxu2 %v5465_v41  ;;  %v1696_v41 = vld [vmem:[#allocation2 + $0x37] sm:$0x1] }
 0x43e   :  { %1752 = vmatpush.msra.mxu1 %v5458_v30  ;;  %1792 = vmatpush.msra.mxu3 %v5459_v44  ;;  %v1694_v30 = vld [vmem:[#allocation2 + $0x27] sm:$0x1]  ;;  %v1707_v44 = vsel %vm99_vm0, %v1706_v13, %v1690_v7  ;;  %v1906_v7 = vld [vmem:[#allocation8 + $0x38] sm:$0xff] }
 0x43f   :  { %1854 = vmatpush.msrb.mxu2 %v5469_v52  ;;  %v1697_v52 = vld [vmem:[#allocation2 + $0x3f] sm:$0x1]  ;;  %v1907_v13 = vld [vmem:[#allocation8 + $0x40] sm:$0xff] }
 0x440   :  { %1753 = vmatpush.msra.mxu1 %v5462_v29  ;;  %1793 = vmatpush.msra.mxu3 %v5463_v32  ;;  %v1709_v29 = vsel %vm102_vm1, %v1708_v36, %v1707_v44  ;;  %v1712_v32 = vrot.slane %v1694_v30, 4  ;;  %v1904_v30 = vld [vmem:[#allocation8 + $0x28] sm:$0xff]  ;;  %v1903_v44 = vld [vmem:[#allocation8 + $0x20] sm:$0xff] }
 0x441   :  { %1855 = vmatpush.msrb.mxu2 %v5473_v62  ;;  %v1718_v62 = vrot.slane %v1697_v52, 1 }
 0x442   :  { %1754 = vmatpush.msra.mxu1 %v5466_v57  ;;  %1794 = vmatpush.msra.mxu3 %v5467_v40  ;;  %v1711_v57 = vsel %vm105_vm2, %v1710_v2, %v1709_v29  ;;  %v1714_v40 = vrot.slane %v1695_v34, 3  ;;  %v1902_v2 = vld [vmem:[#allocation8 + $0x18] sm:$0xff] }
 0x443   :  { %1856 = vmatpush.msrb.mxu2 %v5479_v14 }
 0x444   :  { %1755 = vmatpush.msra.mxu1 %v5470_v61  ;;  %1795 = vmatpush.msra.mxu3 %v5471_v18  ;;  %v1713_v61 = vsel %vm108_vm3, %v1712_v32, %v1711_v57  ;;  %v1716_v18 = vrot.slane %v1696_v41, 2  ;;  %v1901_v32 = vld [vmem:[#allocation8 + $0x10] sm:$0xff]  ;;  %v1900_v41 = vld [vmem:[#allocation8 + $0x8] sm:$0xff] }
 0x445   :  { %v1715_v19 = vsel %vm111_vm4, %v1714_v40, %v1713_v61  ;;  %v1899_v40 = vld [vmem:[#allocation8] sm:$0xff] }
 0x446   :  { %1756 = vmatpush.msra.mxu1 %v5474_v54  ;;  %1796 = vmatpush.msra.mxu3 %v5475_v1  ;;  %v1717_v1 = vsel %vm114_vm5, %v1716_v18, %v1715_v19 }
 0x448   :  { %1821 = vmatpush.msrb.mxu1 %v5476_v17  ;;  %1861 = vmatpush.msrb.mxu3 %v5477_v22  ;;  %v1719_v22 = vsel %vm117_vm6, %v1718_v62, %v1717_v1 }
 0x449   :  { %1737 = vmatmul.f32.vlgmr.msra.gmra.mxu0 %v1719_v22  ;;  %1777 = vmatmul.f32.vlgmr.msra.gmra.mxu2 %v1719_v22 }
 0x44a   :  { %1822 = vmatpush.msrb.mxu1 %v5480_v0  ;;  %1862 = vmatpush.msrb.mxu3 %v5481_v4 }
 0x44c   :  { %1823 = vmatpush.msrb.mxu1 %v5482_v8  ;;  %1863 = vmatpush.msrb.mxu3 %v5483_v31 }
 0x44e   :  { %1824 = vmatpush.msrb.mxu1 %v5484_v55  ;;  %1864 = vmatpush.msrb.mxu3 %v5485_v20 }
 0x450   :  { %1825 = vmatpush.msrb.mxu1 %v5486_v58  ;;  %1865 = vmatpush.msrb.mxu3 %v5487_v33 }
 0x451   :  { %1817 = vmatmul.f32.vlgmr.msrb.gmra.mxu0 %v1719_v22  ;;  %1857 = vmatmul.f32.vlgmr.msrb.gmra.mxu2 %v1719_v22 }
 0x452   :  { %1826 = vmatpush.msrb.mxu1 %v5488_v38  ;;  %1866 = vmatpush.msrb.mxu3 %v5489_v39 }
 0x454   :  { %1827 = vmatpush.msrb.mxu1 %v5490_v27  ;;  %1867 = vmatpush.msrb.mxu3 %v5491_v26 }
 0x456   :  { %1828 = vmatpush.msrb.mxu1 %v5492_v49  ;;  %1868 = vmatpush.msrb.mxu3 %v5493_v5  ;;  %v1529_v50 = vpop.f32.mrf.mxu0 }
 0x457   :  { %v1530_v43 = vadd.f32 %v1529_v50, %v3008_v48  ;;  %v1910_v50 = vld [vmem:[#allocation8 + $0x58] sm:$0xff] }
 0x458   :  { %1829 = vmatpush.msrb.mxu1 %v5494_v28  ;;  %1869 = vmatpush.msrb.mxu3 %v5495_v37 }
 0x45a   :  { %1830 = vmatpush.msrb.mxu1 %v5496_v51  ;;  %1870 = vmatpush.msrb.mxu3 %v5497_v9 }
 0x45c   :  { %1831 = vmatpush.msrb.mxu1 %v5498_v53  ;;  %1871 = vmatpush.msrb.mxu3 %v5499_v11  ;;  %v1569_v24 = vpop.f32.mrf.mxu2 }
 0x45d   :  { %v1570_v0 = vadd.f32 %v1569_v24, %v3011_v47 }
 0x45e   :  { %1832 = vmatpush.msrb.mxu1 %v5500_v23  ;;  %1872 = vmatpush.msrb.mxu3 %v5501_v60  ;;  %v1609_v25 = vpop.f32.mrf.mxu0 }
 0x45f   :  { %v1610_v4 = vadd.f32 %v1609_v25, %v3022_v56 }
 0x460   :  { %1833 = vmatpush.msrb.mxu1 %v5502_v12  ;;  %1873 = vmatpush.msrb.mxu3 %v5503_v42 }
 0x462   :  { %1834 = vmatpush.msrb.mxu1 %v5504_v15  ;;  %1874 = vmatpush.msrb.mxu3 %v5505_v21 }
 0x464   :  { %1835 = vmatpush.msrb.mxu1 %v5506_v59  ;;  %1875 = vmatpush.msrb.mxu3 %v5507_v46  ;;  %v1649_v20 = vpop.f32.mrf.mxu2  ;;  %v1914_v46 = vld [vmem:[#allocation8 + $0x78] sm:$0xff] }
 0x465   :  { %v1650_v38 = vadd.f32 %v1649_v20, %v3031_v6  ;;  %1919 = vmatpush.msra.mxu0 %v1914_v46 }
 0x466   :  { %1836 = vmatpush.msrb.mxu1 %v5508_v16  ;;  %1876 = vmatpush.msrb.mxu3 %v5509_v63  ;;  %v1913_v16 = vld [vmem:[#allocation8 + $0x70] sm:$0xff]  ;;  %v1912_v63 = vld [vmem:[#allocation8 + $0x68] sm:$0xff] }
 0x467   :  { %1920 = vmatpush.msra.mxu0 %v1913_v16 }
 0x469   :  { %1921 = vmatpush.msra.mxu0 %v1912_v63 }
 0x4a4   :  { %v1549_v54 = vpop.f32.mrf.mxu1 }
 0x4a5   :  { %v1550_v17 = vadd.f32 %v1549_v54, %v1530_v43 }
 0x4a7   :  { %v1672_v14 = vmul.f32 0.5, %v1550_v17 }
 0x4a9   :  { %2030 = vtanh.f32 %v1672_v14 }
 0x4aa   :  { %v1589_v8 = vpop.f32.mrf.mxu3 }
 0x4ab   :  { %v1590_v31 = vadd.f32 %v1589_v8, %v1570_v0 }
 0x4ac   :  { %v1629_v55 = vpop.f32.mrf.mxu1 }
 0x4ad   :  { %v1676_v58 = vmul.f32 0.5, %v1590_v31  ;;  %v1630_v33 = vadd.f32 %v1629_v55, %v1610_v4 }
 0x4af   :  { %2032 = vtanh.f32 %v1676_v58  ;;  %v2031_v39 = vpop.eup %2030 }
 0x4b0   :  { %2034 = vtanh.f32 %v1630_v33  ;;  %v1674_v49 = vadd.f32 1.0, %v2031_v39 }
 0x4b2   :  { %v1669_v27 = vpop.f32.mrf.mxu3  ;;  %v1675_v9 = vmul.f32 0.5, %v1674_v49 }
 0x4b3   :  { %v1670_v26 = vadd.f32 %v1669_v27, %v1650_v38 }
 0x4b5   :  { %v2033_v5 = vpop.eup %2032  ;;  %v1681_v28 = vmul.f32 0.5, %v1670_v26 }
 0x4b6   :  { %v1678_v37 = vadd.f32 1.0, %v2033_v5  ;;  %v2035_v51 = vpop.eup %2034  ;;  %v1969_v5 = vld [vmem:[%s4412_s4] ss:$0 sm:$0xff] }
 0x4b7   :  { %2036 = vtanh.f32 %v1681_v28  ;;  %v1686_v23 = vmul.f32 %v2035_v51, %v1675_v9 }
 0x4b8   :  { %v1679_v53 = vmul.f32 0.5, %v1678_v37 }
 0x4ba   :  { %v1685_v11 = vmul.f32 %v1679_v53, %v4273_v35  ;;  %v1911_v35 = vld [vmem:[#allocation8 + $0x60] sm:$0xff] }
 0x4bb   :  { %1922 = vmatpush.msra.mxu0 %v1911_v35 }
 0x4bc   :  { %v4394_v60 = vadd.f32 %v1686_v23, %v1685_v11 }
 0x4bd   :  { %v2037_v12 = vpop.eup %2036  ;;  %1923 = vmatpush.msra.mxu0 %v1910_v50 }
 0x4be   :  { %2038 = vtanh.f32 %v4394_v60  ;;  %v1683_v42 = vadd.f32 1.0, %v2037_v12 }
 0x4bf   :  { %1924 = vmatpush.msra.mxu0 %v1909_v3 }
 0x4c0   :  { %v1684_v15 = vmul.f32 0.5, %v1683_v42 }
 0x4c1   :  { %1925 = vmatpush.msra.mxu0 %v1908_v45 }
 0x4c3   :  { %1926 = vmatpush.msra.mxu0 %v1907_v13 }
 0x4c4   :  { %v2039_v21 = vpop.eup %2038 }
 0x4c5   :  { %v1689_v59 = vmul.f32 %v2039_v21, %v1684_v15  ;;  %1927 = vmatpush.msra.mxu0 %v1906_v7 }
 0x4c6   :  { %v1738_v36 = vpop.f32.mrf.mxu0 }
 0x4c7   :  { %1757 = vmatmul.f32.vlgmr.msra.gmra.mxu1 %v1689_v59  ;;  %1797 = vmatmul.f32.vlgmr.msra.gmra.mxu3 %v1689_v59  ;;  %v1739_v34 = vadd.f32 %v1738_v36, %v3008_v48 }
 0x4c8   :  { %1928 = vmatpush.msra.mxu0 %v1905_v10 }
 0x4ca   :  { %1929 = vmatpush.msra.mxu0 %v1904_v30 }
 0x4cc   :  { %1930 = vmatpush.msra.mxu0 %v1903_v44  ;;  %v1778_v29 = vpop.f32.mrf.mxu2 }
 0x4cd   :  { %v1779_v61 = vadd.f32 %v1778_v29, %v3011_v47 }
 0x4ce   :  { %1931 = vmatpush.msra.mxu0 %v1902_v2  ;;  %v1818_v24 = vpop.f32.mrf.mxu0 }
 0x4cf   :  { %1837 = vmatmul.f32.vlgmr.msrb.gmra.mxu1 %v1689_v59  ;;  %1877 = vmatmul.f32.vlgmr.msrb.gmra.mxu3 %v1689_v59  ;;  %v1819_v18 = vadd.f32 %v1818_v24, %v3022_v56 }
 0x4d0   :  { %1932 = vmatpush.msra.mxu0 %v1901_v32 }
 0x4d2   :  { %1933 = vmatpush.msra.mxu0 %v1900_v41 }
 0x4d4   :  { %1934 = vmatpush.msra.mxu0 %v1899_v40  ;;  %v1858_v54 = vpop.f32.mrf.mxu2 }
 0x4d5   :  { %v1859_v22 = vadd.f32 %v1858_v54, %v3031_v6 }
 0x544   :  { %v1758_v43 = vpop.f32.mrf.mxu1 }
 0x545   :  { %v1759_v57 = vadd.f32 %v1758_v43, %v1739_v34 }
 0x547   :  { %v1881_v52 = vmul.f32 0.5, %v1759_v57 }
 0x549   :  { %2040 = vtanh.f32 %v1881_v52 }
 0x54a   :  { %v1798_v19 = vpop.f32.mrf.mxu3 }
 0x54b   :  { %v1799_v62 = vadd.f32 %v1798_v19, %v1779_v61 }
 0x54c   :  { %v1838_v48 = vpop.f32.mrf.mxu1 }
 0x54d   :  { %v1885_v1 = vmul.f32 0.5, %v1799_v62  ;;  %v1839_v17 = vadd.f32 %v1838_v48, %v1819_v18 }
 0x54f   :  { %2042 = vtanh.f32 %v1885_v1  ;;  %v2041_v25 = vpop.eup %2040 }
 0x550   :  { %2044 = vtanh.f32 %v1839_v17  ;;  %v1883_v4 = vadd.f32 1.0, %v2041_v25 }
 0x552   :  { %v1878_v14 = vpop.f32.mrf.mxu3  ;;  %v1884_v56 = vmul.f32 0.5, %v1883_v4 }
 0x553   :  { %v1879_v0 = vadd.f32 %v1878_v14, %v1859_v22 }
 0x555   :  { %v2043_v8 = vpop.eup %2042  ;;  %v1890_v47 = vmul.f32 0.5, %v1879_v0 }
 0x556   :  { %v1887_v31 = vadd.f32 1.0, %v2043_v8  ;;  %v2045_v55 = vpop.eup %2044 }
 0x557   :  { %2046 = vtanh.f32 %v1890_v47  ;;  %v1895_v33 = vmul.f32 %v2045_v55, %v1884_v56 }
 0x558   :  { %v1888_v20 = vmul.f32 0.5, %v1887_v31 }
 0x55a   :  { %v1894_v58 = vmul.f32 %v1888_v20, %v4394_v60 }
 0x55c   :  { %v1896_v38 = vadd.f32 %v1895_v33, %v1894_v58 }
 0x55d   :  { %v2047_v39 = vpop.eup %2046 }
 0x55e   :  { %2048 = vtanh.f32 %v1896_v38  ;;  %v1892_v27 = vadd.f32 1.0, %v2047_v39 }
 0x560   :  { %v1893_v6 = vmul.f32 0.5, %v1892_v27 }
 0x564   :  { %v2049_v26 = vpop.eup %2048 }
 0x565   :  { %v1898_v49 = vmul.f32 %v2049_v26, %v1893_v6 }
 0x567   :  { %1935 = vmatmul.f32.vlgmr.msra.gmra.mxu0 %v1898_v49 }
 0x5e4   :  { %v1936_v28 = vpop.f32.mrf.mxu0 }
 0x5e5   :  { %v1937_v37 = vadd.f32 %v1969_v5, %v1936_v28 }
 0x5e7   :  { %1939 = vst [vmem:[#allocation10] sm:$0xff] %v1937_v37 }
 0x5e8   :  { %1950 = dma.vmem_to_hbm [thread:$0]  %s1946_s16, 128, %s1948_s19, [#allocation4]  }
 0x5e9   :  { %2432 = dma.done.wait [#allocation4], 128  }
 0x5ea   :  { %2433 = vsyncadd [#allocation4], 4294967168 }
 0x5eb   :  { %1955 = vsyncpa [#allocation3], 1 }
 0x5ec   :  { %1956 = vsyncpa [#allocation6], 1 }
 0x5ed   :  { %1957 = vsyncpa [#allocation9], 1 }
 0x5ee   :  { %1958 = vsyncpa [#allocation4], 1 }

</bundles_post_ra>
